<compile_context>
chip_gen: v7x
topology: tpu7x:2x2x1
jax: 0.10.0
libtpu: 0.0.40
codegen_flags: <defaults>
</compile_context>

<pallas_src>
import functools

import jax
import jax.numpy as jnp
from jax.experimental import pallas as pl
from jax.experimental.pallas import tpu as pltpu

_EPS = 1e-5    # PyTorch BatchNorm2d default eps
_LANE = 128    # TPU lane width


def _round_up(x, m):
    return ((x + m - 1) // m) * m


def _basic_block_kernel(*refs, TR, Wo, Cp_in, Cp_out, stride, has_downsample):
    """One (batch element, output-row tile) per grid step.

    refs (with downsample):
      xp, w1, s1, b1, w2, s2, b2, wd, sd, bd, out, mid_scratch
    refs (without downsample):
      xp, w1, s1, b1, w2, s2, b2, out, mid_scratch

    xp : (1, Hp, Wp_in, Cp_in)   zero-padded NHWC input (lane-padded channels,
                                 `stride` extra halo rows top / bottom)
    w1 : (3, 3, Cp_in, Cp_out)   conv1 weights (HWIO, lane-padded)
    w2 : (3, 3, Cp_out, Cp_out)  conv2 weights
    wd : (Cp_in, Cp_out)         1x1 downsample weight
    s*/b* : (1, Cp_out)          folded BatchNorm scale / bias (f32)
    out: (1, TR, Wo, Cp_out)     one output-row tile
    mid: (TR+2, Wp_mid, Cp_out)  VMEM scratch holding the zero-haloed conv1 rows
    """
    if has_downsample:
        (xp_ref, w1_ref, s1_ref, b1_ref, w2_ref, s2_ref, b2_ref,
         wd_ref, sd_ref, bd_ref, o_ref, mid_ref) = refs
    else:
        (xp_ref, w1_ref, s1_ref, b1_ref, w2_ref, s2_ref, b2_ref,
         o_ref, mid_ref) = refs

    r = pl.program_id(1)
    last = pl.num_programs(1) - 1
    band_rows = (TR + 1) * stride + 3          # input rows feeding TR+2 conv1 rows
    row0 = r * (TR * stride)                   # first input row of this tile's band

    # Input band for this tile (tile rows + the 1-row conv2 halo it recomputes).
    xb = xp_ref[0, pl.ds(row0, band_rows), :, :]     # (band_rows, Wp_in, Cp_in)

    def tap(kh, kw, nrows, roff):
        # (nrows, Wo, Cp_in) tap patch; roff = conv1-row offset inside the band.
        r0 = roff * stride + kh
        return jax.lax.slice(
            xb, (r0, kw, 0),
            (r0 + (nrows - 1) * stride + 1, kw + (Wo - 1) * stride + 1, Cp_in),
            (stride, stride, 1))

    # -------- conv1 -> bn1 (folded) -> relu: 9 accumulating K=Cp_in dots --------
    acc1 = None
    p11 = None
    for kh in range(3):
        for kw in range(3):
            p = tap(kh, kw, TR + 2, 0)
            if kh == 1 and kw == 1:
                p11 = p                          # center tap, reused for identity
            d = jnp.dot(p.reshape((TR + 2) * Wo, Cp_in), w1_ref[kh, kw, :, :],
                        preferred_element_type=jnp.float32)
            acc1 = d if acc1 is None else acc1 + d
    out1 = jnp.maximum(acc1 * s1_ref[0, :] + b1_ref[0, :], 0.0)

    # -------- stash conv1 rows in the zero-haloed VMEM scratch for conv2 --------
    Wp_mid = mid_ref.shape[1]
    mid_ref[:, 1:Wo + 1, :] = out1.reshape(TR + 2, Wo, Cp_out).astype(mid_ref.dtype)
    zcol = jnp.zeros((TR + 2, 1, Cp_out), mid_ref.dtype)
    mid_ref[:, 0:1, :] = zcol
    mid_ref[:, Wo + 1:Wo + 2, :] = zcol

    @pl.when(r == 0)                 # conv2 top zero padding (first row tile only)
    def _():
        mid_ref[0:1, :, :] = jnp.zeros((1, Wp_mid, Cp_out), mid_ref.dtype)

    @pl.when(r == last)              # conv2 bottom zero padding (last row tile only)
    def _():
        mid_ref[TR + 1:TR + 2, :, :] = jnp.zeros((1, Wp_mid, Cp_out), mid_ref.dtype)

    # -------- conv2 -> bn2 (folded): 9 accumulating K=Cp_out dots --------
    acc2 = None
    for kh in range(3):
        for kw in range(3):
            p = mid_ref[kh:kh + TR, kw:kw + Wo, :]
            d = jnp.dot(p.reshape(TR * Wo, Cp_out), w2_ref[kh, kw, :, :],
                        preferred_element_type=jnp.float32)
            acc2 = d if acc2 is None else acc2 + d
    out2 = acc2 * s2_ref[0, :] + b2_ref[0, :]

    # ------ identity / 1x1 downsample (reuses the conv1 center-tap patch) ------
    idp = jax.lax.slice(p11, (1, 0, 0), (TR + 1, Wo, Cp_in)).reshape(TR * Wo, Cp_in)
    if has_downsample:
        identity = (jnp.dot(idp, wd_ref[...], preferred_element_type=jnp.float32)
                    * sd_ref[0, :] + bd_ref[0, :])
    else:
        identity = idp.astype(jnp.float32)       # Cp_in == Cp_out (asserted)

    # -------- residual add + relu --------
    y = jnp.maximum(out2 + identity, 0.0)
    o_ref[...] = y.reshape(1, TR, Wo, Cp_out).astype(o_ref.dtype)


def _fold_bn(bn, c, cp):
    gamma, beta, mean, var = bn
    scale = gamma / jnp.sqrt(var + _EPS)
    bias = beta - mean * scale
    scale = jnp.pad(scale, (0, cp - c)).reshape(1, cp).astype(jnp.float32)
    bias = jnp.pad(bias, (0, cp - c)).reshape(1, cp).astype(jnp.float32)
    return scale, bias


def basic_block_forward(x_nchw, params, stride, compute_dtype=jnp.bfloat16):
    """Pallas forward.  x_nchw: (N, Cin, H, W) float32 (PyTorch layout).

    compute_dtype: bf16 by default (native MXU on v5e/v6e/v7x, half the DMA
    bytes); pass jnp.float32 for bit-accurate comparison against the reference.
    Accumulation, BN, residual add and ReLU are always f32.
    """
    N, Cin, H, W = x_nchw.shape
    Cout = params["w1"].shape[-1]
    has_downsample = params["wd"] is not None
    if not has_downsample:
        assert stride == 1 and Cin == Cout, (
            "BasicBlock without a downsample branch requires stride == 1 and "
            "in_channel == out_channel")

    Ho = (H + 2 - 3) // stride + 1
    Wo = (W + 2 - 3) // stride + 1

    # Pad channels up to the 128-lane width: lane-dense compute and stores.
    Cp_in = max(_round_up(Cin, _LANE), _LANE)
    Cp_out = max(_round_up(Cout, _LANE), _LANE)
    if not has_downsample:
        Cp_in = Cp_out = max(Cp_in, Cp_out)

    # Output-row tile: largest divisor of Ho that is <= 8.  Keeps the conv
    # intermediates near-vreg-resident and gives the pipeline many grid steps.
    TR = max(d for d in range(1, min(Ho, 8) + 1) if Ho % d == 0)
    n_tiles = Ho // TR

    # Spatial padding: pad=1 for conv1 plus `stride` extra zero rows on top and
    # enough on the bottom so every tile's input band (including the 1-row
    # conv2 halo it recomputes) stays in bounds; widths rounded to 8 sublanes.
    extra_top = stride
    extra_bot = max(0, Ho * stride + 1 - H)
    Hp = extra_top + H + 2 + extra_bot
    Wp_in = _round_up(W + 2, 8)
    Wp_mid = _round_up(Wo + 2, 8)

    # NCHW -> NHWC, spatial + channel padding, compute dtype cast.
    x = jnp.transpose(x_nchw, (0, 2, 3, 1))
    xp = jnp.pad(x, ((0, 0), (1 + extra_top, 1 + extra_bot),
                     (1, Wp_in - W - 1), (0, Cp_in - Cin))).astype(compute_dtype)

    def pad_w(w, ci, co, cpi, cpo):
        return jnp.pad(w, ((0, 0), (0, 0), (0, cpi - ci), (0, cpo - co)))

    s1, b1 = _fold_bn(params["bn1"], Cout, Cp_out)
    s2, b2 = _fold_bn(params["bn2"], Cout, Cp_out)
    w1 = pad_w(params["w1"], Cin, Cout, Cp_in, Cp_out).astype(compute_dtype)
    w2 = pad_w(params["w2"], Cout, Cout, Cp_out, Cp_out).astype(compute_dtype)

    inputs = [xp, w1, s1, b1, w2, s2, b2]
    in_specs = [
        # Whole padded image per batch element; index_map ignores the row-tile
        # axis so the block is only DMA'd when n changes.
        pl.BlockSpec((1, Hp, Wp_in, Cp_in), lambda n, r: (n, 0, 0, 0)),
        pl.BlockSpec((3, 3, Cp_in, Cp_out), lambda n, r: (0, 0, 0, 0)),
        pl.BlockSpec((1, Cp_out), lambda n, r: (0, 0)),
        pl.BlockSpec((1, Cp_out), lambda n, r: (0, 0)),
        pl.BlockSpec((3, 3, Cp_out, Cp_out), lambda n, r: (0, 0, 0, 0)),
        pl.BlockSpec((1, Cp_out), lambda n, r: (0, 0)),
        pl.BlockSpec((1, Cp_out), lambda n, r: (0, 0)),
    ]
    if has_downsample:
        wd = jnp.pad(params["wd"],
                     ((0, Cp_in - Cin), (0, Cp_out - Cout))).astype(compute_dtype)
        sd, bd = _fold_bn(params["bnd"], Cout, Cp_out)
        inputs += [wd, sd, bd]
        in_specs += [
            pl.BlockSpec((Cp_in, Cp_out), lambda n, r: (0, 0)),
            pl.BlockSpec((1, Cp_out), lambda n, r: (0, 0)),
            pl.BlockSpec((1, Cp_out), lambda n, r: (0, 0)),
        ]

    kernel = functools.partial(
        _basic_block_kernel, TR=TR, Wo=Wo, Cp_in=Cp_in, Cp_out=Cp_out,
        stride=stride, has_downsample=has_downsample)

    # VMEM footprint (double-buffered blocks + scratch) is ~3 MiB at these
    # shapes — well under the scoped default on every TPU generation, so
    # vmem_limit_bytes is left at its default (see TODO for 512-ch stages).
    out_nhwc = pl.pallas_call(
        kernel,
        out_shape=jax.ShapeDtypeStruct((N, Ho, Wo, Cp_out), jnp.float32),
        grid_spec=pltpu.PrefetchScalarGridSpec(
            num_scalar_prefetch=0,
            grid=(N, n_tiles),
            in_specs=in_specs,
            out_specs=pl.BlockSpec((1, TR, Wo, Cp_out), lambda n, r: (n, r, 0, 0)),
            scratch_shapes=[pltpu.VMEM((TR + 2, Wp_mid, Cp_out), compute_dtype)],
        ),
        compiler_params=pltpu.CompilerParams(
            dimension_semantics=("parallel", "parallel")),
    )(*inputs)

    # Crop the channel padding and go back to NCHW.
    return jnp.transpose(out_nhwc[..., :Cout], (0, 3, 1, 2))


def basic_block_reference(x_nchw, params, stride):
    """Pure-JAX reference (eval-mode BatchNorm), mirrors the PyTorch forward."""
    x = jnp.transpose(x_nchw, (0, 2, 3, 1))

    def conv(inp, w, s, pad):
        return jax.lax.conv_general_dilated(
            inp, w, (s, s), pad, dimension_numbers=("NHWC", "HWIO", "NHWC"))

    def bn(inp, b):
        gamma, beta, mean, var = b
        return (inp - mean) / jnp.sqrt(var + _EPS) * gamma + beta

    out = jax.nn.relu(bn(conv(x, params["w1"], stride, ((1, 1), (1, 1))), params["bn1"]))
    out = bn(conv(out, params["w2"], 1, ((1, 1), (1, 1))), params["bn2"])
    if params["wd"] is None:
        identity = x
    else:
        Cin, Cout = params["wd"].shape
        identity = bn(conv(x, params["wd"].reshape(1, 1, Cin, Cout),
                           stride, ((0, 0), (0, 0))), params["bnd"])
    out = jax.nn.relu(out + identity)
    return jnp.transpose(out, (0, 3, 1, 2))


def init_params(key, in_channel, out_channel, stride):
    """Deterministic synthetic parameters (shapes from BasicBlock.__init__)."""
    ks = jax.random.split(key, 12)

    def bn_params(k):
        k1, k2, k3, k4 = jax.random.split(k, 4)
        gamma = jax.random.uniform(k1, (out_channel,), jnp.float32, 0.5, 1.5)
        beta = 0.1 * jax.random.normal(k2, (out_channel,), jnp.float32)
        mean = 0.1 * jax.random.normal(k3, (out_channel,), jnp.float32)
        var = jax.random.uniform(k4, (out_channel,), jnp.float32, 0.5, 1.5)
        return (gamma, beta, mean, var)

    params = {
        # conv weights stored HWIO
        "w1": 0.1 * jax.random.normal(ks[0], (3, 3, in_channel, out_channel), jnp.float32),
        "bn1": bn_params(ks[1]),
        "w2": 0.1 * jax.random.normal(ks[2], (3, 3, out_channel, out_channel), jnp.float32),
        "bn2": bn_params(ks[3]),
        "wd": None,
        "bnd": None,
    }
    if stride != 1 or in_channel != out_channel:
        params["wd"] = 0.1 * jax.random.normal(ks[4], (in_channel, out_channel), jnp.float32)
        params["bnd"] = bn_params(ks[5])
    return params


if __name__ == "__main__":
    key = jax.random.PRNGKey(0)
    kx, kp = jax.random.split(key)

    # Small shapes: batch=2, in_channel=4, out_channel=8, spatial=16, stride=1
    # (in_channel != out_channel => downsample branch is active, like PyTorch)
    N, Cin, H, W = 2, 4, 16, 16
    Cout, stride = 8, 1

    x = jax.random.normal(kx, (N, Cin, H, W), jnp.float32)   # PyTorch NCHW input
    params = init_params(kp, Cin, Cout, stride)
    ref = basic_block_reference(x, params, stride)

    # f32 compute path: tight comparison against the pure-JAX reference.
    out_f32 = jax.block_until_ready(
        basic_block_forward(x, params, stride, compute_dtype=jnp.float32))
    assert out_f32.shape == (N, Cout, H, W), out_f32.shape
    err_f32 = float(jnp.max(jnp.abs(out_f32 - ref)))
    assert jnp.allclose(out_f32, ref, rtol=1e-3, atol=1e-3), f"f32 max abs err = {err_f32}"

    # bf16 compute path (default): MXU-native, f32 accumulation — looser tolerance.
    out_bf16 = jax.block_until_ready(basic_block_forward(x, params, stride))
    err_bf16 = float(jnp.max(jnp.abs(out_bf16 - ref)))
    assert err_bf16 < 0.1, f"bf16 max abs err = {err_bf16}"

    # No-downsample (pure identity residual) specialisation, f32.
    params_id = init_params(kp, 8, 8, 1)
    x_id = jax.random.normal(kx, (N, 8, H, W), jnp.float32)
    ref_id = basic_block_reference(x_id, params_id, 1)
    out_id = jax.block_until_ready(
        basic_block_forward(x_id, params_id, 1, compute_dtype=jnp.float32))
    err_id = float(jnp.max(jnp.abs(out_id - ref_id)))
    assert jnp.allclose(out_id, ref_id, rtol=1e-3, atol=1e-3), f"identity max abs err = {err_id}"

    print("KERNEL_OK")
</pallas_src>

<mosaic_0001>
module attributes {stable_mosaic.version = 11 : i64} {
  func.func @_basic_block_kernel(%arg0: i32, %arg1: i32, %arg2: memref<1x20x24x128xf32, #tpu.memory_space<vmem>>, %arg3: memref<3x3x128x128xf32, #tpu.memory_space<vmem>>, %arg4: memref<1x128xf32, #tpu.memory_space<vmem>>, %arg5: memref<1x128xf32, #tpu.memory_space<vmem>>, %arg6: memref<3x3x128x128xf32, #tpu.memory_space<vmem>>, %arg7: memref<1x128xf32, #tpu.memory_space<vmem>>, %arg8: memref<1x128xf32, #tpu.memory_space<vmem>>, %arg9: memref<128x128xf32, #tpu.memory_space<vmem>>, %arg10: memref<1x128xf32, #tpu.memory_space<vmem>>, %arg11: memref<1x128xf32, #tpu.memory_space<vmem>>, %arg12: memref<1x8x16x128xf32, #tpu.memory_space<vmem>>, %arg13: memref<10x24x128xf32, #tpu.memory_space<vmem>>) attributes {dimension_semantics = [#tpu.dimension_semantics<parallel>, #tpu.dimension_semantics<parallel>], iteration_bounds = array<i64: 2, 2>, scalar_prefetch = 0 : i64, scratch_operands = 1 : i64, tpu.core_type = #tpu.core_type<tc>, window_params = [{transform_indices = @transform_0, window_bounds = array<i64: 1, 20, 24, 128>}, {pipeline_mode = #tpu.pipeline_mode<synchronous>, transform_indices = @transform_1, window_bounds = array<i64: 3, 3, 128, 128>}, {pipeline_mode = #tpu.pipeline_mode<synchronous>, transform_indices = @transform_2, window_bounds = array<i64: 1, 128>}, {pipeline_mode = #tpu.pipeline_mode<synchronous>, transform_indices = @transform_3, window_bounds = array<i64: 1, 128>}, {pipeline_mode = #tpu.pipeline_mode<synchronous>, transform_indices = @transform_4, window_bounds = array<i64: 3, 3, 128, 128>}, {pipeline_mode = #tpu.pipeline_mode<synchronous>, transform_indices = @transform_5, window_bounds = array<i64: 1, 128>}, {pipeline_mode = #tpu.pipeline_mode<synchronous>, transform_indices = @transform_6, window_bounds = array<i64: 1, 128>}, {pipeline_mode = #tpu.pipeline_mode<synchronous>, transform_indices = @transform_7, window_bounds = array<i64: 128, 128>}, {pipeline_mode = #tpu.pipeline_mode<synchronous>, transform_indices = @transform_8, window_bounds = array<i64: 1, 128>}, {pipeline_mode = #tpu.pipeline_mode<synchronous>, transform_indices = @transform_9, window_bounds = array<i64: 1, 128>}, {transform_indices = @transform_10, window_bounds = array<i64: 1, 8, 16, 128>}]} {
    %c8_i32 = arith.constant 8 : i32
    %0 = arith.muli %arg1, %c8_i32 : i32
    %c0 = arith.constant 0 : index
    %1 = arith.index_cast %0 : i32 to index
    %c0_0 = arith.constant 0 : index
    %c0_1 = arith.constant 0 : index
    %2 = vector.load %arg2[%c0, %1, %c0_0, %c0_1] : memref<1x20x24x128xf32, #tpu.memory_space<vmem>>, vector<1x12x24x128xf32>
    %3 = vector.shape_cast %2 : vector<1x12x24x128xf32> to vector<12x24x128xf32>
    %4 = vector.extract_strided_slice %3 {offsets = [0, 0, 0], sizes = [10, 16, 128], strides = [1, 1, 1]} : vector<12x24x128xf32> to vector<10x16x128xf32>
    %5 = vector.shape_cast %4 : vector<10x16x128xf32> to vector<160x128xf32>
    %c0_2 = arith.constant 0 : index
    %c0_3 = arith.constant 0 : index
    %c0_4 = arith.constant 0 : index
    %c0_5 = arith.constant 0 : index
    %6 = vector.load %arg3[%c0_2, %c0_3, %c0_4, %c0_5] : memref<3x3x128x128xf32, #tpu.memory_space<vmem>>, vector<1x1x128x128xf32>
    %7 = vector.shape_cast %6 : vector<1x1x128x128xf32> to vector<128x128xf32>
    %cst = arith.constant dense<0.000000e+00> : vector<160x128xf32>
    %8 = tpu.matmul %5, %7, %cst {dimension_numbers = #tpu.dot_dimension_numbers<[1], [0], [0], [1], [0, 0, 1, 1], [], []>} : vector<160x128xf32>, vector<128x128xf32>, vector<160x128xf32> -> vector<160x128xf32>
    %9 = vector.extract_strided_slice %3 {offsets = [0, 1, 0], sizes = [10, 16, 128], strides = [1, 1, 1]} : vector<12x24x128xf32> to vector<10x16x128xf32>
    %10 = vector.shape_cast %9 : vector<10x16x128xf32> to vector<160x128xf32>
    %c0_6 = arith.constant 0 : index
    %c1 = arith.constant 1 : index
    %c0_7 = arith.constant 0 : index
    %c0_8 = arith.constant 0 : index
    %11 = vector.load %arg3[%c0_6, %c1, %c0_7, %c0_8] : memref<3x3x128x128xf32, #tpu.memory_space<vmem>>, vector<1x1x128x128xf32>
    %12 = vector.shape_cast %11 : vector<1x1x128x128xf32> to vector<128x128xf32>
    %cst_9 = arith.constant dense<0.000000e+00> : vector<160x128xf32>
    %13 = tpu.matmul %10, %12, %cst_9 {dimension_numbers = #tpu.dot_dimension_numbers<[1], [0], [0], [1], [0, 0, 1, 1], [], []>} : vector<160x128xf32>, vector<128x128xf32>, vector<160x128xf32> -> vector<160x128xf32>
    %14 = arith.addf %8, %13 : vector<160x128xf32>
    %15 = vector.extract_strided_slice %3 {offsets = [0, 2, 0], sizes = [10, 16, 128], strides = [1, 1, 1]} : vector<12x24x128xf32> to vector<10x16x128xf32>
    %16 = vector.shape_cast %15 : vector<10x16x128xf32> to vector<160x128xf32>
    %c0_10 = arith.constant 0 : index
    %c2 = arith.constant 2 : index
    %c0_11 = arith.constant 0 : index
    %c0_12 = arith.constant 0 : index
    %17 = vector.load %arg3[%c0_10, %c2, %c0_11, %c0_12] : memref<3x3x128x128xf32, #tpu.memory_space<vmem>>, vector<1x1x128x128xf32>
    %18 = vector.shape_cast %17 : vector<1x1x128x128xf32> to vector<128x128xf32>
    %cst_13 = arith.constant dense<0.000000e+00> : vector<160x128xf32>
    %19 = tpu.matmul %16, %18, %cst_13 {dimension_numbers = #tpu.dot_dimension_numbers<[1], [0], [0], [1], [0, 0, 1, 1], [], []>} : vector<160x128xf32>, vector<128x128xf32>, vector<160x128xf32> -> vector<160x128xf32>
    %20 = arith.addf %14, %19 : vector<160x128xf32>
    %21 = vector.extract_strided_slice %3 {offsets = [1, 0, 0], sizes = [10, 16, 128], strides = [1, 1, 1]} : vector<12x24x128xf32> to vector<10x16x128xf32>
    %22 = vector.shape_cast %21 : vector<10x16x128xf32> to vector<160x128xf32>
    %c1_14 = arith.constant 1 : index
    %c0_15 = arith.constant 0 : index
    %c0_16 = arith.constant 0 : index
    %c0_17 = arith.constant 0 : index
    %23 = vector.load %arg3[%c1_14, %c0_15, %c0_16, %c0_17] : memref<3x3x128x128xf32, #tpu.memory_space<vmem>>, vector<1x1x128x128xf32>
    %24 = vector.shape_cast %23 : vector<1x1x128x128xf32> to vector<128x128xf32>
    %cst_18 = arith.constant dense<0.000000e+00> : vector<160x128xf32>
    %25 = tpu.matmul %22, %24, %cst_18 {dimension_numbers = #tpu.dot_dimension_numbers<[1], [0], [0], [1], [0, 0, 1, 1], [], []>} : vector<160x128xf32>, vector<128x128xf32>, vector<160x128xf32> -> vector<160x128xf32>
    %26 = arith.addf %20, %25 : vector<160x128xf32>
    %27 = vector.extract_strided_slice %3 {offsets = [1, 1, 0], sizes = [10, 16, 128], strides = [1, 1, 1]} : vector<12x24x128xf32> to vector<10x16x128xf32>
    %28 = vector.shape_cast %27 : vector<10x16x128xf32> to vector<160x128xf32>
    %c1_19 = arith.constant 1 : index
    %c1_20 = arith.constant 1 : index
    %c0_21 = arith.constant 0 : index
    %c0_22 = arith.constant 0 : index
    %29 = vector.load %arg3[%c1_19, %c1_20, %c0_21, %c0_22] : memref<3x3x128x128xf32, #tpu.memory_space<vmem>>, vector<1x1x128x128xf32>
    %30 = vector.shape_cast %29 : vector<1x1x128x128xf32> to vector<128x128xf32>
    %cst_23 = arith.constant dense<0.000000e+00> : vector<160x128xf32>
    %31 = tpu.matmul %28, %30, %cst_23 {dimension_numbers = #tpu.dot_dimension_numbers<[1], [0], [0], [1], [0, 0, 1, 1], [], []>} : vector<160x128xf32>, vector<128x128xf32>, vector<160x128xf32> -> vector<160x128xf32>
    %32 = arith.addf %26, %31 : vector<160x128xf32>
    %33 = vector.extract_strided_slice %3 {offsets = [1, 2, 0], sizes = [10, 16, 128], strides = [1, 1, 1]} : vector<12x24x128xf32> to vector<10x16x128xf32>
    %34 = vector.shape_cast %33 : vector<10x16x128xf32> to vector<160x128xf32>
    %c1_24 = arith.constant 1 : index
    %c2_25 = arith.constant 2 : index
    %c0_26 = arith.constant 0 : index
    %c0_27 = arith.constant 0 : index
    %35 = vector.load %arg3[%c1_24, %c2_25, %c0_26, %c0_27] : memref<3x3x128x128xf32, #tpu.memory_space<vmem>>, vector<1x1x128x128xf32>
    %36 = vector.shape_cast %35 : vector<1x1x128x128xf32> to vector<128x128xf32>
    %cst_28 = arith.constant dense<0.000000e+00> : vector<160x128xf32>
    %37 = tpu.matmul %34, %36, %cst_28 {dimension_numbers = #tpu.dot_dimension_numbers<[1], [0], [0], [1], [0, 0, 1, 1], [], []>} : vector<160x128xf32>, vector<128x128xf32>, vector<160x128xf32> -> vector<160x128xf32>
    %38 = arith.addf %32, %37 : vector<160x128xf32>
    %39 = vector.extract_strided_slice %3 {offsets = [2, 0, 0], sizes = [10, 16, 128], strides = [1, 1, 1]} : vector<12x24x128xf32> to vector<10x16x128xf32>
    %40 = vector.shape_cast %39 : vector<10x16x128xf32> to vector<160x128xf32>
    %c2_29 = arith.constant 2 : index
    %c0_30 = arith.constant 0 : index
    %c0_31 = arith.constant 0 : index
    %c0_32 = arith.constant 0 : index
    %41 = vector.load %arg3[%c2_29, %c0_30, %c0_31, %c0_32] : memref<3x3x128x128xf32, #tpu.memory_space<vmem>>, vector<1x1x128x128xf32>
    %42 = vector.shape_cast %41 : vector<1x1x128x128xf32> to vector<128x128xf32>
    %cst_33 = arith.constant dense<0.000000e+00> : vector<160x128xf32>
    %43 = tpu.matmul %40, %42, %cst_33 {dimension_numbers = #tpu.dot_dimension_numbers<[1], [0], [0], [1], [0, 0, 1, 1], [], []>} : vector<160x128xf32>, vector<128x128xf32>, vector<160x128xf32> -> vector<160x128xf32>
    %44 = arith.addf %38, %43 : vector<160x128xf32>
    %45 = vector.extract_strided_slice %3 {offsets = [2, 1, 0], sizes = [10, 16, 128], strides = [1, 1, 1]} : vector<12x24x128xf32> to vector<10x16x128xf32>
    %46 = vector.shape_cast %45 : vector<10x16x128xf32> to vector<160x128xf32>
    %c2_34 = arith.constant 2 : index
    %c1_35 = arith.constant 1 : index
    %c0_36 = arith.constant 0 : index
    %c0_37 = arith.constant 0 : index
    %47 = vector.load %arg3[%c2_34, %c1_35, %c0_36, %c0_37] : memref<3x3x128x128xf32, #tpu.memory_space<vmem>>, vector<1x1x128x128xf32>
    %48 = vector.shape_cast %47 : vector<1x1x128x128xf32> to vector<128x128xf32>
    %cst_38 = arith.constant dense<0.000000e+00> : vector<160x128xf32>
    %49 = tpu.matmul %46, %48, %cst_38 {dimension_numbers = #tpu.dot_dimension_numbers<[1], [0], [0], [1], [0, 0, 1, 1], [], []>} : vector<160x128xf32>, vector<128x128xf32>, vector<160x128xf32> -> vector<160x128xf32>
    %50 = arith.addf %44, %49 : vector<160x128xf32>
    %51 = vector.extract_strided_slice %3 {offsets = [2, 2, 0], sizes = [10, 16, 128], strides = [1, 1, 1]} : vector<12x24x128xf32> to vector<10x16x128xf32>
    %52 = vector.shape_cast %51 : vector<10x16x128xf32> to vector<160x128xf32>
    %c2_39 = arith.constant 2 : index
    %c2_40 = arith.constant 2 : index
    %c0_41 = arith.constant 0 : index
    %c0_42 = arith.constant 0 : index
    %53 = vector.load %arg3[%c2_39, %c2_40, %c0_41, %c0_42] : memref<3x3x128x128xf32, #tpu.memory_space<vmem>>, vector<1x1x128x128xf32>
    %54 = vector.shape_cast %53 : vector<1x1x128x128xf32> to vector<128x128xf32>
    %cst_43 = arith.constant dense<0.000000e+00> : vector<160x128xf32>
    %55 = tpu.matmul %52, %54, %cst_43 {dimension_numbers = #tpu.dot_dimension_numbers<[1], [0], [0], [1], [0, 0, 1, 1], [], []>} : vector<160x128xf32>, vector<128x128xf32>, vector<160x128xf32> -> vector<160x128xf32>
    %56 = arith.addf %50, %55 : vector<160x128xf32>
    %c0_44 = arith.constant 0 : index
    %c0_45 = arith.constant 0 : index
    %57 = vector.load %arg4[%c0_44, %c0_45] : memref<1x128xf32, #tpu.memory_space<vmem>>, vector<1x128xf32>
    %58 = vector.shape_cast %57 : vector<1x128xf32> to vector<128xf32>
    %59 = vector.shape_cast %58 : vector<128xf32> to vector<1x128xf32>
    %60 = vector.broadcast %59 : vector<1x128xf32> to vector<160x128xf32>
    %61 = arith.mulf %56, %60 : vector<160x128xf32>
    %c0_46 = arith.constant 0 : index
    %c0_47 = arith.constant 0 : index
    %62 = vector.load %arg5[%c0_46, %c0_47] : memref<1x128xf32, #tpu.memory_space<vmem>>, vector<1x128xf32>
    %63 = vector.shape_cast %62 : vector<1x128xf32> to vector<128xf32>
    %64 = vector.shape_cast %63 : vector<128xf32> to vector<1x128xf32>
    %65 = vector.broadcast %64 : vector<1x128xf32> to vector<160x128xf32>
    %66 = arith.addf %61, %65 : vector<160x128xf32>
    %cst_48 = arith.constant 0.000000e+00 : f32
    %67 = vector.broadcast %cst_48 : f32 to vector<160x128xf32>
    %68 = arith.maximumf %66, %67 : vector<160x128xf32>
    %69 = vector.shape_cast %68 : vector<160x128xf32> to vector<10x16x128xf32>
    %c0_49 = arith.constant 0 : index
    %c1_50 = arith.constant 1 : index
    %c0_51 = arith.constant 0 : index
    %70 = vector.load %arg13[%c0_49, %c1_50, %c0_51] : memref<10x24x128xf32, #tpu.memory_space<vmem>>, vector<10x16x128xf32>
    tpu.vector_store %arg13[%c0_49, %c1_50, %c0_51], %69 {strides = array<i32>} : memref<10x24x128xf32, #tpu.memory_space<vmem>>, vector<10x16x128xf32>,
    %cst_52 = arith.constant 0.000000e+00 : f32
    %71 = vector.broadcast %cst_52 : f32 to vector<10x1x128xf32>
    %c0_53 = arith.constant 0 : index
    %c0_54 = arith.constant 0 : index
    %c0_55 = arith.constant 0 : index
    %72 = vector.load %arg13[%c0_53, %c0_54, %c0_55] : memref<10x24x128xf32, #tpu.memory_space<vmem>>, vector<10x1x128xf32>
    tpu.vector_store %arg13[%c0_53, %c0_54, %c0_55], %71 {strides = array<i32>} : memref<10x24x128xf32, #tpu.memory_space<vmem>>, vector<10x1x128xf32>,
    %c0_56 = arith.constant 0 : index
    %c17 = arith.constant 17 : index
    %c0_57 = arith.constant 0 : index
    %73 = vector.load %arg13[%c0_56, %c17, %c0_57] : memref<10x24x128xf32, #tpu.memory_space<vmem>>, vector<10x1x128xf32>
    tpu.vector_store %arg13[%c0_56, %c17, %c0_57], %71 {strides = array<i32>} : memref<10x24x128xf32, #tpu.memory_space<vmem>>, vector<10x1x128xf32>,
    %c0_i32 = arith.constant 0 : i32
    %74 = arith.cmpi eq, %arg1, %c0_i32 : i32
    %75 = arith.extui %74 : i1 to i32
    %c0_i32_58 = arith.constant 0 : i32
    %76 = arith.cmpi ne, %75, %c0_i32_58 : i32
    scf.if %76 {
      %cst_148 = arith.constant 0.000000e+00 : f32
      %162 = vector.broadcast %cst_148 : f32 to vector<1x24x128xf32>
      %c0_149 = arith.constant 0 : index
      %c0_150 = arith.constant 0 : index
      %c0_151 = arith.constant 0 : index
      %163 = vector.load %arg13[%c0_149, %c0_150, %c0_151] : memref<10x24x128xf32, #tpu.memory_space<vmem>>, vector<1x24x128xf32>
      tpu.vector_store %arg13[%c0_149, %c0_150, %c0_151], %162 {strides = array<i32>} : memref<10x24x128xf32, #tpu.memory_space<vmem>>, vector<1x24x128xf32>,
    } else {
    }
    %c1_i32 = arith.constant 1 : i32
    %77 = arith.cmpi eq, %arg1, %c1_i32 : i32
    %78 = arith.extui %77 : i1 to i32
    %c0_i32_59 = arith.constant 0 : i32
    %79 = arith.cmpi ne, %78, %c0_i32_59 : i32
    scf.if %79 {
      %cst_148 = arith.constant 0.000000e+00 : f32
      %162 = vector.broadcast %cst_148 : f32 to vector<1x24x128xf32>
      %c9 = arith.constant 9 : index
      %c0_149 = arith.constant 0 : index
      %c0_150 = arith.constant 0 : index
      %163 = vector.load %arg13[%c9, %c0_149, %c0_150] : memref<10x24x128xf32, #tpu.memory_space<vmem>>, vector<1x24x128xf32>
      tpu.vector_store %arg13[%c9, %c0_149, %c0_150], %162 {strides = array<i32>} : memref<10x24x128xf32, #tpu.memory_space<vmem>>, vector<1x24x128xf32>,
    } else {
    }
    %c0_60 = arith.constant 0 : index
    %c0_61 = arith.constant 0 : index
    %c0_62 = arith.constant 0 : index
    %80 = vector.load %arg13[%c0_60, %c0_61, %c0_62] : memref<10x24x128xf32, #tpu.memory_space<vmem>>, vector<8x16x128xf32>
    %81 = vector.shape_cast %80 : vector<8x16x128xf32> to vector<128x128xf32>
    %c0_63 = arith.constant 0 : index
    %c0_64 = arith.constant 0 : index
    %c0_65 = arith.constant 0 : index
    %c0_66 = arith.constant 0 : index
    %82 = vector.load %arg6[%c0_63, %c0_64, %c0_65, %c0_66] : memref<3x3x128x128xf32, #tpu.memory_space<vmem>>, vector<1x1x128x128xf32>
    %83 = vector.shape_cast %82 : vector<1x1x128x128xf32> to vector<128x128xf32>
    %cst_67 = arith.constant dense<0.000000e+00> : vector<128x128xf32>
    %84 = tpu.matmul %81, %83, %cst_67 {dimension_numbers = #tpu.dot_dimension_numbers<[1], [0], [0], [1], [0, 0, 1, 1], [], []>} : vector<128x128xf32>, vector<128x128xf32>, vector<128x128xf32> -> vector<128x128xf32>
    %c0_68 = arith.constant 0 : index
    %c1_69 = arith.constant 1 : index
    %c0_70 = arith.constant 0 : index
    %85 = vector.load %arg13[%c0_68, %c1_69, %c0_70] : memref<10x24x128xf32, #tpu.memory_space<vmem>>, vector<8x16x128xf32>
    %86 = vector.shape_cast %85 : vector<8x16x128xf32> to vector<128x128xf32>
    %c0_71 = arith.constant 0 : index
    %c1_72 = arith.constant 1 : index
    %c0_73 = arith.constant 0 : index
    %c0_74 = arith.constant 0 : index
    %87 = vector.load %arg6[%c0_71, %c1_72, %c0_73, %c0_74] : memref<3x3x128x128xf32, #tpu.memory_space<vmem>>, vector<1x1x128x128xf32>
    %88 = vector.shape_cast %87 : vector<1x1x128x128xf32> to vector<128x128xf32>
    %cst_75 = arith.constant dense<0.000000e+00> : vector<128x128xf32>
    %89 = tpu.matmul %86, %88, %cst_75 {dimension_numbers = #tpu.dot_dimension_numbers<[1], [0], [0], [1], [0, 0, 1, 1], [], []>} : vector<128x128xf32>, vector<128x128xf32>, vector<128x128xf32> -> vector<128x128xf32>
    %90 = arith.addf %84, %89 : vector<128x128xf32>
    %c0_76 = arith.constant 0 : index
    %c2_77 = arith.constant 2 : index
    %c0_78 = arith.constant 0 : index
    %91 = vector.load %arg13[%c0_76, %c2_77, %c0_78] : memref<10x24x128xf32, #tpu.memory_space<vmem>>, vector<8x16x128xf32>
    %92 = vector.shape_cast %91 : vector<8x16x128xf32> to vector<128x128xf32>
    %c0_79 = arith.constant 0 : index
    %c2_80 = arith.constant 2 : index
    %c0_81 = arith.constant 0 : index
    %c0_82 = arith.constant 0 : index
    %93 = vector.load %arg6[%c0_79, %c2_80, %c0_81, %c0_82] : memref<3x3x128x128xf32, #tpu.memory_space<vmem>>, vector<1x1x128x128xf32>
    %94 = vector.shape_cast %93 : vector<1x1x128x128xf32> to vector<128x128xf32>
    %cst_83 = arith.constant dense<0.000000e+00> : vector<128x128xf32>
    %95 = tpu.matmul %92, %94, %cst_83 {dimension_numbers = #tpu.dot_dimension_numbers<[1], [0], [0], [1], [0, 0, 1, 1], [], []>} : vector<128x128xf32>, vector<128x128xf32>, vector<128x128xf32> -> vector<128x128xf32>
    %96 = arith.addf %90, %95 : vector<128x128xf32>
    %c1_84 = arith.constant 1 : index
    %c0_85 = arith.constant 0 : index
    %c0_86 = arith.constant 0 : index
    %97 = vector.load %arg13[%c1_84, %c0_85, %c0_86] : memref<10x24x128xf32, #tpu.memory_space<vmem>>, vector<8x16x128xf32>
    %98 = vector.shape_cast %97 : vector<8x16x128xf32> to vector<128x128xf32>
    %c1_87 = arith.constant 1 : index
    %c0_88 = arith.constant 0 : index
    %c0_89 = arith.constant 0 : index
    %c0_90 = arith.constant 0 : index
    %99 = vector.load %arg6[%c1_87, %c0_88, %c0_89, %c0_90] : memref<3x3x128x128xf32, #tpu.memory_space<vmem>>, vector<1x1x128x128xf32>
    %100 = vector.shape_cast %99 : vector<1x1x128x128xf32> to vector<128x128xf32>
    %cst_91 = arith.constant dense<0.000000e+00> : vector<128x128xf32>
    %101 = tpu.matmul %98, %100, %cst_91 {dimension_numbers = #tpu.dot_dimension_numbers<[1], [0], [0], [1], [0, 0, 1, 1], [], []>} : vector<128x128xf32>, vector<128x128xf32>, vector<128x128xf32> -> vector<128x128xf32>
    %102 = arith.addf %96, %101 : vector<128x128xf32>
    %c1_92 = arith.constant 1 : index
    %c1_93 = arith.constant 1 : index
    %c0_94 = arith.constant 0 : index
    %103 = vector.load %arg13[%c1_92, %c1_93, %c0_94] : memref<10x24x128xf32, #tpu.memory_space<vmem>>, vector<8x16x128xf32>
    %104 = vector.shape_cast %103 : vector<8x16x128xf32> to vector<128x128xf32>
    %c1_95 = arith.constant 1 : index
    %c1_96 = arith.constant 1 : index
    %c0_97 = arith.constant 0 : index
    %c0_98 = arith.constant 0 : index
    %105 = vector.load %arg6[%c1_95, %c1_96, %c0_97, %c0_98] : memref<3x3x128x128xf32, #tpu.memory_space<vmem>>, vector<1x1x128x128xf32>
    %106 = vector.shape_cast %105 : vector<1x1x128x128xf32> to vector<128x128xf32>
    %cst_99 = arith.constant dense<0.000000e+00> : vector<128x128xf32>
    %107 = tpu.matmul %104, %106, %cst_99 {dimension_numbers = #tpu.dot_dimension_numbers<[1], [0], [0], [1], [0, 0, 1, 1], [], []>} : vector<128x128xf32>, vector<128x128xf32>, vector<128x128xf32> -> vector<128x128xf32>
    %108 = arith.addf %102, %107 : vector<128x128xf32>
    %c1_100 = arith.constant 1 : index
    %c2_101 = arith.constant 2 : index
    %c0_102 = arith.constant 0 : index
    %109 = vector.load %arg13[%c1_100, %c2_101, %c0_102] : memref<10x24x128xf32, #tpu.memory_space<vmem>>, vector<8x16x128xf32>
    %110 = vector.shape_cast %109 : vector<8x16x128xf32> to vector<128x128xf32>
    %c1_103 = arith.constant 1 : index
    %c2_104 = arith.constant 2 : index
    %c0_105 = arith.constant 0 : index
    %c0_106 = arith.constant 0 : index
    %111 = vector.load %arg6[%c1_103, %c2_104, %c0_105, %c0_106] : memref<3x3x128x128xf32, #tpu.memory_space<vmem>>, vector<1x1x128x128xf32>
    %112 = vector.shape_cast %111 : vector<1x1x128x128xf32> to vector<128x128xf32>
    %cst_107 = arith.constant dense<0.000000e+00> : vector<128x128xf32>
    %113 = tpu.matmul %110, %112, %cst_107 {dimension_numbers = #tpu.dot_dimension_numbers<[1], [0], [0], [1], [0, 0, 1, 1], [], []>} : vector<128x128xf32>, vector<128x128xf32>, vector<128x128xf32> -> vector<128x128xf32>
    %114 = arith.addf %108, %113 : vector<128x128xf32>
    %c2_108 = arith.constant 2 : index
    %c0_109 = arith.constant 0 : index
    %c0_110 = arith.constant 0 : index
    %115 = vector.load %arg13[%c2_108, %c0_109, %c0_110] : memref<10x24x128xf32, #tpu.memory_space<vmem>>, vector<8x16x128xf32>
    %116 = vector.shape_cast %115 : vector<8x16x128xf32> to vector<128x128xf32>
    %c2_111 = arith.constant 2 : index
    %c0_112 = arith.constant 0 : index
    %c0_113 = arith.constant 0 : index
    %c0_114 = arith.constant 0 : index
    %117 = vector.load %arg6[%c2_111, %c0_112, %c0_113, %c0_114] : memref<3x3x128x128xf32, #tpu.memory_space<vmem>>, vector<1x1x128x128xf32>
    %118 = vector.shape_cast %117 : vector<1x1x128x128xf32> to vector<128x128xf32>
    %cst_115 = arith.constant dense<0.000000e+00> : vector<128x128xf32>
    %119 = tpu.matmul %116, %118, %cst_115 {dimension_numbers = #tpu.dot_dimension_numbers<[1], [0], [0], [1], [0, 0, 1, 1], [], []>} : vector<128x128xf32>, vector<128x128xf32>, vector<128x128xf32> -> vector<128x128xf32>
    %120 = arith.addf %114, %119 : vector<128x128xf32>
    %c2_116 = arith.constant 2 : index
    %c1_117 = arith.constant 1 : index
    %c0_118 = arith.constant 0 : index
    %121 = vector.load %arg13[%c2_116, %c1_117, %c0_118] : memref<10x24x128xf32, #tpu.memory_space<vmem>>, vector<8x16x128xf32>
    %122 = vector.shape_cast %121 : vector<8x16x128xf32> to vector<128x128xf32>
    %c2_119 = arith.constant 2 : index
    %c1_120 = arith.constant 1 : index
    %c0_121 = arith.constant 0 : index
    %c0_122 = arith.constant 0 : index
    %123 = vector.load %arg6[%c2_119, %c1_120, %c0_121, %c0_122] : memref<3x3x128x128xf32, #tpu.memory_space<vmem>>, vector<1x1x128x128xf32>
    %124 = vector.shape_cast %123 : vector<1x1x128x128xf32> to vector<128x128xf32>
    %cst_123 = arith.constant dense<0.000000e+00> : vector<128x128xf32>
    %125 = tpu.matmul %122, %124, %cst_123 {dimension_numbers = #tpu.dot_dimension_numbers<[1], [0], [0], [1], [0, 0, 1, 1], [], []>} : vector<128x128xf32>, vector<128x128xf32>, vector<128x128xf32> -> vector<128x128xf32>
    %126 = arith.addf %120, %125 : vector<128x128xf32>
    %c2_124 = arith.constant 2 : index
    %c2_125 = arith.constant 2 : index
    %c0_126 = arith.constant 0 : index
    %127 = vector.load %arg13[%c2_124, %c2_125, %c0_126] : memref<10x24x128xf32, #tpu.memory_space<vmem>>, vector<8x16x128xf32>
    %128 = vector.shape_cast %127 : vector<8x16x128xf32> to vector<128x128xf32>
    %c2_127 = arith.constant 2 : index
    %c2_128 = arith.constant 2 : index
    %c0_129 = arith.constant 0 : index
    %c0_130 = arith.constant 0 : index
    %129 = vector.load %arg6[%c2_127, %c2_128, %c0_129, %c0_130] : memref<3x3x128x128xf32, #tpu.memory_space<vmem>>, vector<1x1x128x128xf32>
    %130 = vector.shape_cast %129 : vector<1x1x128x128xf32> to vector<128x128xf32>
    %cst_131 = arith.constant dense<0.000000e+00> : vector<128x128xf32>
    %131 = tpu.matmul %128, %130, %cst_131 {dimension_numbers = #tpu.dot_dimension_numbers<[1], [0], [0], [1], [0, 0, 1, 1], [], []>} : vector<128x128xf32>, vector<128x128xf32>, vector<128x128xf32> -> vector<128x128xf32>
    %132 = arith.addf %126, %131 : vector<128x128xf32>
    %c0_132 = arith.constant 0 : index
    %c0_133 = arith.constant 0 : index
    %133 = vector.load %arg7[%c0_132, %c0_133] : memref<1x128xf32, #tpu.memory_space<vmem>>, vector<1x128xf32>
    %134 = vector.shape_cast %133 : vector<1x128xf32> to vector<128xf32>
    %135 = vector.shape_cast %134 : vector<128xf32> to vector<1x128xf32>
    %136 = vector.broadcast %135 : vector<1x128xf32> to vector<128x128xf32>
    %137 = arith.mulf %132, %136 : vector<128x128xf32>
    %c0_134 = arith.constant 0 : index
    %c0_135 = arith.constant 0 : index
    %138 = vector.load %arg8[%c0_134, %c0_135] : memref<1x128xf32, #tpu.memory_space<vmem>>, vector<1x128xf32>
    %139 = vector.shape_cast %138 : vector<1x128xf32> to vector<128xf32>
    %140 = vector.shape_cast %139 : vector<128xf32> to vector<1x128xf32>
    %141 = vector.broadcast %140 : vector<1x128xf32> to vector<128x128xf32>
    %142 = arith.addf %137, %141 : vector<128x128xf32>
    %143 = vector.extract_strided_slice %27 {offsets = [1, 0, 0], sizes = [8, 16, 128], strides = [1, 1, 1]} : vector<10x16x128xf32> to vector<8x16x128xf32>
    %144 = vector.shape_cast %143 : vector<8x16x128xf32> to vector<128x128xf32>
    %c0_136 = arith.constant 0 : index
    %c0_137 = arith.constant 0 : index
    %145 = vector.load %arg9[%c0_136, %c0_137] : memref<128x128xf32, #tpu.memory_space<vmem>>, vector<128x128xf32>
    %cst_138 = arith.constant dense<0.000000e+00> : vector<128x128xf32>
    %146 = tpu.matmul %144, %145, %cst_138 {dimension_numbers = #tpu.dot_dimension_numbers<[1], [0], [0], [1], [0, 0, 1, 1], [], []>} : vector<128x128xf32>, vector<128x128xf32>, vector<128x128xf32> -> vector<128x128xf32>
    %c0_139 = arith.constant 0 : index
    %c0_140 = arith.constant 0 : index
    %147 = vector.load %arg10[%c0_139, %c0_140] : memref<1x128xf32, #tpu.memory_space<vmem>>, vector<1x128xf32>
    %148 = vector.shape_cast %147 : vector<1x128xf32> to vector<128xf32>
    %149 = vector.shape_cast %148 : vector<128xf32> to vector<1x128xf32>
    %150 = vector.broadcast %149 : vector<1x128xf32> to vector<128x128xf32>
    %151 = arith.mulf %146, %150 : vector<128x128xf32>
    %c0_141 = arith.constant 0 : index
    %c0_142 = arith.constant 0 : index
    %152 = vector.load %arg11[%c0_141, %c0_142] : memref<1x128xf32, #tpu.memory_space<vmem>>, vector<1x128xf32>
    %153 = vector.shape_cast %152 : vector<1x128xf32> to vector<128xf32>
    %154 = vector.shape_cast %153 : vector<128xf32> to vector<1x128xf32>
    %155 = vector.broadcast %154 : vector<1x128xf32> to vector<128x128xf32>
    %156 = arith.addf %151, %155 : vector<128x128xf32>
    %157 = arith.addf %142, %156 : vector<128x128xf32>
    %cst_143 = arith.constant 0.000000e+00 : f32
    %158 = vector.broadcast %cst_143 : f32 to vector<128x128xf32>
    %159 = arith.maximumf %157, %158 : vector<128x128xf32>
    %160 = vector.shape_cast %159 : vector<128x128xf32> to vector<1x8x16x128xf32>
    %c0_144 = arith.constant 0 : index
    %c0_145 = arith.constant 0 : index
    %c0_146 = arith.constant 0 : index
    %c0_147 = arith.constant 0 : index
    %161 = vector.load %arg12[%c0_144, %c0_145, %c0_146, %c0_147] : memref<1x8x16x128xf32, #tpu.memory_space<vmem>>, vector<1x8x16x128xf32>
    tpu.vector_store %arg12[%c0_144, %c0_145, %c0_146, %c0_147], %160 {strides = array<i32>} : memref<1x8x16x128xf32, #tpu.memory_space<vmem>>, vector<1x8x16x128xf32>,
    return
  }
  func.func @transform_0(%arg0: i32, %arg1: i32) -> (i32, i32, i32, i32) {
    %c0_i32 = arith.constant 0 : i32
    %c0_i32_0 = arith.constant 0 : i32
    %c0_i32_1 = arith.constant 0 : i32
    %c0_i32_2 = arith.constant 0 : i32
    return %arg0, %c0_i32, %c0_i32_0, %c0_i32_1 : i32, i32, i32, i32
  }
  func.func @transform_1(%arg0: i32, %arg1: i32) -> (i32, i32, i32, i32) {
    %c0_i32 = arith.constant 0 : i32
    %c0_i32_0 = arith.constant 0 : i32
    %c0_i32_1 = arith.constant 0 : i32
    %c0_i32_2 = arith.constant 0 : i32
    %c0_i32_3 = arith.constant 0 : i32
    return %c0_i32, %c0_i32_0, %c0_i32_1, %c0_i32_2 : i32, i32, i32, i32
  }
  func.func @transform_2(%arg0: i32, %arg1: i32) -> (i32, i32) {
    %c0_i32 = arith.constant 0 : i32
    %c0_i32_0 = arith.constant 0 : i32
    %c0_i32_1 = arith.constant 0 : i32
    return %c0_i32, %c0_i32_0 : i32, i32
  }
  func.func @transform_3(%arg0: i32, %arg1: i32) -> (i32, i32) {
    %c0_i32 = arith.constant 0 : i32
    %c0_i32_0 = arith.constant 0 : i32
    %c0_i32_1 = arith.constant 0 : i32
    return %c0_i32, %c0_i32_0 : i32, i32
  }
  func.func @transform_4(%arg0: i32, %arg1: i32) -> (i32, i32, i32, i32) {
    %c0_i32 = arith.constant 0 : i32
    %c0_i32_0 = arith.constant 0 : i32
    %c0_i32_1 = arith.constant 0 : i32
    %c0_i32_2 = arith.constant 0 : i32
    %c0_i32_3 = arith.constant 0 : i32
    return %c0_i32, %c0_i32_0, %c0_i32_1, %c0_i32_2 : i32, i32, i32, i32
  }
  func.func @transform_5(%arg0: i32, %arg1: i32) -> (i32, i32) {
    %c0_i32 = arith.constant 0 : i32
    %c0_i32_0 = arith.constant 0 : i32
    %c0_i32_1 = arith.constant 0 : i32
    return %c0_i32, %c0_i32_0 : i32, i32
  }
  func.func @transform_6(%arg0: i32, %arg1: i32) -> (i32, i32) {
    %c0_i32 = arith.constant 0 : i32
    %c0_i32_0 = arith.constant 0 : i32
    %c0_i32_1 = arith.constant 0 : i32
    return %c0_i32, %c0_i32_0 : i32, i32
  }
  func.func @transform_7(%arg0: i32, %arg1: i32) -> (i32, i32) {
    %c0_i32 = arith.constant 0 : i32
    %c0_i32_0 = arith.constant 0 : i32
    %c0_i32_1 = arith.constant 0 : i32
    return %c0_i32, %c0_i32_0 : i32, i32
  }
  func.func @transform_8(%arg0: i32, %arg1: i32) -> (i32, i32) {
    %c0_i32 = arith.constant 0 : i32
    %c0_i32_0 = arith.constant 0 : i32
    %c0_i32_1 = arith.constant 0 : i32
    return %c0_i32, %c0_i32_0 : i32, i32
  }
  func.func @transform_9(%arg0: i32, %arg1: i32) -> (i32, i32) {
    %c0_i32 = arith.constant 0 : i32
    %c0_i32_0 = arith.constant 0 : i32
    %c0_i32_1 = arith.constant 0 : i32
    return %c0_i32, %c0_i32_0 : i32, i32
  }
  func.func @transform_10(%arg0: i32, %arg1: i32) -> (i32, i32, i32, i32) {
    %c0_i32 = arith.constant 0 : i32
    %c0_i32_0 = arith.constant 0 : i32
    %c0_i32_1 = arith.constant 0 : i32
    return %arg0, %arg1, %c0_i32, %c0_i32_0 : i32, i32, i32, i32
  }
}

</mosaic_0001>

<bundles_post_ra>
// kernel: tpu_custom_call.1
= control target key start
LH: loop header
LB: loop body
LE: loop exit
PB: predicated region body
PF: predicated region fallthrough
CT: control target
= control target key end

     0   :  { %s9169_s0 = inlined_call_operand.hbm [shape: f32[2,20,24,128], index: 0, kind: input, shape index: {}]   ;;  %s9170_s1 = inlined_call_operand.hbm [shape: f32[3,3,128,128], index: 1, kind: input, shape index: {}]   ;;  %s9171_s2 = inlined_call_operand.vmem [shape: f32[1,128], index: 2, kind: input, shape index: {}]   ;;  %s9172_s3 = inlined_call_operand.vmem [shape: f32[1,128], index: 3, kind: input, shape index: {}]   ;;  %s9173_s4 = inlined_call_operand.hbm [shape: f32[3,3,128,128], index: 4, kind: input, shape index: {}]   ;;  %s9174_s5 = inlined_call_operand.vmem [shape: f32[1,128], index: 5, kind: input, shape index: {}]   ;;  %s9175_s6 = inlined_call_operand.vmem [shape: f32[1,128], index: 6, kind: input, shape index: {}]   ;;  %s9176_s7 = inlined_call_operand.hbm [shape: f32[128,128], index: 7, kind: input, shape index: {}]   ;;  %s9177_s8 = inlined_call_operand.vmem [shape: f32[1,128], index: 8, kind: input, shape index: {}]   ;;  %s9178_s9 = inlined_call_operand.vmem [shape: f32[1,128], index: 9, kind: input, shape index: {}]   ;;  %s9179_s10 = inlined_call_operand.hbm [shape: f32[2,16,16,128], index: 10, kind: output, shape index: {}]  }
   0x1   :  { %9202 = sst [smem:[#allocation27_spill]] %s9170_s1 }
   0x2   :  { %9203 = sst [smem:[#allocation28_spill]] %s9171_s2 }
   0x3   :  { %9204 = sst [smem:[#allocation29_spill]] %s9172_s3 }
   0x4   :  { %9205 = sst [smem:[#allocation30_spill]] %s9173_s4 }
   0x5   :  { %9206 = sst [smem:[#allocation31_spill]] %s9174_s5 }
   0x6   :  { %9207 = sst [smem:[#allocation32_spill]] %s9175_s6 }
   0x7   :  { %9208 = sst [smem:[#allocation33_spill]] %s9177_s8 }
   0x8   :  { %9209 = sst [smem:[#allocation34_spill]] %s9178_s9 }
   0x9   :  { %9210 = sst [smem:[#allocation35_spill]] %s9179_s10 }
   0xa   :  { %15 = vsyncpa [#allocation4], 0 }
   0xb   :  { %17 = vsyncpa [#allocation4 + $0x1], 0 }
   0xc   :  { %18 = vsyncpa [#allocation7], 0 }
   0xd   :  { %19 = vsyncpa [#allocation10], 0 }
   0xe   :  { %20 = vsyncpa [#allocation5], 0 }
   0xf   :  { %22 = vsyncpa [#allocation5 + $0x1], 0  ;;  %s7900_s13 = smov 0   ;;  %s7902_s14 = smov 0  }
  0x10   :  { %s7904_s15 = smov 0   ;;  %s7906_s16 = smov 0  }
  0x11   :  { %s7908_s17 = smov 0   ;;  %s7910_s18 = smov 0  }
  0x12   :  { %s7912_s19 = smov 0   ;;  %s7914_s20 = smov 0  }
  0x13   :  { %s7916_s21 = smov 0   ;;  %s7918_s22 = smov 0  }
  0x14   :  { %s7920_s23 = smov 0  }
  0x15 LB: > { %9211 = sst [smem:[#allocation16_spill]] %s7791_s13  ;;  %s4739_s24 = sadd.s32 4294967295, %s7831_s23   ;;  %s7831_s23 = sphi %s7920_s23, %s28_s23   ;;  %s7827_s22 = sphi %s7918_s22, %s9270_s22   ;;  %s7823_s21 = sphi %s7916_s21, %s9269_s21   ;;  %s7819_s20 = sphi %s7914_s20, %s9268_s20   ;;  %s7815_s19 = sphi %s7912_s19, %s9267_s19   ;;  %s7811_s18 = sphi %s7910_s18, %s9266_s18   ;;  %s7807_s17 = sphi %s7908_s17, %s9265_s17   ;;  %s7803_s16 = sphi %s7906_s16, %s9264_s16   ;;  %s7799_s15 = sphi %s7904_s15, %s9263_s15   ;;  %s7795_s14 = sphi %s7902_s14, %s9262_s14   ;;  %s7791_s13 = sphi %s7900_s13, %s9261_s13  }
  0x16   : > { %9212 = sst [smem:[#allocation17_spill]] %s7819_s20  ;;  %s4740_s25 = sadd.s32 4294967294, %s7831_s23  }
  0x17   : > { %p60_p0 = scmp.ne.s32.totalorder %s7807_s17, %s7803_s16  ;;  %p7956_p1 = scmp.eq.s32.totalorder %s4739_s24, 0 }
  0x18   : > { %p274_p2 = scmp.ne.s32.totalorder %s7799_s15, %s7795_s14  ;;  %p275_p4 = scmp.eq.s32.totalorder %s4739_s24, 3 }
  0x19   : > { %s9213_s26 = scalar_select %p7956_p1, 1, 0 }
  0x1a   : > { %p7965_p3 = por %p7956_p1, %p60_p0  ;;  %p280_p5 = scmp.ne.s32.totalorder %s7795_s14, %s7791_s13 }
  0x1b   : > { %p281_p6 = scmp.eq.s32.totalorder %s4740_s25, 3  ;;  %p7971_p7 = por %p275_p4, %p274_p2 }
  0x1c   : > { %s9214_s28 = scalar_select %p7965_p3, 1, 0 }
  0x1d   : > { %s9215_s29 = scalar_select %p7971_p7, 1, 0 }
  0x1e   : > { %p4741_p8 = scmp.ge.s32.totalorder %s7831_s23, 1  ;;  %p7976_p9 = por %p281_p6, %p280_p5 }
  0x1f   : > { %9216 = sst [smem:[#allocation18_spill]] %s9215_s29  ;;  %p288_p10 = scmp.lt.s32.totalorder %s7831_s23, 5 }
  0x20   : > { %s9217_s30 = scalar_select %p7976_p9, 1, 0 }
  0x21   : > { %p7981_p11 = pnand %p4741_p8, %p288_p10  ;;  %s7833_s12 = smov [#allocation6]  }
  0x22   : > { %9218 = sst [smem:[#allocation19_spill]] %s9217_s30  ;;  %s300_s16 = sshll.u32 %s7833_s12, 4  ;;  %s7985_s16 = int_to_ptr.vmem [resolvable:$true] %s300_s16 }
  0x23   : > { %s9219_s11 = scalar_select %p7981_p11, 1, 0 }
  0x24   : > { %p7463_p12 = pneg %p7981_p11  ;;  %s7834_s25 = smov [#allocation8]  }
  0x25   : > { %s319_s27 = sshll.u32 %s7834_s25, 4  ;;  %s7835_s30 = smov [#allocation9]   ;;  %s7995_s27 = int_to_ptr.vmem [resolvable:$true] %s319_s27 }
  0x26   : > { %p7991_p13 = pnand %p7463_p12, %p7956_p1  ;;  %s7997_s13 = sshll.u32 %s7835_s30, 4  ;;  %s339_s13 = int_to_ptr.vmem [resolvable:$true] %s7997_s13 }
  0x27   : > { %s9221_s1 = sld [smem:[#allocation27_spill]] }
  0x28   : > { %p8007_p2 = pneg %p7991_p13 }
  0x2d   : > { %s7587_s12 = scalar_lea.hbm %s9221_s1, 18432 }
  0x2e   : > { %p7588_p0 = scmp.ne.s32.totalorder %s9221_s1, %s7587_s12  ;;  %p7594_p6 = scmp.lt.u32.totalorder %s7587_s12, %s9221_s1 }
  0x30   : > { %p7590_p4 = pnand %p8007_p2, %p7588_p0 }
  0x32   : > { %p7591_p5 = pneg %p7590_p4 }
  0x34   : > { %p7596_p8 = pnand %p7594_p6, %p7591_p5 }
  0x36   : > { %7599 = shalt.err (!%p7596_p8)
}
  0x37   : > { %s7600_s9 = scalar_lea.vmem %s7985_s16, 18432  ;;  %p7608_p7 = scmp.lt.s32.totalorder %s7985_s16, %s7985_s16 }
  0x38   : > { %p7601_p10 = scmp.ne.s32.totalorder %s7985_s16, %s7600_s9  ;;  %p7609_p1 = scmp.lt.s32.totalorder %s7600_s9, %s7600_s9 }
  0x3a   : > { %p7603_p12 = pnand %p7601_p10, %p8007_p2  ;;  %p7610_p0 = por %p7609_p1, %p7608_p7 }
  0x3c   : > { %p7604_p9 = pneg %p7603_p12 }
  0x3e   : > { %p7611_p4 = pnand %p7610_p0, %p7604_p9 }
  0x40   : > { %7614 = shalt.err (!%p7611_p4)
}
  0x41   : > { %s9190_s10 = smov 128   ;;  %s9191_s20 = smov 8  }
  0x42   : > { %7466 = dma.hbm_to_vmem [thread:$0]  (!%p7991_p13), %s9221_s1, 18432, %s7985_s16, [#allocation7], %s9190_s10, %s9190_s10, %s9191_s20  }
  0x43   : > { %s9223_s4 = sld [smem:[#allocation30_spill]] }
  0x49   : > { %s7615_s9 = scalar_lea.hbm %s9223_s4, 18432 }
  0x4a   : > { %p7616_p1 = scmp.ne.s32.totalorder %s9223_s4, %s7615_s9  ;;  %p7622_p5 = scmp.lt.u32.totalorder %s7615_s9, %s9223_s4 }
  0x4c   : > { %p7618_p7 = pnand %p7616_p1, %p8007_p2 }
  0x4e   : > { %p7619_p9 = pneg %p7618_p7 }
  0x50   : > { %p7624_p6 = pnand %p7622_p5, %p7619_p9 }
  0x52   : > { %7627 = shalt.err (!%p7624_p6)
}
  0x53   : > { %s7628_s16 = scalar_lea.vmem %s7995_s27, 18432  ;;  %p7636_p0 = scmp.lt.s32.totalorder %s7995_s27, %s7995_s27 }
  0x54   : > { %p7629_p8 = scmp.ne.s32.totalorder %s7995_s27, %s7628_s16  ;;  %p7637_p4 = scmp.lt.s32.totalorder %s7628_s16, %s7628_s16 }
  0x56   : > { %p7631_p10 = pnand %p7629_p8, %p8007_p2  ;;  %p7638_p1 = por %p7637_p4, %p7636_p0 }
  0x58   : > { %p7632_p12 = pneg %p7631_p10 }
  0x5a   : > { %p7639_p7 = pnand %p7638_p1, %p7632_p12 }
  0x5c   : > { %7642 = shalt.err (!%p7639_p7)
}
  0x5d   : > { %7469 = dma.hbm_to_vmem [thread:$0]  (!%p7991_p13), %s9223_s4, 18432, %s7995_s27, [#allocation7], %s9190_s10, %s9190_s10, %s9191_s20  }
  0x5e   : > { %s7643_s29 = scalar_lea.hbm %s9176_s7, 2048 }
  0x5f   : > { %p7644_p9 = scmp.ne.s32.totalorder %s9176_s7, %s7643_s29  ;;  %p7650_p8 = scmp.lt.u32.totalorder %s7643_s29, %s9176_s7 }
  0x61   : > { %p7646_p5 = pnand %p7644_p9, %p8007_p2 }
  0x63   : > { %p7647_p6 = pneg %p7646_p5 }
  0x65   : > { %p7652_p10 = pnand %p7650_p8, %p7647_p6 }
  0x67   : > { %7655 = shalt.err (!%p7652_p10)
}
  0x68   : > { %s7656_s16 = scalar_lea.vmem %s339_s13, 2048  ;;  %p7664_p1 = scmp.lt.s32.totalorder %s339_s13, %s339_s13 }
  0x69   : > { %p7657_p12 = scmp.ne.s32.totalorder %s339_s13, %s7656_s16  ;;  %p7665_p7 = scmp.lt.s32.totalorder %s7656_s16, %s7656_s16 }
  0x6b   : > { %p7659_p0 = pnand %p7657_p12, %p8007_p2  ;;  %p7666_p3 = por %p7665_p7, %p7664_p1 }
  0x6d   : > { %p7660_p4 = pneg %p7659_p0 }
  0x6f   : > { %p7667_p11 = pnand %p7666_p3, %p7660_p4 }
  0x71   : > { %7670 = shalt.err (!%p7667_p11)
}
  0x72   : > { %7472 = dma.hbm_to_vmem [thread:$0]  (!%p7991_p13), %s9176_s7, 2048, %s339_s13, [#allocation10], %s9190_s10, %s9190_s10, %s9191_s20  }
  0x73   : > { %s37_s6 = sadd.s32 1, %s7823_s21  ;;  %s40_s24 = sadd.s32 1, %s7827_s22 }
  0x74   : > { %p38_p3 = scmp.ge.s32.totalorder %s37_s6, 2  ;;  %s47_s3 = sadd.s32 1, %s7811_s18 }
  0x75   : > { %p54_p11 = scmp.ne.s32.totalorder %s7811_s18, %s7807_s17  ;;  %p55_p2 = scmp.eq.s32.totalorder %s7831_s23, 0 }
  0x76   : > { %s9272_s6 = smov (%p38_p3, %s37_s6), 0  ;;  %s9274_s24 = smov (!%p38_p3, %s40_s24), %s7827_s22 }
  0x77   : > { %s260_s5 = ssub.s32 %s7823_s21, %s9272_s6  ;;  %p42_p9 = scmp.ge.s32.totalorder %s9274_s24, 2 }
  0x78   : > { %p7484_p5 = scmp.lt.s32.totalorder %s7831_s23, 4  ;;  %p8091_p13 = por %p55_p2, %p54_p11 }
  0x79   : > { %s358_s8 = sand.u32 1, %s7811_s18   ;;  %s9276_s24 = smov (%p42_p9, %s9274_s24), 0 }
  0x7a   : > { %s7444_s29 = smul.u32 480, %s358_s8  ;;  %s44_s12 = ssub.s32 %s7827_s22, %s9276_s24 }
  0x7b   : > { %s7445_s25 = smul.u32 7680, %s7827_s22  ;;  %p45_p6 = scmp.eq.s32.totalorder %s44_s12, 0 }
  0x7c   : > { %s261_s30 = sor.u32 %s260_s5, %s44_s12  ;;  %s9225_s16 = sadd.s32 1, %s7799_s15 }
  0x7d   : > { %p262_p8 = scmp.eq.s32.totalorder %s261_s30, 0  ;;  %s8112_s20 = scalar_lea.hbm %s9169_s0, %s7445_s25 }
  0x7e   : > { %s8102_s9 = scalar_select %p45_p6, %s7811_s18, %s47_s3  }
  0x7f   : > { %s8107_s27 = scalar_select %p262_p8, %s7799_s15, %s9225_s16  }
  0x80   : > { %s362_s1 = scalar_lea.vmem [#allocation3], %s7444_s29  ;;  %p8120_p10 = pnand %p7484_p5, %p8091_p13 }
  0x81   : > { %s369_s4 = sshll.u32 %s362_s1, 4  ;;  %s8124_s5 = scalar_lea.sflag [#allocation4], %s358_s8  ;;  %s8114_s4 = int_to_ptr.vmem [resolvable:$true] %s369_s4 }
  0x82   : > { %s7671_s10 = scalar_lea.hbm %s8112_s20, 7680  ;;  %p7673_p0 = pneg %p8120_p10 }
  0x83   : > { %p7672_p12 = scmp.ne.s32.totalorder %s8112_s20, %s7671_s10  ;;  %s7676_s13 = scalar_lea.hbm %s9169_s0, 15360 }
  0x84   : > { %p7677_p7 = scmp.lt.u32.totalorder %s8112_s20, %s9169_s0  ;;  %p7678_p3 = scmp.lt.u32.totalorder %s7676_s13, %s7671_s10 }
  0x85   : > { %p7674_p4 = pnand %p7673_p0, %p7672_p12  ;;  %p7680_p2 = scmp.lt.u32.totalorder %s7671_s10, %s8112_s20 }
  0x86   : > { %p7679_p11 = por %p7678_p3, %p7677_p7 }
  0x87   : > { %p7675_p1 = pneg %p7674_p4 }
  0x88   : > { %p7681_p9 = por %p7680_p2, %p7679_p11 }
  0x8a   : > { %p7682_p5 = pnand %p7681_p9, %p7675_p1 }
  0x8c   : > { %7685 = shalt.err (!%p7682_p5)
}
  0x8d   : > { %s7686_s8 = scalar_lea.vmem %s8114_s4, 7680  ;;  %s7838_s30 = smov [#allocation3]  }
  0x8e   : > { %p7687_p13 = scmp.ne.s32.totalorder %s8114_s4, %s7686_s8  ;;  %s7691_s16 = sshll.u32 %s7838_s30, 4  ;;  %s7692_s16 = int_to_ptr.vmem [resolvable:$false] %s7691_s16 }
  0x8f   : > { %s7693_s2 = scalar_lea.vmem %s7692_s16, 15360  ;;  %p7694_p12 = scmp.lt.s32.totalorder %s8114_s4, %s7692_s16 }
  0x90   : > { %p7689_p6 = pnand %p7687_p13, %p7673_p0  ;;  %p7695_p4 = scmp.lt.s32.totalorder %s7693_s2, %s7686_s8 }
  0x92   : > { %p7690_p8 = pneg %p7689_p6  ;;  %p7696_p7 = por %p7695_p4, %p7694_p12 }
  0x94   : > { %p7697_p3 = pnand %p7696_p7, %p7690_p8 }
  0x96   : > { %7700 = shalt.err (!%p7697_p3)
}
  0x97   : > { %s9227_s10 = smov 8   ;;  %s9228_s1 = smov 128  }
  0x98   : > { %7476 = dma.hbm_to_vmem [thread:$0]  (!%p8120_p10), %s8112_s20, 7680, %s8114_s4, %s8124_s5, %s9228_s1, %s9228_s1, %s9227_s10  }
  0x99   : > { %p9229_p0 = scmp.ne.s32.totalorder %s9219_s11, 0 }
  0x9b   : > { %381 = sbr.rel (%p9229_p0) target bundleno = 1374 (0x55e), region = 60 }
  0xa2   : > { %s383_s29 = sand.u32 1, %s7807_s17   ;;  %p9230_p1 = scmp.ne.s32.totalorder %s9214_s28, 0 }
  0xa3   : > { %s8158_s13 = smul.u32 480, %s383_s29  ;;  %s384_s12 = scalar_lea.sflag [#allocation4], %s383_s29 }
  0xa5   : > { %s387_s25 = scalar_lea.vmem [#allocation3], %s8158_s13 }
  0xa6   : > { %7774 = dma.done.wait (%p9230_p1), %s384_s12, 7680  }
  0xa7   : > { %7776 = vsyncadd (%p9230_p1), %s384_s12, 4294959616  ;;  %p9231_p11 = scmp.ne.s32.totalorder %s9213_s26, 0 }
  0xa9   : > { %7778 = dma.done.wait (%p9231_p11), [#allocation7], 36864  }
  0xaa   : > { %7780 = vsyncadd (%p9231_p11), [#allocation7], 4294930432 }
  0xab   : > { %7782 = dma.done.wait (%p9231_p11), [#allocation10], 2048  }
  0xac   : > { %7784 = vsyncadd (%p9231_p11), [#allocation10], 4294965248  ;;  %s433_s4 = sand.u32 1, %s7795_s14   ;;  %v7839_v0 = vmov 0.0   ;;  %s4753_s28 = smul.u32 192, %s7815_s19  ;;  %v594_v1 = vld [vmem:[#allocation6 + $0x80] sm:$0xff] }
  0xad   : > { %2553 = vst [vmem:[#allocation2] sm:$0x1] %v7839_v0  ;;  %2554 = vst [vmem:[#allocation2 + $0x18] sm:$0x1] %v7839_v0  ;;  %s8176_s26 = sshll.u32 %s433_s4, 7  ;;  %v595_v2 = vld [vmem:[#allocation6 + $0x88] sm:$0xff] }
  0xae   : > { %2555 = vst [vmem:[#allocation2 + $0x30] sm:$0x1] %v7839_v0  ;;  %2556 = vst [vmem:[#allocation2 + $0x48] sm:$0x1] %v7839_v0  ;;  %v596_v3 = vld [vmem:[#allocation6 + $0x90] sm:$0xff]  ;;  %v6532_v4 = vpack.c.bf16 %v595_v2, %v594_v1  ;;  %v597_v5 = vld [vmem:[#allocation6 + $0x98] sm:$0xff]  ;;  %s8181_s11 = scalar_lea.vmem %s387_s25, %s4753_s28 [#allocation3] }
  0xaf   : > { %2557 = vst [vmem:[#allocation2 + $0x60] sm:$0x1] %v7839_v0  ;;  %2558 = vst [vmem:[#allocation2 + $0x78] sm:$0x1] %v7839_v0  ;;  %v6536_v6 = vpack.c.bf16 %v597_v5, %v596_v3  ;;  %v598_v7 = vld [vmem:[#allocation6 + $0xa0] sm:$0xff]  ;;  %v599_v8 = vld [vmem:[#allocation6 + $0xa8] sm:$0xff] }
  0xb0   : > { %2559 = vst [vmem:[#allocation2 + $0x90] sm:$0x1] %v7839_v0  ;;  %2560 = vst [vmem:[#allocation2 + $0xa8] sm:$0x1] %v7839_v0  ;;  %6533 = vmatprep.subr.bf16.mxu0 %v6532_v4  ;;  %7140 = vmatprep.subr.bf16.mxu1 %v6532_v4  ;;  %v6540_v9 = vpack.c.bf16 %v599_v8, %v598_v7  ;;  %v8184_v10 = vld [vmem:[%s8181_s11] sm:$0xff]  ;;  %v8187_v11 = vld [vmem:[%s8181_s11 + $0x8] sm:$0xff] }
  0xb1   : > { %2561 = vst [vmem:[#allocation2 + $0xc0] sm:$0x1] %v7839_v0  ;;  %2562 = vst [vmem:[#allocation2 + $0xd8] sm:$0x1] %v7839_v0  ;;  %6535 = vmatpush3.bf16.msra.mxu0 %v6532_v4  ;;  %7148 = vmatpush3.bf16.msra.mxu1 %v6532_v4  ;;  %vm522_vm0 = vcmask 1046528   ;;  %vm940_vm1 = vcmask 1045504  }
  0xb2   : > { %2563 = vst [vmem:[#allocation2 + $0x11] sm:$0x1] %v7839_v0  ;;  %2564 = vst [vmem:[#allocation2 + $0x29] sm:$0x1] %v7839_v0  ;;  %6537 = vmatprep.subr.bf16.mxu0 %v6536_v6  ;;  %7141 = vmatprep.subr.bf16.mxu1 %v6536_v6  ;;  %v600_v12 = vld [vmem:[#allocation6 + $0xb0] sm:$0xff]  ;;  %v601_v13 = vld [vmem:[#allocation6 + $0xb8] sm:$0xff] }
  0xb3   : > { %2565 = vst [vmem:[#allocation2 + $0x41] sm:$0x1] %v7839_v0  ;;  %2566 = vst [vmem:[#allocation2 + $0x59] sm:$0x1] %v7839_v0  ;;  %v523_v14 = vrot.slane %v8184_v10, 1  ;;  %v524_v15 = vrot.slane %v8187_v11, 1  ;;  %v6544_v21 = vpack.c.bf16 %v601_v13, %v600_v12 }
  0xb4   : > { %2567 = vst [vmem:[#allocation2 + $0x71] sm:$0x1] %v7839_v0  ;;  %2568 = vst [vmem:[#allocation2 + $0x89] sm:$0x1] %v7839_v0  ;;  %v442_v16 = vld [vmem:[%s8181_s11 + $0x10] sm:$0xff]  ;;  %v941_v17 = vrot.slane %v8184_v10, 2 }
  0xb5   : > { %2569 = vst [vmem:[#allocation2 + $0xa1] sm:$0x1] %v7839_v0  ;;  %2570 = vst [vmem:[#allocation2 + $0xb9] sm:$0x1] %v7839_v0  ;;  %v944_v18 = vrot.slane %v442_v16, 2  ;;  %v942_v19 = vrot.slane %v8187_v11, 2  ;;  %6539 = vmatpush3.bf16.msra.mxu0 %v6536_v6  ;;  %v525_v20 = vsel %vm522_vm0, %v523_v14, %v524_v15  ;;  %7149 = vmatpush3.bf16.msra.mxu1 %v6536_v6 }
  0xb6   : > { %2571 = vst [vmem:[#allocation2 + $0xd1] sm:$0x1] %v7839_v0  ;;  %2572 = vst [vmem:[#allocation2 + $0xe9] sm:$0x1] %v7839_v0  ;;  %6541 = vmatprep.subr.bf16.mxu0 %v6540_v9  ;;  %5446 = vmatprep.mubr.f32.mxu0 %v525_v20  ;;  %v602_v23 = vld [vmem:[#allocation6 + $0xc0] sm:$0xff]  ;;  %v603_v24 = vld [vmem:[#allocation6 + $0xc8] sm:$0xff] }
  0xb7   : > { %v8196_v22 = vsel %vm940_vm1, %v941_v17, %v942_v19  ;;  %7142 = vmatprep.subr.bf16.mxu1 %v6540_v9  ;;  %v8199_v25 = vsel %vm940_vm1, %v942_v19, %v944_v18  ;;  %v6548_v26 = vpack.c.bf16 %v603_v24, %v602_v23  ;;  %v604_v27 = vld [vmem:[#allocation6 + $0xd0] sm:$0xff]  ;;  %v605_v28 = vld [vmem:[#allocation6 + $0xd8] sm:$0xff]  ;;  %v606_v30 = vld [vmem:[#allocation6 + $0xe0] sm:$0xff]  ;;  %v526_v40 = vrot.slane %v442_v16, 1  ;;  %s9243_s5 = sld [smem:[#allocation28_spill]]  ;;  %s9244_s16 = sld [smem:[#allocation29_spill]] }
  0xb8   : > { %v6552_v29 = vpack.c.bf16 %v605_v28, %v604_v27  ;;  %v607_v31 = vld [vmem:[#allocation6 + $0xe8] sm:$0xff]  ;;  %v608_v33 = vld [vmem:[#allocation6 + $0xf0] sm:$0xff]  ;;  %v609_v34 = vld [vmem:[#allocation6 + $0xf8] sm:$0xff]  ;;  %s8724_s2 = scalar_lea.vmem [#allocation11], %s8176_s26  ;;  %p4756_p10 = scmp.ne.s32.totalorder %s7815_s19, 0 }
  0xb9   : > { %6543 = vmatpush3.bf16.msra.mxu0 %v6540_v9  ;;  %7150 = vmatpush3.bf16.msra.mxu1 %v6540_v9  ;;  %v6556_v32 = vpack.c.bf16 %v607_v31, %v606_v30  ;;  %v6560_v35 = vpack.c.bf16 %v609_v34, %v608_v33  ;;  %v476_v36 = vld [vmem:[#allocation6] sm:$0xff]  ;;  %v477_v37 = vld [vmem:[#allocation6 + $0x8] sm:$0xff]  ;;  %v8205_v39 = vld [vmem:[%s8181_s11 + $0x20] sm:$0xff]  ;;  %v527_v49 = vsel %vm522_vm0, %v524_v15, %v526_v40 }
  0xba   : > { %6545 = vmatprep.subr.bf16.mxu0 %v6544_v21  ;;  %7143 = vmatprep.subr.bf16.mxu1 %v6544_v21  ;;  %v8202_v38 = vld [vmem:[%s8181_s11 + $0x18] sm:$0xff]  ;;  %v6564_v41 = vpack.c.bf16 %v477_v37, %v476_v36  ;;  %v529_v43 = vrot.slane %v8205_v39, 1  ;;  %v8210_v44 = vld [vmem:[%s8181_s11 + $0x28] sm:$0xff]  ;;  %v478_v45 = vld [vmem:[#allocation6 + $0x10] sm:$0xff] }
  0xbb   : > { %v528_v42 = vrot.slane %v8202_v38, 1  ;;  %v479_v46 = vld [vmem:[#allocation6 + $0x18] sm:$0xff]  ;;  %v8213_v47 = vld [vmem:[%s8181_s11 + $0x30] sm:$0xff]  ;;  %v8216_v48 = vld [vmem:[%s8181_s11 + $0x38] sm:$0xff]  ;;  %v531_v50 = vrot.slane %v8210_v44, 1 }
  0xbc   : > { %v6568_v52 = vpack.c.bf16 %v479_v46, %v478_v45  ;;  %v533_v53 = vrot.slane %v8213_v47, 1  ;;  %v534_v54 = vrot.slane %v8216_v48, 1  ;;  %v8226_v55 = vld [vmem:[%s8181_s11 + $0x40] sm:$0xff]  ;;  %v480_v56 = vld [vmem:[#allocation6 + $0x20] sm:$0xff]  ;;  %v481_v57 = vld [vmem:[#allocation6 + $0x28] sm:$0xff] }
  0xbd   : > { %6547 = vmatpush3.bf16.msra.mxu0 %v6544_v21  ;;  %7151 = vmatpush3.bf16.msra.mxu1 %v6544_v21  ;;  %v8221_v51 = vsel %vm522_vm0, %v528_v42, %v529_v43  ;;  %v8229_v58 = vld [vmem:[%s8181_s11 + $0x48] sm:$0xff]  ;;  %v8232_v59 = vld [vmem:[%s8181_s11 + $0x50] sm:$0xff]  ;;  %v8236_v60 = vsel %vm522_vm0, %v529_v43, %v531_v50  ;;  %v536_v61 = vrot.slane %v8226_v55, 1  ;;  %v6572_v63 = vpack.c.bf16 %v481_v57, %v480_v56  ;;  %v8245_v2 = vld [vmem:[%s8181_s11 + $0x58] sm:$0xff] }
  0xbe   : > { %6549 = vmatprep.subr.bf16.mxu0 %v6548_v26  ;;  %7144 = vmatprep.subr.bf16.mxu1 %v6548_v26  ;;  %v8240_v62 = vsel %vm522_vm0, %v533_v53, %v534_v54  ;;  %v538_v0 = vrot.slane %v8229_v58, 1  ;;  %v539_v1 = vrot.slane %v8232_v59, 1  ;;  %v482_v3 = vld [vmem:[#allocation6 + $0x30] sm:$0xff]  ;;  %v483_v4 = vld [vmem:[#allocation6 + $0x38] sm:$0xff]  ;;  %v541_v8 = vrot.slane %v8245_v2, 1  ;;  %v8265_v15 = vld [vmem:[%s8181_s11 + $0x70] sm:$0xff] }
  0xbf   : > { %v8248_v5 = vld [vmem:[%s8181_s11 + $0x60] sm:$0xff]  ;;  %v8251_v6 = vld [vmem:[%s8181_s11 + $0x68] sm:$0xff]  ;;  %v8256_v7 = vsel %vm522_vm0, %v534_v54, %v536_v61  ;;  %v6576_v12 = vpack.c.bf16 %v483_v4, %v482_v3  ;;  %v484_v16 = vld [vmem:[#allocation6 + $0x40] sm:$0xff]  ;;  %v546_v21 = vrot.slane %v8265_v15, 1 }
  0xc0   : > { %v8260_v9 = vsel %vm522_vm0, %v538_v0, %v539_v1  ;;  %v543_v13 = vrot.slane %v8248_v5, 1  ;;  %v544_v14 = vrot.slane %v8251_v6, 1  ;;  %v485_v17 = vld [vmem:[#allocation6 + $0x48] sm:$0xff]  ;;  %v8271_v19 = vld [vmem:[%s8181_s11 + $0x80] sm:$0xff]  ;;  %v8276_v20 = vsel %vm522_vm0, %v539_v1, %v541_v8  ;;  %v8285_v28 = vld [vmem:[%s8181_s11 + $0x88] sm:$0xff] }
  0xc1   : > { %6551 = vmatpush3.bf16.msra.mxu0 %v6548_v26  ;;  %7152 = vmatpush3.bf16.msra.mxu1 %v6548_v26  ;;  %v8268_v18 = vld [vmem:[%s8181_s11 + $0x78] sm:$0xff]  ;;  %v6580_v24 = vpack.c.bf16 %v485_v17, %v484_v16  ;;  %v549_v27 = vrot.slane %v8271_v19, 1  ;;  %v487_v30 = vld [vmem:[#allocation6 + $0x58] sm:$0xff]  ;;  %v8288_v31 = vld [vmem:[%s8181_s11 + $0x90] sm:$0xff]  ;;  %v551_v34 = vrot.slane %v8285_v28, 1 }
  0xc2   : > { %6553 = vmatprep.subr.bf16.mxu0 %v6552_v29  ;;  %7145 = vmatprep.subr.bf16.mxu1 %v6552_v29  ;;  %v8280_v23 = vsel %vm522_vm0, %v543_v13, %v544_v14  ;;  %v548_v26 = vrot.slane %v8268_v18, 1  ;;  %v8296_v33 = vsel %vm522_vm0, %v544_v14, %v546_v21  ;;  %v553_v37 = vrot.slane %v8288_v31, 1  ;;  %v488_v42 = vld [vmem:[#allocation6 + $0x60] sm:$0xff]  ;;  %v489_v43 = vld [vmem:[#allocation6 + $0x68] sm:$0xff]  ;;  %v8308_v45 = vld [vmem:[%s8181_s11 + $0xa8] sm:$0xff] }
  0xc3   : > { %v8311_v46 = vld [vmem:[%s8181_s11 + $0xb0] sm:$0xff]  ;;  %v6588_v53 = vpack.c.bf16 %v489_v43, %v488_v42  ;;  %v558_v54 = vrot.slane %v8308_v45, 1  ;;  %v8325_v57 = vld [vmem:[%s8181_s11 + $0xb8] sm:$0xff]  ;;  %v490_v61 = vld [vmem:[#allocation6 + $0x70] sm:$0xff] }
  0xc4   : > { %v559_v56 = vrot.slane %v8311_v46, 1  ;;  %v561_v1 = vrot.slane %v8325_v57, 1  ;;  %v1012_v8 = vld [vmem:[#allocation6 + $0x100] sm:$0xff]  ;;  %v1014_v16 = vld [vmem:[#allocation6 + $0x110] sm:$0xff]  ;;  %v1015_v17 = vld [vmem:[#allocation6 + $0x118] sm:$0xff] }
  0xc5   : > { %6555 = vmatpush3.bf16.msra.mxu0 %v6552_v29  ;;  %7153 = vmatpush3.bf16.msra.mxu1 %v6552_v29  ;;  %v486_v29 = vld [vmem:[#allocation6 + $0x50] sm:$0xff]  ;;  %v6600_v21 = vpack.c.bf16 %v1015_v17, %v1014_v16  ;;  %v1024_v43 = vld [vmem:[#allocation6 + $0x160] sm:$0xff]  ;;  %v1027_v16 = vld [vmem:[#allocation6 + $0x178] sm:$0xff] }
  0xc6   : > { %6557 = vmatprep.subr.bf16.mxu0 %v6556_v32  ;;  %7146 = vmatprep.subr.bf16.mxu1 %v6556_v32  ;;  %v6584_v36 = vpack.c.bf16 %v487_v30, %v486_v29  ;;  %v8334_v3 = vsel %vm522_vm0, %v558_v54, %v559_v56  ;;  %v8339_v13 = vsel %vm522_vm0, %v559_v56, %v561_v1  ;;  %v1018_v29 = vld [vmem:[#allocation6 + $0x130] sm:$0xff]  ;;  %v1019_v30 = vld [vmem:[#allocation6 + $0x138] sm:$0xff]  ;;  %v8359_v56 = vld [vmem:[%s8181_s11 + $0xd0] sm:$0xff] }
  0xc7   : > { %9232 = vst [vmem:[#allocation20_spill] sm:$0xff] %v8339_v13  ;;  %v8355_v54 = vld [vmem:[%s8181_s11 + $0xc8] sm:$0xff]  ;;  %v566_v1 = vrot.slane %v8359_v56, 1  ;;  %v8372_v17 = vld [vmem:[%s8181_s11 + $0xe0] sm:$0xff] }
  0xc9   : > { %6559 = vmatpush3.bf16.msra.mxu0 %v6556_v32  ;;  %7154 = vmatpush3.bf16.msra.mxu1 %v6556_v32  ;;  %v8291_v32 = vld [vmem:[%s8181_s11 + $0x98] sm:$0xff] }
  0xca   : > { %6561 = vmatprep.subr.bf16.mxu0 %v6560_v35  ;;  %7147 = vmatprep.subr.bf16.mxu1 %v6560_v35  ;;  %v554_v40 = vrot.slane %v8291_v32, 1 }
  0xcd   : > { %6563 = vmatpush3.bf16.msra.mxu0 %v6560_v35  ;;  %7155 = vmatpush3.bf16.msra.mxu1 %v6560_v35  ;;  %v8300_v35 = vsel %vm522_vm0, %v548_v26, %v549_v27  ;;  %v1017_v26 = vld [vmem:[#allocation6 + $0x128] sm:$0xff] }
  0xce   : > { %6565 = vmatprep.subr.bf16.mxu0 %v6564_v41 }
  0xd0   : > { %5447 = vmatmul.mubr.f32.vlgmr.msra.gmra.mrb[0].mxu0 %v527_v49  ;;  %v8316_v49 = vsel %vm522_vm0, %v549_v27, %v551_v34  ;;  %v1020_v34 = vld [vmem:[#allocation6 + $0x140] sm:$0xff] }
  0xd1   : > { %6567 = vmatpush3.bf16.msra.mxu0 %v6564_v41  ;;  %5449 = vmatprep.mubr.f32.mxu0 %v8221_v51  ;;  %v8305_v41 = vld [vmem:[%s8181_s11 + $0xa0] sm:$0xff] }
  0xd2   : > { %6569 = vmatprep.subr.bf16.mxu0 %v6568_v52  ;;  %v556_v50 = vrot.slane %v8305_v41, 1 }
  0xd4   : > { %5450 = vmatmul.mubr.f32.gmra.mrb[2].mxu0 %v8236_v60  ;;  %v8330_v0 = vsel %vm522_vm0, %v554_v40, %v556_v50  ;;  %v1025_v50 = vld [vmem:[#allocation6 + $0x168] sm:$0xff] }
  0xd5   : > { %6571 = vmatpush3.bf16.msra.mxu0 %v6568_v52  ;;  %5452 = vmatprep.mubr.f32.mxu0 %v8240_v62  ;;  %v8320_v52 = vsel %vm522_vm0, %v553_v37, %v554_v40  ;;  %v1022_v37 = vld [vmem:[#allocation6 + $0x150] sm:$0xff]  ;;  %v1023_v40 = vld [vmem:[#allocation6 + $0x158] sm:$0xff] }
  0xd6   : > { %6573 = vmatprep.subr.bf16.mxu0 %v6572_v63  ;;  %v6616_v42 = vpack.c.bf16 %v1023_v40, %v1022_v37  ;;  %v946_v40 = vrot.slane %v8202_v38, 2 }
  0xd8   : > { %5453 = vmatmul.mubr.f32.gmra.mrb[4].mxu0 %v8256_v7 }
  0xd9   : > { %6575 = vmatpush3.bf16.msra.mxu0 %v6572_v63  ;;  %5455 = vmatprep.mubr.f32.mxu0 %v8260_v9  ;;  %v491_v63 = vld [vmem:[#allocation6 + $0x78] sm:$0xff] }
  0xda   : > { %6577 = vmatprep.subr.bf16.mxu0 %v6576_v12  ;;  %v6592_v4 = vpack.c.bf16 %v491_v63, %v490_v61  ;;  %v564_v63 = vrot.slane %v8355_v54, 1 }
  0xdc   : > { %5456 = vmatmul.mubr.f32.gmra.mrb[6].mxu0 %v8276_v20 }
  0xdd   : > { %6579 = vmatpush3.bf16.msra.mxu0 %v6576_v12  ;;  %5458 = vmatprep.mubr.f32.mxu0 %v8280_v23  ;;  %v1013_v12 = vld [vmem:[#allocation6 + $0x108] sm:$0xff] }
  0xde   : > { %6581 = vmatprep.subr.bf16.mxu0 %v6580_v24  ;;  %v6596_v14 = vpack.c.bf16 %v1013_v12, %v1012_v8  ;;  %v8366_v8 = vld [vmem:[%s8181_s11 + $0xd8] sm:$0xff] }
  0xe0   : > { %5459 = vmatmul.mubr.f32.gmra.mrb[8].mxu0 %v8296_v33 }
  0xe1   : > { %6583 = vmatpush3.bf16.msra.mxu0 %v6580_v24  ;;  %5461 = vmatprep.mubr.f32.mxu0 %v8300_v35  ;;  %v1016_v24 = vld [vmem:[#allocation6 + $0x120] sm:$0xff] }
  0xe2   : > { %6585 = vmatprep.subr.bf16.mxu0 %v6584_v36  ;;  %v6604_v27 = vpack.c.bf16 %v1017_v26, %v1016_v24  ;;  %v8380_v24 = vld [vmem:[%s8181_s11 + $0xe8] sm:$0xff]  ;;  %v568_v26 = vrot.slane %v8366_v8, 1 }
  0xe4   : > { %5462 = vmatmul.mubr.f32.gmra.mrb[10].mxu0 %v8316_v49 }
  0xe5   : > { %6587 = vmatpush3.bf16.msra.mxu0 %v6584_v36  ;;  %5464 = vmatprep.mubr.f32.mxu0 %v8320_v52  ;;  %v1021_v36 = vld [vmem:[#allocation6 + $0x148] sm:$0xff] }
  0xe6   : > { %6589 = vmatprep.subr.bf16.mxu0 %v6588_v53 }
  0xe8   : > { %5465 = vmatmul.mubr.f32.gmra.mrb[12].mxu0 %v8330_v0 }
  0xe9   : > { %6591 = vmatpush3.bf16.msra.mxu0 %v6588_v53  ;;  %5467 = vmatprep.mubr.f32.mxu0 %v8334_v3  ;;  %v8352_v53 = vld [vmem:[%s8181_s11 + $0xc0] sm:$0xff] }
  0xea   : > { %6593 = vmatprep.subr.bf16.mxu0 %v6592_v4  ;;  %v563_v61 = vrot.slane %v8352_v53, 1 }
  0xec   : > { %5468 = vmatmul.mubr.f32.gmra.mrb[14].mxu0 %v8339_v13  ;;  %v8369_v12 = vsel %vm522_vm0, %v563_v61, %v564_v63  ;;  %v949_v61 = vrot.slane %v8210_v44, 2 }
  0xed   : > { %6595 = vmatpush3.bf16.msra.mxu0 %v6592_v4  ;;  %5508 = vmatprep.mubr.f32.mxu0 %v8184_v10  ;;  %v6608_v10 = vpack.c.bf16 %v1019_v30, %v1018_v29  ;;  %v6620_v4 = vpack.c.bf16 %v1025_v50, %v1024_v43  ;;  %9233 = vst [vmem:[#allocation21_spill] sm:$0xff] %v8369_v12  ;;  %v571_v29 = vrot.slane %v8380_v24, 1  ;;  %v1216_v43 = vld [vmem:[#allocation6 + $0x190] sm:$0xff]  ;;  %v1217_v50 = vld [vmem:[#allocation6 + $0x198] sm:$0xff] }
  0xee   : > { %6597 = vmatprep.subr.bf16.mxu0 %v6596_v14  ;;  %5470 = vmatprep.mubr.f32.mxu1 %v8369_v12 }
  0xf0   : > { %5509 = vmatmul.mubr.f32.vlgmr.msra.gmra.mrb[0].mxu0 %v8187_v11  ;;  %v6612_v11 = vpack.c.bf16 %v1021_v36, %v1020_v34  ;;  %v1214_v34 = vld [vmem:[#allocation6 + $0x180] sm:$0xff]  ;;  %v1215_v36 = vld [vmem:[#allocation6 + $0x188] sm:$0xff] }
  0xf1   : > { %6599 = vmatpush3.bf16.msra.mxu0 %v6596_v14  ;;  %5511 = vmatprep.mubr.f32.mxu0 %v8202_v38  ;;  %v1026_v14 = vld [vmem:[#allocation6 + $0x170] sm:$0xff]  ;;  %v6628_v37 = vpack.c.bf16 %v1215_v36, %v1214_v34  ;;  %v957_v34 = vrot.slane %v8232_v59, 2 }
  0xf2   : > { %6601 = vmatprep.subr.bf16.mxu0 %v6600_v21  ;;  %v6624_v30 = vpack.c.bf16 %v1027_v16, %v1026_v14  ;;  %v952_v14 = vrot.slane %v8216_v48, 2  ;;  %v1218_v16 = vld [vmem:[#allocation6 + $0x1a0] sm:$0xff]  ;;  %v1220_v36 = vld [vmem:[#allocation6 + $0x1b0] sm:$0xff] }
  0xf4   : > { %5512 = vmatmul.mubr.f32.gmra.mrb[2].mxu0 %v8205_v39 }
  0xf5   : > { %6603 = vmatpush3.bf16.msra.mxu0 %v6600_v21  ;;  %5514 = vmatprep.mubr.f32.mxu0 %v8213_v47  ;;  %v8375_v21 = vsel %vm522_vm0, %v564_v63, %v566_v1  ;;  %v6632_v1 = vpack.c.bf16 %v1217_v50, %v1216_v43  ;;  %v962_v43 = vrot.slane %v8251_v6, 2 }
  0xf6   : > { %6605 = vmatprep.subr.bf16.mxu0 %v6604_v27  ;;  %9234 = vst [vmem:[#allocation22_spill] sm:$0xff] %v8375_v21  ;;  %5471 = vmatmul.mubr.f32.vlgmr.msra.gmra.mrb[0].mxu1 %v8375_v21 }
  0xf8   : > { %5515 = vmatmul.mubr.f32.gmra.mrb[4].mxu0 %v8216_v48 }
  0xf9   : > { %5517 = vmatprep.mubr.f32.mxu0 %v8229_v58  ;;  %6607 = vmatpush3.bf16.msra.mxu0 %v6604_v27  ;;  %v569_v27 = vrot.slane %v8372_v17, 1 }
  0xfa   : > { %6609 = vmatprep.subr.bf16.mxu0 %v6608_v10 }
  0xfc   : > { %5518 = vmatmul.mubr.f32.gmra.mrb[6].mxu0 %v8232_v59 }
  0xfd   : > { %5520 = vmatprep.mubr.f32.mxu0 %v8248_v5  ;;  %6611 = vmatpush3.bf16.msra.mxu0 %v6608_v10  ;;  %v8388_v10 = vsel %vm522_vm0, %v568_v26, %v569_v27  ;;  %v1219_v26 = vld [vmem:[#allocation6 + $0x1a8] sm:$0xff] }
  0xfe   : > { %6613 = vmatprep.subr.bf16.mxu0 %v6612_v11  ;;  %9235 = vst [vmem:[#allocation23_spill] sm:$0xff] %v8388_v10  ;;  %5473 = vmatprep.mubr.f32.mxu1 %v8388_v10 }
 0x100   : > { %5521 = vmatmul.mubr.f32.gmra.mrb[8].mxu0 %v8251_v6 }
 0x101   : > { %5523 = vmatprep.mubr.f32.mxu0 %v8268_v18  ;;  %6615 = vmatpush3.bf16.msra.mxu0 %v6612_v11  ;;  %v8391_v11 = vsel %vm522_vm0, %v569_v27, %v571_v29  ;;  %v6636_v29 = vpack.c.bf16 %v1219_v26, %v1218_v16  ;;  %v966_v16 = vrot.slane %v8268_v18, 2  ;;  %v967_v26 = vrot.slane %v8271_v19, 2 }
 0x102   : > { %6617 = vmatprep.subr.bf16.mxu0 %v6616_v42  ;;  %9236 = vst [vmem:[#allocation24_spill] sm:$0xff] %v8391_v11  ;;  %5474 = vmatmul.mubr.f32.gmra.mrb[2].mxu1 %v8391_v11 }
 0x104   : > { %5524 = vmatmul.mubr.f32.gmra.mrb[10].mxu0 %v8271_v19 }
 0x105   : > { %5526 = vmatprep.mubr.f32.mxu0 %v8288_v31  ;;  %6619 = vmatpush3.bf16.msra.mxu0 %v6616_v42  ;;  %v947_v42 = vrot.slane %v8205_v39, 2 }
 0x106   : > { %6621 = vmatprep.subr.bf16.mxu0 %v6620_v4 }
 0x107   : > { %v8407_v63 = vsel %vm940_vm1, %v946_v40, %v947_v42  ;;  %v8414_v27 = vsel %vm940_vm1, %v947_v42, %v949_v61  ;;  %v1221_v40 = vld [vmem:[#allocation6 + $0x1b8] sm:$0xff]  ;;  %v961_v42 = vrot.slane %v8248_v5, 2  ;;  %v1222_v61 = vld [vmem:[#allocation6 + $0x1c0] sm:$0xff] }
 0x108   : > { %5527 = vmatmul.mubr.f32.gmra.mrb[12].mxu0 %v8291_v32  ;;  %v6640_v50 = vpack.c.bf16 %v1221_v40, %v1220_v36  ;;  %v1225_v36 = vld [vmem:[#allocation6 + $0x1d8] sm:$0xff]  ;;  %v971_v40 = vrot.slane %v8288_v31, 2 }
 0x109   : > { %5529 = vmatprep.mubr.f32.mxu0 %v8308_v45  ;;  %6623 = vmatpush3.bf16.msra.mxu0 %v6620_v4  ;;  %v951_v4 = vrot.slane %v8213_v47, 2 }
 0x10a   : > { %6625 = vmatprep.subr.bf16.mxu0 %v6624_v30 }
 0x10b   : > { %v8418_v44 = vsel %vm940_vm1, %v951_v4, %v952_v14  ;;  %v1223_v4 = vld [vmem:[#allocation6 + $0x1c8] sm:$0xff] }
 0x10c   : > { %5530 = vmatmul.mubr.f32.gmra.mrb[14].mxu0 %v8311_v46 }
 0x10d   : > { %5532 = vmatprep.mubr.f32.mxu0 %v8352_v53  ;;  %6627 = vmatpush3.bf16.msra.mxu0 %v6624_v30  ;;  %v956_v30 = vrot.slane %v8229_v58, 2 }
 0x10e   : > { %6629 = vmatprep.subr.bf16.mxu0 %v6628_v37 }
 0x110   : > { %5533 = vmatmul.mubr.f32.gmra.mrb[16].mxu0 %v8355_v54 }
 0x111   : > { %5535 = vmatprep.mubr.f32.mxu0 %v8366_v8 }
 0x114   : > { %5536 = vmatmul.mubr.f32.gmra.mrb[18].mxu0 %v8372_v17 }
 0x115   : > { %5570 = vmatprep.mubr.f32.mxu0 %v8196_v22  ;;  %v954_v22 = vrot.slane %v8226_v55, 2  ;;  %v959_v55 = vrot.slane %v8245_v2, 2  ;;  %v964_v2 = vrot.slane %v8265_v15, 2  ;;  %v969_v15 = vrot.slane %v8285_v28, 2 }
 0x116   : > { %v974_v28 = vrot.slane %v8305_v41, 2  ;;  %v979_v41 = vrot.slane %v8325_v57, 2  ;;  %v984_v57 = vrot.slane %v8359_v56, 2 }
 0x118   : > { %5571 = vmatmul.mubr.f32.vlgmr.msra.gmra.mrb[0].mxu0 %v8199_v25  ;;  %v8425_v25 = vsel %vm940_vm1, %v952_v14, %v954_v22  ;;  %v8440_v14 = vsel %vm940_vm1, %v961_v42, %v962_v43  ;;  %v6644_v22 = vpack.c.bf16 %v1223_v4, %v1222_v61  ;;  %v1226_v61 = vld [vmem:[#allocation6 + $0x1e0] sm:$0xff]  ;;  %v1227_v4 = vld [vmem:[#allocation6 + $0x1e8] sm:$0xff] }
 0x119   : > { %6631 = vmatpush3.bf16.msra.mxu0 %v6628_v37  ;;  %5573 = vmatprep.mubr.f32.mxu0 %v8407_v63  ;;  %v8429_v37 = vsel %vm940_vm1, %v956_v30, %v957_v34  ;;  %9237 = vst [vmem:[#allocation25_spill] sm:$0xff] %v8440_v14  ;;  %v1224_v30 = vld [vmem:[#allocation6 + $0x1d0] sm:$0xff] }
 0x11a   : > { %6633 = vmatprep.subr.bf16.mxu0 %v6632_v1  ;;  %v6648_v42 = vpack.c.bf16 %v1225_v36, %v1224_v30  ;;  %v6652_v30 = vpack.c.bf16 %v1227_v4, %v1226_v61  ;;  %v1228_v36 = vld [vmem:[#allocation6 + $0x1f0] sm:$0xff]  ;;  %v1426_v4 = vld [vmem:[#allocation6 + $0x200] sm:$0xff] }
 0x11c   : > { %5574 = vmatmul.mubr.f32.gmra.mrb[2].mxu0 %v8414_v27 }
 0x11d   : > { %6635 = vmatpush3.bf16.msra.mxu0 %v6632_v1  ;;  %5576 = vmatprep.mubr.f32.mxu0 %v8418_v44  ;;  %v8436_v1 = vsel %vm940_vm1, %v957_v34, %v959_v55  ;;  %v8451_v34 = vsel %vm940_vm1, %v966_v16, %v967_v26  ;;  %v972_v55 = vrot.slane %v8291_v32, 2  ;;  %v977_v16 = vrot.slane %v8311_v46, 2 }
 0x11e   : > { %6637 = vmatprep.subr.bf16.mxu0 %v6636_v29  ;;  %9238 = vst [vmem:[#allocation26_spill] sm:$0xff] %v8451_v34 }
 0x120   : > { %5577 = vmatmul.mubr.f32.gmra.mrb[4].mxu0 %v8425_v25 }
 0x121   : > { %5579 = vmatprep.mubr.f32.mxu0 %v8429_v37  ;;  %6639 = vmatpush3.bf16.msra.mxu0 %v6636_v29  ;;  %v8447_v29 = vsel %vm940_vm1, %v962_v43, %v964_v2  ;;  %v8458_v43 = vsel %vm940_vm1, %v967_v26, %v969_v15  ;;  %v976_v2 = vrot.slane %v8308_v45, 2  ;;  %v8469_v26 = vsel %vm940_vm1, %v972_v55, %v974_v28 }
 0x122   : > { %6641 = vmatprep.subr.bf16.mxu0 %v6640_v50  ;;  %v981_v15 = vrot.slane %v8352_v53, 2  ;;  %v986_v28 = vrot.slane %v8366_v8, 2 }
 0x124   : > { %5580 = vmatmul.mubr.f32.gmra.mrb[6].mxu0 %v8436_v1 }
 0x125   : > { %5582 = vmatprep.mubr.f32.mxu0 %v8440_v14  ;;  %6643 = vmatpush3.bf16.msra.mxu0 %v6640_v50  ;;  %v8462_v50 = vsel %vm940_vm1, %v971_v40, %v972_v55  ;;  %v1229_v14 = vld [vmem:[#allocation6 + $0x1f8] sm:$0xff]  ;;  %v982_v40 = vrot.slane %v8355_v54, 2  ;;  %v8480_v55 = vsel %vm940_vm1, %v977_v16, %v979_v41 }
 0x126   : > { %6645 = vmatprep.subr.bf16.mxu0 %v6644_v22  ;;  %v6656_v61 = vpack.c.bf16 %v1229_v14, %v1228_v36  ;;  %v1429_v41 = vld [vmem:[#allocation6 + $0x218] sm:$0xff] }
 0x127   : > { %v8491_v36 = vsel %vm940_vm1, %v982_v40, %v984_v57  ;;  %v1433_v57 = vld [vmem:[#allocation6 + $0x238] sm:$0xff] }
 0x128   : > { %5583 = vmatmul.mubr.f32.gmra.mrb[8].mxu0 %v8447_v29 }
 0x129   : > { %5585 = vmatprep.mubr.f32.mxu0 %v8451_v34  ;;  %6647 = vmatpush3.bf16.msra.mxu0 %v6644_v22  ;;  %v8473_v22 = vsel %vm940_vm1, %v976_v2, %v977_v16  ;;  %v1427_v34 = vld [vmem:[#allocation6 + $0x208] sm:$0xff]  ;;  %v987_v2 = vrot.slane %v8372_v17, 2  ;;  %v989_v16 = vrot.slane %v8380_v24, 2  ;;  %v1430_v24 = vld [vmem:[#allocation6 + $0x220] sm:$0xff] }
 0x12a   : > { %6649 = vmatprep.subr.bf16.mxu0 %v6648_v42  ;;  %v6660_v14 = vpack.c.bf16 %v1427_v34, %v1426_v4  ;;  %v1432_v4 = vld [vmem:[#allocation6 + $0x230] sm:$0xff] }
 0x12b   : > { %v8495_v56 = vsel %vm940_vm1, %v986_v28, %v987_v2  ;;  %v8500_v34 = vsel %vm940_vm1, %v987_v2, %v989_v16  ;;  %v6672_v28 = vpack.c.bf16 %v1433_v57, %v1432_v4  ;;  %v1435_v2 = vld [vmem:[#allocation6 + $0x248] sm:$0xff]  ;;  %v1437_v16 = vld [vmem:[#allocation6 + $0x258] sm:$0xff]  ;;  %v1635_v57 = vld [vmem:[#allocation6 + $0x280] sm:$0xff] }
 0x12c   : > { %5586 = vmatmul.mubr.f32.gmra.mrb[10].mxu0 %v8458_v43 }
 0x12d   : > { %5588 = vmatprep.mubr.f32.mxu0 %v8462_v50  ;;  %6651 = vmatpush3.bf16.msra.mxu0 %v6648_v42  ;;  %v8484_v42 = vsel %vm940_vm1, %v981_v15, %v982_v40  ;;  %v1431_v40 = vld [vmem:[#allocation6 + $0x228] sm:$0xff] }
 0x12e   : > { %6653 = vmatprep.subr.bf16.mxu0 %v6652_v30 }
 0x130   : > { %5589 = vmatmul.mubr.f32.gmra.mrb[12].mxu0 %v8469_v26 }
 0x131   : > { %5591 = vmatprep.mubr.f32.mxu0 %v8473_v22  ;;  %6655 = vmatpush3.bf16.msra.mxu0 %v6652_v30  ;;  %v1428_v30 = vld [vmem:[#allocation6 + $0x210] sm:$0xff] }
 0x132   : > { %6657 = vmatprep.subr.bf16.mxu0 %v6656_v61  ;;  %v6664_v15 = vpack.c.bf16 %v1429_v41, %v1428_v30  ;;  %v1438_v41 = vld [vmem:[#allocation6 + $0x260] sm:$0xff] }
 0x134   : > { %5592 = vmatmul.mubr.f32.gmra.mrb[14].mxu0 %v8480_v55 }
 0x135   : > { %5594 = vmatprep.mubr.f32.mxu0 %v8484_v42  ;;  %6659 = vmatpush3.bf16.msra.mxu0 %v6656_v61  ;;  %v6668_v61 = vpack.c.bf16 %v1431_v40, %v1430_v24  ;;  %v1440_v40 = vld [vmem:[#allocation6 + $0x270] sm:$0xff] }
 0x136   : > { %6661 = vmatprep.subr.bf16.mxu0 %v6660_v14 }
 0x138   : > { %5595 = vmatmul.mubr.f32.gmra.mrb[16].mxu0 %v8491_v36 }
 0x139   : > { %5597 = vmatprep.mubr.f32.mxu0 %v8495_v56 }
 0x13c   : > { %5598 = vmatmul.mubr.f32.gmra.mrb[18].mxu0 %v8500_v34 }
 0x13d   : > { %5632 = vmatprep.mubr.f32.mxu0 %v8202_v38  ;;  %v1434_v38 = vld [vmem:[#allocation6 + $0x240] sm:$0xff] }
 0x140   : > { %5633 = vmatmul.mubr.f32.vlgmr.msra.gmra.mrb[0].mxu0 %v8205_v39  ;;  %v6676_v39 = vpack.c.bf16 %v1435_v2, %v1434_v38  ;;  %v8521_v2 = vld [vmem:[%s8181_s11 + $0xf0] sm:$0xff] }
 0x141   : > { %6663 = vmatpush3.bf16.msra.mxu0 %v6660_v14  ;;  %5635 = vmatprep.mubr.f32.mxu0 %v8213_v47  ;;  %v1436_v14 = vld [vmem:[#allocation6 + $0x250] sm:$0xff] }
 0x142   : > { %6665 = vmatprep.subr.bf16.mxu0 %v6664_v15  ;;  %v6680_v30 = vpack.c.bf16 %v1437_v16, %v1436_v14  ;;  %v1637_v14 = vld [vmem:[#allocation6 + $0x290] sm:$0xff]  ;;  %v1638_v16 = vld [vmem:[#allocation6 + $0x298] sm:$0xff] }
 0x144   : > { %5636 = vmatmul.mubr.f32.gmra.mrb[2].mxu0 %v8216_v48 }
 0x145   : > { %6667 = vmatpush3.bf16.msra.mxu0 %v6664_v15  ;;  %5638 = vmatprep.mubr.f32.mxu0 %v8229_v58  ;;  %v1439_v15 = vld [vmem:[#allocation6 + $0x268] sm:$0xff] }
 0x146   : > { %6669 = vmatprep.subr.bf16.mxu0 %v6668_v61  ;;  %v6684_v24 = vpack.c.bf16 %v1439_v15, %v1438_v41  ;;  %v1639_v41 = vld [vmem:[#allocation6 + $0x2a0] sm:$0xff]  ;;  %v1640_v15 = vld [vmem:[#allocation6 + $0x2a8] sm:$0xff] }
 0x148   : > { %5639 = vmatmul.mubr.f32.gmra.mrb[4].mxu0 %v8232_v59 }
 0x149   : > { %5641 = vmatprep.mubr.f32.mxu0 %v8248_v5  ;;  %6671 = vmatpush3.bf16.msra.mxu0 %v6668_v61  ;;  %v1441_v61 = vld [vmem:[#allocation6 + $0x278] sm:$0xff] }
 0x14a   : > { %6673 = vmatprep.subr.bf16.mxu0 %v6672_v28  ;;  %v6688_v4 = vpack.c.bf16 %v1441_v61, %v1440_v40  ;;  %v1641_v40 = vld [vmem:[#allocation6 + $0x2b0] sm:$0xff]  ;;  %v1642_v61 = vld [vmem:[#allocation6 + $0x2b8] sm:$0xff] }
 0x14c   : > { %5642 = vmatmul.mubr.f32.gmra.mrb[6].mxu0 %v8251_v6 }
 0x14d   : > { %5644 = vmatprep.mubr.f32.mxu0 %v8268_v18  ;;  %6675 = vmatpush3.bf16.msra.mxu0 %v6672_v28  ;;  %v1636_v28 = vld [vmem:[#allocation6 + $0x288] sm:$0xff] }
 0x14e   : > { %6677 = vmatprep.subr.bf16.mxu0 %v6676_v39  ;;  %v6692_v38 = vpack.c.bf16 %v1636_v28, %v1635_v57  ;;  %v1644_v57 = vld [vmem:[#allocation6 + $0x2c8] sm:$0xff]  ;;  %v1645_v28 = vld [vmem:[#allocation6 + $0x2d0] sm:$0xff] }
 0x150   : > { %5645 = vmatmul.mubr.f32.gmra.mrb[8].mxu0 %v8271_v19 }
 0x151   : > { %5647 = vmatprep.mubr.f32.mxu0 %v8288_v31  ;;  %6679 = vmatpush3.bf16.msra.mxu0 %v6676_v39  ;;  %v8526_v39 = vld [vmem:[%s8181_s11 + $0xf8] sm:$0xff] }
 0x152   : > { %6681 = vmatprep.subr.bf16.mxu0 %v6680_v30 }
 0x154   : > { %5648 = vmatmul.mubr.f32.gmra.mrb[10].mxu0 %v8291_v32 }
 0x155   : > { %5650 = vmatprep.mubr.f32.mxu0 %v8308_v45  ;;  %6683 = vmatpush3.bf16.msra.mxu0 %v6680_v30  ;;  %v6696_v30 = vpack.c.bf16 %v1638_v16, %v1637_v14  ;;  %v1647_v16 = vld [vmem:[#allocation6 + $0x2e0] sm:$0xff] }
 0x156   : > { %6685 = vmatprep.subr.bf16.mxu0 %v6684_v24 }
 0x158   : > { %5651 = vmatmul.mubr.f32.gmra.mrb[12].mxu0 %v8311_v46 }
 0x159   : > { %5653 = vmatprep.mubr.f32.mxu0 %v8352_v53  ;;  %6687 = vmatpush3.bf16.msra.mxu0 %v6684_v24  ;;  %v6700_v24 = vpack.c.bf16 %v1640_v15, %v1639_v41  ;;  %v1649_v15 = vld [vmem:[#allocation6 + $0x2f0] sm:$0xff] }
 0x15a   : > { %6689 = vmatprep.subr.bf16.mxu0 %v6688_v4 }
 0x15c   : > { %5654 = vmatmul.mubr.f32.gmra.mrb[14].mxu0 %v8355_v54 }
 0x15d   : > { %5656 = vmatprep.mubr.f32.mxu0 %v8366_v8  ;;  %6691 = vmatpush3.bf16.msra.mxu0 %v6688_v4  ;;  %v6704_v4 = vpack.c.bf16 %v1642_v61, %v1641_v40  ;;  %v1837_v61 = vld [vmem:[#allocation6 + $0x300] sm:$0xff] }
 0x15e   : > { %6693 = vmatprep.subr.bf16.mxu0 %v6692_v38 }
 0x160   : > { %5657 = vmatmul.mubr.f32.gmra.mrb[16].mxu0 %v8372_v17 }
 0x161   : > { %5659 = vmatprep.mubr.f32.mxu0 %v8521_v2 }
 0x164   : > { %5660 = vmatmul.mubr.f32.gmra.mrb[18].mxu0 %v8526_v39 }
 0x165   : > { %5694 = vmatprep.mubr.f32.mxu0 %v8221_v51  ;;  %v1643_v51 = vld [vmem:[#allocation6 + $0x2c0] sm:$0xff] }
 0x168   : > { %5695 = vmatmul.mubr.f32.vlgmr.msra.gmra.mrb[0].mxu0 %v8236_v60  ;;  %v6708_v60 = vpack.c.bf16 %v1644_v57, %v1643_v51  ;;  %v1418_v51 = vrot.slane %v8521_v2, 1  ;;  %v1419_v57 = vrot.slane %v8526_v39, 1 }
 0x169   : > { %6695 = vmatpush3.bf16.msra.mxu0 %v6692_v38  ;;  %5697 = vmatprep.mubr.f32.mxu0 %v8240_v62  ;;  %v1646_v38 = vld [vmem:[#allocation6 + $0x2d8] sm:$0xff] }
 0x16a   : > { %6697 = vmatprep.subr.bf16.mxu0 %v6696_v30  ;;  %v6712_v14 = vpack.c.bf16 %v1646_v38, %v1645_v28 }
 0x16c   : > { %5698 = vmatmul.mubr.f32.gmra.mrb[2].mxu0 %v8256_v7 }
 0x16d   : > { %6699 = vmatpush3.bf16.msra.mxu0 %v6696_v30  ;;  %5700 = vmatprep.mubr.f32.mxu0 %v8260_v9  ;;  %v1648_v30 = vld [vmem:[#allocation6 + $0x2e8] sm:$0xff] }
 0x16e   : > { %6701 = vmatprep.subr.bf16.mxu0 %v6700_v24  ;;  %v6716_v41 = vpack.c.bf16 %v1648_v30, %v1647_v16  ;;  %v1839_v30 = vld [vmem:[#allocation6 + $0x310] sm:$0xff] }
 0x170   : > { %5701 = vmatmul.mubr.f32.gmra.mrb[4].mxu0 %v8276_v20 }
 0x171   : > { %5703 = vmatprep.mubr.f32.mxu0 %v8280_v23  ;;  %6703 = vmatpush3.bf16.msra.mxu0 %v6700_v24  ;;  %v1650_v24 = vld [vmem:[#allocation6 + $0x2f8] sm:$0xff] }
 0x172   : > { %6705 = vmatprep.subr.bf16.mxu0 %v6704_v4  ;;  %v6720_v40 = vpack.c.bf16 %v1650_v24, %v1649_v15  ;;  %v1841_v24 = vld [vmem:[#allocation6 + $0x320] sm:$0xff] }
 0x174   : > { %5704 = vmatmul.mubr.f32.gmra.mrb[6].mxu0 %v8296_v33 }
 0x175   : > { %5706 = vmatprep.mubr.f32.mxu0 %v8300_v35  ;;  %6707 = vmatpush3.bf16.msra.mxu0 %v6704_v4  ;;  %v1838_v4 = vld [vmem:[#allocation6 + $0x308] sm:$0xff] }
 0x176   : > { %6709 = vmatprep.subr.bf16.mxu0 %v6708_v60  ;;  %v6724_v28 = vpack.c.bf16 %v1838_v4, %v1837_v61  ;;  %v1843_v4 = vld [vmem:[#allocation6 + $0x330] sm:$0xff] }
 0x178   : > { %5707 = vmatmul.mubr.f32.gmra.mrb[8].mxu0 %v8316_v49 }
 0x179   : > { %5709 = vmatprep.mubr.f32.mxu0 %v8320_v52  ;;  %6711 = vmatpush3.bf16.msra.mxu0 %v6708_v60  ;;  %v8547_v60 = vld [vmem:[%s8181_s11 + $0x100] sm:$0xff] }
 0x17a   : > { %6713 = vmatprep.subr.bf16.mxu0 %v6712_v14  ;;  %v1421_v38 = vrot.slane %v8547_v60, 1 }
 0x17c   : > { %5710 = vmatmul.mubr.f32.gmra.mrb[10].mxu0 %v8330_v0  ;;  %v8558_v16 = vsel %vm522_vm0, %v1419_v57, %v1421_v38  ;;  %v1846_v38 = vld [vmem:[#allocation6 + $0x348] sm:$0xff] }
 0x17d   : > { %5712 = vmatprep.mubr.f32.mxu0 %v8334_v3  ;;  %6715 = vmatpush3.bf16.msra.mxu0 %v6712_v14  ;;  %v8553_v14 = vsel %vm522_vm0, %v1418_v51, %v1419_v57  ;;  %v1844_v51 = vld [vmem:[#allocation6 + $0x338] sm:$0xff] }
 0x17e   : > { %6717 = vmatprep.subr.bf16.mxu0 %v6716_v41  ;;  %v6736_v57 = vpack.c.bf16 %v1844_v51, %v1843_v4  ;;  %v1850_v4 = vld [vmem:[#allocation6 + $0x368] sm:$0xff]  ;;  %v1851_v51 = vld [vmem:[#allocation6 + $0x370] sm:$0xff] }
 0x180   : > { %5713 = vmatmul.mubr.f32.gmra.mrb[12].mxu0 %v8339_v13 }
 0x181   : > { %5715 = vmatprep.mubr.f32.mxu0 %v8369_v12  ;;  %6719 = vmatpush3.bf16.msra.mxu0 %v6716_v41  ;;  %v1840_v41 = vld [vmem:[#allocation6 + $0x318] sm:$0xff] }
 0x182   : > { %6721 = vmatprep.subr.bf16.mxu0 %v6720_v40  ;;  %v6728_v15 = vpack.c.bf16 %v1840_v41, %v1839_v30  ;;  %v9239_v30 = vld [vmem:[#allocation25_spill] sm:$0xff]  ;;  %v1848_v41 = vld [vmem:[#allocation6 + $0x358] sm:$0xff] }
 0x184   : > { %5716 = vmatmul.mubr.f32.gmra.mrb[14].mxu0 %v8375_v21 }
 0x185   : > { %5718 = vmatprep.mubr.f32.mxu0 %v8388_v10  ;;  %6723 = vmatpush3.bf16.msra.mxu0 %v6720_v40  ;;  %v1842_v40 = vld [vmem:[#allocation6 + $0x328] sm:$0xff] }
 0x186   : > { %6725 = vmatprep.subr.bf16.mxu0 %v6724_v28  ;;  %v6732_v61 = vpack.c.bf16 %v1842_v40, %v1841_v24  ;;  %v9240_v24 = vld [vmem:[#allocation26_spill] sm:$0xff]  ;;  %v1849_v40 = vld [vmem:[#allocation6 + $0x360] sm:$0xff] }
 0x188   : > { %5719 = vmatmul.mubr.f32.gmra.mrb[16].mxu0 %v8391_v11 }
 0x189   : > { %5721 = vmatprep.mubr.f32.mxu0 %v8553_v14 }
 0x18c   : > { %5722 = vmatmul.mubr.f32.gmra.mrb[18].mxu0 %v8558_v16 }
 0x18d   : > { %5756 = vmatprep.mubr.f32.mxu0 %v8407_v63  ;;  %v1845_v63 = vld [vmem:[#allocation6 + $0x340] sm:$0xff] }
 0x190   : > { %5757 = vmatmul.mubr.f32.vlgmr.msra.gmra.mrb[0].mxu0 %v8414_v27  ;;  %v6740_v27 = vpack.c.bf16 %v1846_v38, %v1845_v63  ;;  %v1852_v63 = vld [vmem:[#allocation6 + $0x378] sm:$0xff]  ;;  %v2049_v38 = vld [vmem:[#allocation6 + $0x380] sm:$0xff] }
 0x191   : > { %6727 = vmatpush3.bf16.msra.mxu0 %v6724_v28  ;;  %5759 = vmatprep.mubr.f32.mxu0 %v8418_v44  ;;  %v1847_v28 = vld [vmem:[#allocation6 + $0x350] sm:$0xff] }
 0x192   : > { %6729 = vmatprep.subr.bf16.mxu0 %v6728_v15 }
 0x194   : > { %5760 = vmatmul.mubr.f32.gmra.mrb[2].mxu0 %v8425_v25 }
 0x195   : > { %6731 = vmatpush3.bf16.msra.mxu0 %v6728_v15  ;;  %5762 = vmatprep.mubr.f32.mxu0 %v8429_v37  ;;  %v6744_v15 = vpack.c.bf16 %v1848_v41, %v1847_v28  ;;  %v2050_v28 = vld [vmem:[#allocation6 + $0x388] sm:$0xff]  ;;  %v1628_v41 = vrot.slane %v8526_v39, 2 }
 0x196   : > { %6733 = vmatprep.subr.bf16.mxu0 %v6732_v61 }
 0x198   : > { %5763 = vmatmul.mubr.f32.gmra.mrb[4].mxu0 %v8436_v1 }
 0x199   : > { %5765 = vmatprep.mubr.f32.mxu0 %v9239_v30  ;;  %6735 = vmatpush3.bf16.msra.mxu0 %v6732_v61  ;;  %v6748_v61 = vpack.c.bf16 %v1850_v4, %v1849_v40  ;;  %v6756_v40 = vpack.c.bf16 %v2050_v28, %v2049_v38 }
 0x19a   : > { %6737 = vmatprep.subr.bf16.mxu0 %v6736_v57 }
 0x19c   : > { %5766 = vmatmul.mubr.f32.gmra.mrb[6].mxu0 %v8447_v29 }
 0x19d   : > { %5768 = vmatprep.mubr.f32.mxu0 %v9240_v24  ;;  %6739 = vmatpush3.bf16.msra.mxu0 %v6736_v57  ;;  %v6752_v57 = vpack.c.bf16 %v1852_v63, %v1851_v51  ;;  %v2051_v51 = vld [vmem:[#allocation6 + $0x390] sm:$0xff]  ;;  %v2052_v63 = vld [vmem:[#allocation6 + $0x398] sm:$0xff] }
 0x19e   : > { %6741 = vmatprep.subr.bf16.mxu0 %v6740_v27  ;;  %v6760_v38 = vpack.c.bf16 %v2052_v63, %v2051_v51  ;;  %v2064_v51 = vld [vmem:[#allocation6 + $0x3f8] sm:$0xff]  ;;  %v2259_v63 = vld [vmem:[#allocation6 + $0x408] sm:$0xff] }
 0x1a0   : > { %5769 = vmatmul.mubr.f32.gmra.mrb[8].mxu0 %v8458_v43 }
 0x1a1   : > { %5771 = vmatprep.mubr.f32.mxu0 %v8462_v50  ;;  %6743 = vmatpush3.bf16.msra.mxu0 %v6740_v27  ;;  %v1627_v27 = vrot.slane %v8521_v2, 2 }
 0x1a2   : > { %6745 = vmatprep.subr.bf16.mxu0 %v6744_v15 }
 0x1a3   : > { %v8582_v4 = vsel %vm940_vm1, %v1627_v27, %v1628_v41  ;;  %v2055_v27 = vld [vmem:[#allocation6 + $0x3b0] sm:$0xff] }
 0x1a4   : > { %5772 = vmatmul.mubr.f32.gmra.mrb[10].mxu0 %v8469_v26  ;;  %9241 = vst [vmem:[#allocation25_spill] sm:$0xff] %v8582_v4 }
 0x1a5   : > { %5774 = vmatprep.mubr.f32.mxu0 %v8473_v22  ;;  %6747 = vmatpush3.bf16.msra.mxu0 %v6744_v15  ;;  %v1630_v15 = vrot.slane %v8547_v60, 2  ;;  %v2053_v60 = vld [vmem:[#allocation6 + $0x3a0] sm:$0xff] }
 0x1a6   : > { %6749 = vmatprep.subr.bf16.mxu0 %v6748_v61 }
 0x1a8   : > { %5775 = vmatmul.mubr.f32.gmra.mrb[12].mxu0 %v8480_v55 }
 0x1a9   : > { %5777 = vmatprep.mubr.f32.mxu0 %v8484_v42  ;;  %6751 = vmatpush3.bf16.msra.mxu0 %v6748_v61  ;;  %v8587_v61 = vsel %vm940_vm1, %v1628_v41, %v1630_v15  ;;  %v2058_v15 = vld [vmem:[#allocation6 + $0x3c8] sm:$0xff] }
 0x1aa   : > { %6753 = vmatprep.subr.bf16.mxu0 %v6752_v57 }
 0x1ac   : > { %5778 = vmatmul.mubr.f32.gmra.mrb[14].mxu0 %v8491_v36 }
 0x1ad   : > { %5780 = vmatprep.mubr.f32.mxu0 %v8495_v56  ;;  %6755 = vmatpush3.bf16.msra.mxu0 %v6752_v57  ;;  %v2054_v57 = vld [vmem:[#allocation6 + $0x3a8] sm:$0xff] }
 0x1ae   : > { %6757 = vmatprep.subr.bf16.mxu0 %v6756_v40  ;;  %v6764_v28 = vpack.c.bf16 %v2054_v57, %v2053_v60  ;;  %v2265_v60 = vld [vmem:[#allocation6 + $0x438] sm:$0xff] }
 0x1b0   : > { %5781 = vmatmul.mubr.f32.gmra.mrb[16].mxu0 %v8500_v34 }
 0x1b1   : > { %5783 = vmatprep.mubr.f32.mxu0 %v8582_v4  ;;  %v2056_v4 = vld [vmem:[#allocation6 + $0x3b8] sm:$0xff] }
 0x1b2   : > { %v6768_v41 = vpack.c.bf16 %v2056_v4, %v2055_v27  ;;  %v2062_v4 = vld [vmem:[#allocation6 + $0x3e8] sm:$0xff] }
 0x1b3   : > { %v2267_v27 = vld [vmem:[#allocation6 + $0x448] sm:$0xff] }
 0x1b4   : > { %5784 = vmatmul.mubr.f32.gmra.mrb[18].mxu0 %v8587_v61 }
 0x1b5   : > { %5818 = vmatprep.mubr.f32.mxu0 %v8213_v47  ;;  %v2057_v47 = vld [vmem:[#allocation6 + $0x3c0] sm:$0xff] }
 0x1b8   : > { %5819 = vmatmul.mubr.f32.vlgmr.msra.gmra.mrb[0].mxu0 %v8216_v48  ;;  %v6772_v48 = vpack.c.bf16 %v2058_v15, %v2057_v47  ;;  %v2268_v47 = vld [vmem:[#allocation6 + $0x450] sm:$0xff]  ;;  %v2269_v15 = vld [vmem:[#allocation6 + $0x458] sm:$0xff] }
 0x1b9   : > { %6759 = vmatpush3.bf16.msra.mxu0 %v6756_v40  ;;  %5821 = vmatprep.mubr.f32.mxu0 %v8229_v58  ;;  %v2059_v58 = vld [vmem:[#allocation6 + $0x3d0] sm:$0xff]  ;;  %v2060_v40 = vld [vmem:[#allocation6 + $0x3d8] sm:$0xff] }
 0x1ba   : > { %6761 = vmatprep.subr.bf16.mxu0 %v6760_v38 }
 0x1bc   : > { %5822 = vmatmul.mubr.f32.gmra.mrb[2].mxu0 %v8232_v59  ;;  %v6776_v59 = vpack.c.bf16 %v2060_v40, %v2059_v58  ;;  %v2270_v58 = vld [vmem:[#allocation6 + $0x460] sm:$0xff]  ;;  %v2271_v40 = vld [vmem:[#allocation6 + $0x468] sm:$0xff] }
 0x1bd   : > { %6763 = vmatpush3.bf16.msra.mxu0 %v6760_v38  ;;  %5824 = vmatprep.mubr.f32.mxu0 %v8248_v5  ;;  %v2061_v5 = vld [vmem:[#allocation6 + $0x3e0] sm:$0xff]  ;;  %v2263_v38 = vld [vmem:[#allocation6 + $0x428] sm:$0xff] }
 0x1be   : > { %6765 = vmatprep.subr.bf16.mxu0 %v6764_v28 }
 0x1c0   : > { %5825 = vmatmul.mubr.f32.gmra.mrb[4].mxu0 %v8251_v6  ;;  %v6780_v6 = vpack.c.bf16 %v2062_v4, %v2061_v5  ;;  %v2272_v5 = vld [vmem:[#allocation6 + $0x470] sm:$0xff]  ;;  %v2273_v4 = vld [vmem:[#allocation6 + $0x478] sm:$0xff] }
 0x1c1   : > { %5827 = vmatprep.mubr.f32.mxu0 %v8268_v18  ;;  %6767 = vmatpush3.bf16.msra.mxu0 %v6764_v28  ;;  %v2063_v18 = vld [vmem:[#allocation6 + $0x3f0] sm:$0xff]  ;;  %v2266_v28 = vld [vmem:[#allocation6 + $0x440] sm:$0xff] }
 0x1c2   : > { %6769 = vmatprep.subr.bf16.mxu0 %v6768_v41 }
 0x1c4   : > { %5828 = vmatmul.mubr.f32.gmra.mrb[6].mxu0 %v8271_v19  ;;  %v6784_v19 = vpack.c.bf16 %v2064_v51, %v2063_v18 }
 0x1c5   : > { %5830 = vmatprep.mubr.f32.mxu0 %v8288_v31  ;;  %6771 = vmatpush3.bf16.msra.mxu0 %v6768_v41  ;;  %v2258_v31 = vld [vmem:[#allocation6 + $0x400] sm:$0xff]  ;;  %v6804_v41 = vpack.c.bf16 %v2267_v27, %v2266_v28 }
 0x1c6   : > { %6773 = vmatprep.subr.bf16.mxu0 %v6772_v48 }
 0x1c8   : > { %5831 = vmatmul.mubr.f32.gmra.mrb[8].mxu0 %v8291_v32  ;;  %v6788_v32 = vpack.c.bf16 %v2259_v63, %v2258_v31 }
 0x1c9   : > { %5833 = vmatprep.mubr.f32.mxu0 %v8308_v45  ;;  %6775 = vmatpush3.bf16.msra.mxu0 %v6772_v48  ;;  %v8608_v45 = vld [vmem:[%s8181_s11 + $0x108] sm:$0xff]  ;;  %v6808_v48 = vpack.c.bf16 %v2269_v15, %v2268_v47 }
 0x1ca   : > { %6777 = vmatprep.subr.bf16.mxu0 %v6776_v59  ;;  %v2041_v18 = vrot.slane %v8608_v45, 1 }
 0x1cc   : > { %5834 = vmatmul.mubr.f32.gmra.mrb[10].mxu0 %v8311_v46  ;;  %v8613_v46 = vld [vmem:[%s8181_s11 + $0x110] sm:$0xff] }
 0x1cd   : > { %5836 = vmatprep.mubr.f32.mxu0 %v8352_v53  ;;  %6779 = vmatpush3.bf16.msra.mxu0 %v6776_v59  ;;  %v2260_v53 = vld [vmem:[#allocation6 + $0x410] sm:$0xff]  ;;  %v6812_v59 = vpack.c.bf16 %v2271_v40, %v2270_v58  ;;  %v2042_v51 = vrot.slane %v8613_v46, 1 }
 0x1ce   : > { %6781 = vmatprep.subr.bf16.mxu0 %v6780_v6 }
 0x1cf   : > { %v2043_v63 = vsel %vm522_vm0, %v2041_v18, %v2042_v51 }
 0x1d0   : > { %5837 = vmatmul.mubr.f32.gmra.mrb[12].mxu0 %v8355_v54  ;;  %v2261_v54 = vld [vmem:[#allocation6 + $0x418] sm:$0xff] }
 0x1d1   : > { %5839 = vmatprep.mubr.f32.mxu0 %v8366_v8  ;;  %6783 = vmatpush3.bf16.msra.mxu0 %v6780_v6  ;;  %v6792_v8 = vpack.c.bf16 %v2261_v54, %v2260_v53  ;;  %v6816_v6 = vpack.c.bf16 %v2273_v4, %v2272_v5 }
 0x1d2   : > { %6785 = vmatprep.subr.bf16.mxu0 %v6784_v19 }
 0x1d4   : > { %5840 = vmatmul.mubr.f32.gmra.mrb[14].mxu0 %v8372_v17  ;;  %v2262_v17 = vld [vmem:[#allocation6 + $0x420] sm:$0xff] }
 0x1d5   : > { %5842 = vmatprep.mubr.f32.mxu0 %v8521_v2  ;;  %6787 = vmatpush3.bf16.msra.mxu0 %v6784_v19  ;;  %v6796_v2 = vpack.c.bf16 %v2263_v38, %v2262_v17  ;;  %v475_v19 = vld [vmem:[%s8181_s11 + $0x118] sm:$0xff] }
 0x1d6   : > { %6789 = vmatprep.subr.bf16.mxu0 %v6788_v32  ;;  %v2044_v31 = vrot.slane %v475_v19, 1 }
 0x1d8   : > { %5843 = vmatmul.mubr.f32.gmra.mrb[16].mxu0 %v8526_v39  ;;  %v2264_v39 = vld [vmem:[#allocation6 + $0x430] sm:$0xff] }
 0x1d9   : > { %5845 = vmatprep.mubr.f32.mxu0 %v8608_v45  ;;  %v6800_v57 = vpack.c.bf16 %v2265_v60, %v2264_v39 }
 0x1dc   : > { %5846 = vmatmul.mubr.f32.gmra.mrb[18].mxu0 %v8613_v46 }
 0x1dd   : > { %5880 = vmatprep.mubr.f32.mxu0 %v8240_v62 }
 0x1e0   : > { %5881 = vmatmul.mubr.f32.vlgmr.msra.gmra.mrb[0].mxu0 %v8256_v7 }
 0x1e1   : > { %6791 = vmatpush3.bf16.msra.mxu0 %v6788_v32  ;;  %5883 = vmatprep.mubr.f32.mxu0 %v8260_v9  ;;  %v2045_v32 = vsel %vm522_vm0, %v2042_v51, %v2044_v31 }
 0x1e2   : > { %6793 = vmatprep.subr.bf16.mxu0 %v6792_v8 }
 0x1e4   : > { %5884 = vmatmul.mubr.f32.gmra.mrb[2].mxu0 %v8276_v20 }
 0x1e5   : > { %6795 = vmatpush3.bf16.msra.mxu0 %v6792_v8  ;;  %5886 = vmatprep.mubr.f32.mxu0 %v8280_v23 }
 0x1e6   : > { %6797 = vmatprep.subr.bf16.mxu0 %v6796_v2 }
 0x1e8   : > { %5887 = vmatmul.mubr.f32.gmra.mrb[4].mxu0 %v8296_v33 }
 0x1e9   : > { %5889 = vmatprep.mubr.f32.mxu0 %v8300_v35  ;;  %6799 = vmatpush3.bf16.msra.mxu0 %v6796_v2 }
 0x1ea   : > { %6801 = vmatprep.subr.bf16.mxu0 %v6800_v57 }
 0x1ec   : > { %5890 = vmatmul.mubr.f32.gmra.mrb[6].mxu0 %v8316_v49 }
 0x1ed   : > { %5892 = vmatprep.mubr.f32.mxu0 %v8320_v52  ;;  %6803 = vmatpush3.bf16.msra.mxu0 %v6800_v57 }
 0x1ee   : > { %6805 = vmatprep.subr.bf16.mxu0 %v6804_v41 }
 0x1f0   : > { %5893 = vmatmul.mubr.f32.gmra.mrb[8].mxu0 %v8330_v0 }
 0x1f1   : > { %5895 = vmatprep.mubr.f32.mxu0 %v8334_v3  ;;  %6807 = vmatpush3.bf16.msra.mxu0 %v6804_v41 }
 0x1f2   : > { %6809 = vmatprep.subr.bf16.mxu0 %v6808_v48 }
 0x1f4   : > { %5896 = vmatmul.mubr.f32.gmra.mrb[10].mxu0 %v8339_v13 }
 0x1f5   : > { %5898 = vmatprep.mubr.f32.mxu0 %v8369_v12  ;;  %6811 = vmatpush3.bf16.msra.mxu0 %v6808_v48 }
 0x1f6   : > { %6813 = vmatprep.subr.bf16.mxu0 %v6812_v59 }
 0x1f8   : > { %5899 = vmatmul.mubr.f32.gmra.mrb[12].mxu0 %v8375_v21 }
 0x1f9   : > { %5901 = vmatprep.mubr.f32.mxu0 %v8388_v10  ;;  %6815 = vmatpush3.bf16.msra.mxu0 %v6812_v59 }
 0x1fa   : > { %6817 = vmatprep.subr.bf16.mxu0 %v6816_v6 }
 0x1fc   : > { %5902 = vmatmul.mubr.f32.gmra.mrb[14].mxu0 %v8391_v11 }
 0x1fd   : > { %5904 = vmatprep.mubr.f32.mxu0 %v8553_v14  ;;  %6819 = vmatpush3.bf16.msra.mxu0 %v6816_v6 }
 0x200   : > { %5905 = vmatmul.mubr.f32.gmra.mrb[16].mxu0 %v8558_v16 }
 0x201   : > { %5907 = vmatprep.mubr.f32.mxu0 %v2043_v63 }
 0x204   : > { %5908 = vmatmul.mubr.f32.gmra.mrb[18].mxu0 %v2045_v32 }
 0x205   : > { %5942 = vmatprep.mubr.f32.mxu0 %v8418_v44  ;;  %v2250_v44 = vrot.slane %v8608_v45, 2 }
 0x208   : > { %5943 = vmatmul.mubr.f32.vlgmr.msra.gmra.mrb[0].mxu0 %v8425_v25  ;;  %v2251_v25 = vrot.slane %v8613_v46, 2 }
 0x209   : > { %5945 = vmatprep.mubr.f32.mxu0 %v8429_v37  ;;  %v9242_v37 = vld [vmem:[#allocation25_spill] sm:$0xff] }
 0x20c   : > { %5946 = vmatmul.mubr.f32.gmra.mrb[2].mxu0 %v8436_v1  ;;  %v2253_v1 = vrot.slane %v475_v19, 2 }
 0x20d   : > { %5948 = vmatprep.mubr.f32.mxu0 %v9239_v30 }
 0x210   : > { %5949 = vmatmul.mubr.f32.gmra.mrb[4].mxu0 %v8447_v29  ;;  %v2252_v29 = vsel %vm940_vm1, %v2250_v44, %v2251_v25 }
 0x211   : > { %5951 = vmatprep.mubr.f32.mxu0 %v9240_v24 }
 0x214   : > { %5952 = vmatmul.mubr.f32.gmra.mrb[6].mxu0 %v8458_v43  ;;  %v2254_v43 = vsel %vm940_vm1, %v2251_v25, %v2253_v1 }
 0x215   : > { %5954 = vmatprep.mubr.f32.mxu0 %v8462_v50  ;;  %v8661_v50 = vpop.f32.mrb[0].mxu1 }
 0x218   : > { %5955 = vmatmul.mubr.f32.gmra.mrb[8].mxu0 %v8469_v26  ;;  %v8663_v26 = vpop.f32.mrb[1].mxu1 }
 0x219   : > { %5957 = vmatprep.mubr.f32.mxu0 %v8473_v22  ;;  %v8665_v22 = vpop.f32.mrb[2].mxu1 }
 0x21c   : > { %5958 = vmatmul.mubr.f32.gmra.mrb[10].mxu0 %v8480_v55  ;;  %v8667_v55 = vpop.f32.mrb[3].mxu1 }
 0x21d   : > { %5960 = vmatprep.mubr.f32.mxu0 %v8484_v42  ;;  %v8672_v42 = vld [vmem:[%s9243_s5] ss:$0 sm:$0xff] }
 0x220   : > { %5961 = vmatmul.mubr.f32.gmra.mrb[12].mxu0 %v8491_v36 }
 0x221   : > { %5963 = vmatprep.mubr.f32.mxu0 %v8495_v56  ;;  %v8677_v56 = vld [vmem:[%s9244_s16] ss:$0 sm:$0xff] }
 0x224   : > { %5964 = vmatmul.mubr.f32.gmra.mrb[14].mxu0 %v8500_v34 }
 0x225   : > { %5966 = vmatprep.mubr.f32.mxu0 %v9242_v37 }
 0x228   : > { %5967 = vmatmul.mubr.f32.gmra.mrb[16].mxu0 %v8587_v61 }
 0x229   : > { %5969 = vmatprep.mubr.f32.mxu0 %v2252_v29 }
 0x22c   : > { %5970 = vmatmul.mubr.f32.gmra.mrb[18].mxu0 %v2254_v43 }
 0x2db   : > { %v5944_v36 = vpop.f32.mrb[0].mxu0 }
 0x2dc   : > { %v2467_v34 = vmul.f32 %v5944_v36, %v8672_v42  ;;  %v2340_v14 = vpop.f32.mrb[1].mxu0 }
 0x2dd   : > { %v2466_v16 = vmul.f32 %v8672_v42, %v2340_v14 }
 0x2de   : > { %v2494_v30 = vadd.f32 %v8677_v56, %v2467_v34 }
 0x2df   : > { %v2493_v24 = vadd.f32 %v8677_v56, %v2466_v16  ;;  %v5947_v61 = vpop.f32.mrb[2].mxu0 }
 0x2e0   : > { %v2514_v45 = vmax.f32 %v2494_v30, 0.0  ;;  %v2469_v46 = vmul.f32 %v5947_v61, %v8672_v42  ;;  %v2350_v53 = vpop.f32.mrb[3].mxu0 }
 0x2e1   : > { %v2513_v54 = vmax.f32 %v2493_v24, 0.0  ;;  %v2468_v8 = vmul.f32 %v8672_v42, %v2350_v53 }
 0x2e2   : > { %2534 = vst [vmem:[#allocation2 + $0x9] sm:$0xff] %v2514_v45  ;;  %v2496_v17 = vadd.f32 %v8677_v56, %v2469_v46 }
 0x2e3   : > { %2533 = vst [vmem:[#allocation2 + $0x1] sm:$0xff] %v2513_v54  ;;  %v2495_v38 = vadd.f32 %v8677_v56, %v2468_v8  ;;  %v5950_v2 = vpop.f32.mrb[4].mxu0 }
 0x2e4   : > { %v2516_v39 = vmax.f32 %v2496_v17, 0.0  ;;  %v2471_v60 = vmul.f32 %v5950_v2, %v8672_v42  ;;  %v2360_v57 = vpop.f32.mrb[5].mxu0 }
 0x2e5   : > { %v2515_v28 = vmax.f32 %v2495_v38, 0.0  ;;  %v2470_v27 = vmul.f32 %v8672_v42, %v2360_v57 }
 0x2e6   : > { %2536 = vst [vmem:[#allocation2 + $0x21] sm:$0xff] %v2516_v39  ;;  %v2498_v41 = vadd.f32 %v8677_v56, %v2471_v60 }
 0x2e7   : > { %2535 = vst [vmem:[#allocation2 + $0x19] sm:$0xff] %v2515_v28  ;;  %v2497_v47 = vadd.f32 %v8677_v56, %v2470_v27  ;;  %v5953_v15 = vpop.f32.mrb[6].mxu0 }
 0x2e8   : > { %v2518_v48 = vmax.f32 %v2498_v41, 0.0  ;;  %v2473_v58 = vmul.f32 %v5953_v15, %v8672_v42  ;;  %v2370_v40 = vpop.f32.mrb[7].mxu0 }
 0x2e9   : > { %v2517_v59 = vmax.f32 %v2497_v47, 0.0  ;;  %v2472_v5 = vmul.f32 %v8672_v42, %v2370_v40 }
 0x2ea   : > { %2538 = vst [vmem:[#allocation2 + $0x39] sm:$0xff] %v2518_v48  ;;  %v2500_v4 = vadd.f32 %v8677_v56, %v2473_v58 }
 0x2eb   : > { %2537 = vst [vmem:[#allocation2 + $0x31] sm:$0xff] %v2517_v59  ;;  %v2499_v6 = vadd.f32 %v8677_v56, %v2472_v5  ;;  %v5956_v18 = vpop.f32.mrb[8].mxu0 }
 0x2ec   : > { %v2520_v51 = vmax.f32 %v2500_v4, 0.0  ;;  %v2475_v19 = vmul.f32 %v5956_v18, %v8672_v42  ;;  %v2380_v31 = vpop.f32.mrb[9].mxu0 }
 0x2ed   : > { %v2519_v63 = vmax.f32 %v2499_v6, 0.0  ;;  %v2474_v32 = vmul.f32 %v8672_v42, %v2380_v31 }
 0x2ee   : > { %2540 = vst [vmem:[#allocation2 + $0x51] sm:$0xff] %v2520_v51  ;;  %v2502_v44 = vadd.f32 %v8677_v56, %v2475_v19 }
 0x2ef   : > { %2539 = vst [vmem:[#allocation2 + $0x49] sm:$0xff] %v2519_v63  ;;  %v2501_v25 = vadd.f32 %v8677_v56, %v2474_v32  ;;  %v5959_v37 = vpop.f32.mrb[10].mxu0 }
 0x2f0   : > { %v2522_v1 = vmax.f32 %v2502_v44, 0.0  ;;  %v2477_v29 = vmul.f32 %v5959_v37, %v8672_v42  ;;  %v2390_v43 = vpop.f32.mrb[11].mxu0 }
 0x2f1   : > { %v2521_v36 = vmax.f32 %v2501_v25, 0.0  ;;  %v2476_v34 = vmul.f32 %v8672_v42, %v2390_v43 }
 0x2f2   : > { %2542 = vst [vmem:[#allocation2 + $0x69] sm:$0xff] %v2522_v1  ;;  %v2504_v14 = vadd.f32 %v8677_v56, %v2477_v29 }
 0x2f3   : > { %2541 = vst [vmem:[#allocation2 + $0x61] sm:$0xff] %v2521_v36  ;;  %v2503_v16 = vadd.f32 %v8677_v56, %v2476_v34  ;;  %v5962_v30 = vpop.f32.mrb[12].mxu0 }
 0x2f4   : > { %v2524_v24 = vmax.f32 %v2504_v14, 0.0  ;;  %v2479_v61 = vmul.f32 %v5962_v30, %v8672_v42  ;;  %v2400_v45 = vpop.f32.mrb[13].mxu0 }
 0x2f5   : > { %v2523_v46 = vmax.f32 %v2503_v16, 0.0  ;;  %v2478_v53 = vmul.f32 %v8672_v42, %v2400_v45 }
 0x2f6   : > { %2544 = vst [vmem:[#allocation2 + $0x81] sm:$0xff] %v2524_v24  ;;  %v2506_v54 = vadd.f32 %v8677_v56, %v2479_v61 }
 0x2f7   : > { %2543 = vst [vmem:[#allocation2 + $0x79] sm:$0xff] %v2523_v46  ;;  %v2505_v8 = vadd.f32 %v8677_v56, %v2478_v53  ;;  %v5965_v17 = vpop.f32.mrb[14].mxu0 }
 0x2f8   : > { %v2526_v38 = vmax.f32 %v2506_v54, 0.0  ;;  %v2481_v2 = vmul.f32 %v5965_v17, %v8672_v42  ;;  %v2410_v39 = vpop.f32.mrb[15].mxu0 }
 0x2f9   : > { %v2525_v60 = vmax.f32 %v2505_v8, 0.0  ;;  %v2480_v57 = vmul.f32 %v8672_v42, %v2410_v39 }
 0x2fa   : > { %2546 = vst [vmem:[#allocation2 + $0x99] sm:$0xff] %v2526_v38  ;;  %v2508_v28 = vadd.f32 %v8677_v56, %v2481_v2 }
 0x2fb   : > { %2545 = vst [vmem:[#allocation2 + $0x91] sm:$0xff] %v2525_v60  ;;  %v2507_v27 = vadd.f32 %v8677_v56, %v2480_v57  ;;  %v5968_v41 = vpop.f32.mrb[16].mxu0 }
 0x2fc   : > { %v2528_v47 = vmax.f32 %v2508_v28, 0.0  ;;  %v7156_v15 = vadd.f32 %v5968_v41, %v8661_v50  ;;  %v2420_v48 = vpop.f32.mrb[17].mxu0 }
 0x2fd   : > { %v2527_v58 = vmax.f32 %v2507_v27, 0.0  ;;  %v7157_v40 = vadd.f32 %v2420_v48, %v8663_v26 }
 0x2fe   : > { %2548 = vst [vmem:[#allocation2 + $0xb1] sm:$0xff] %v2528_v47  ;;  %v2483_v59 = vmul.f32 %v7156_v15, %v8672_v42 }
 0x2ff   : > { %2547 = vst [vmem:[#allocation2 + $0xa9] sm:$0xff] %v2527_v58  ;;  %v2482_v5 = vmul.f32 %v7157_v40, %v8672_v42  ;;  %v5971_v4 = vpop.f32.mrb[18].mxu0 }
 0x300   : > { %v2510_v6 = vadd.f32 %v8677_v56, %v2483_v59  ;;  %v7158_v18 = vadd.f32 %v5971_v4, %v8665_v22  ;;  %v2430_v51 = vpop.f32.mrb[19].mxu0 }
 0x301   : > { %v2509_v19 = vadd.f32 %v8677_v56, %v2482_v5  ;;  %v7159_v50 = vadd.f32 %v2430_v51, %v8667_v55  ;;  %v7840_v55 = vmov (!%p4756_p10), 0.0  }
 0x302   : > { %v2530_v31 = vmax.f32 %v2510_v6, 0.0  ;;  %v2485_v26 = vmul.f32 %v7158_v18, %v8672_v42  ;;  %2577 = vst [vmem:[#allocation2] sm:$0xff] (!%p4756_p10), %v7840_v55  ;;  %2578 = vst [vmem:[#allocation2 + $0x8] sm:$0xff] (!%p4756_p10), %v7840_v55 }
 0x303   : > { %v2529_v63 = vmax.f32 %v2509_v19, 0.0  ;;  %v2484_v32 = vmul.f32 %v7159_v50, %v8672_v42  ;;  %2576 = sbr.rel (%p4756_p10) target bundleno = 778 (0x30a), region = 80  ;;  %2579 = vst [vmem:[#allocation2 + $0x10] sm:$0xff] (!%p4756_p10), %v7840_v55 }
 0x304   : > { %2550 = vst [vmem:[#allocation2 + $0xc9] sm:$0xff] %v2530_v31  ;;  %v2512_v44 = vadd.f32 %v8677_v56, %v2485_v26 }
 0x305   : > { %2549 = vst [vmem:[#allocation2 + $0xc1] sm:$0xff] %v2529_v63  ;;  %v2511_v25 = vadd.f32 %v8677_v56, %v2484_v32 }
 0x306   : > { %v2532_v37 = vmax.f32 %v2512_v44, 0.0 }
 0x307   : > { %v2531_v22 = vmax.f32 %v2511_v25, 0.0 }
 0x308   : > { %2552 = vst [vmem:[#allocation2 + $0xe1] sm:$0xff] %v2532_v37 }
 0x309   : > { %2551 = vst [vmem:[#allocation2 + $0xd9] sm:$0xff] %v2531_v22 }
 0x30a PF: > { %p4757_p2 = scmp.ne.s32.totalorder %s7815_s19, 1 }
 0x30b   : > { %v7841_v42 = vmov (!%p4757_p2), 0.0  }
 0x30c   : > { %2583 = sbr.rel (%p4757_p2) target bundleno = 787 (0x313), region = 84  ;;  %2585 = vst [vmem:[#allocation2 + $0xd8] sm:$0xff] (!%p4757_p2), %v7841_v42  ;;  %2586 = vst [vmem:[#allocation2 + $0xe0] sm:$0xff] (!%p4757_p2), %v7841_v42 }
 0x30d   : > { %2587 = vst [vmem:[#allocation2 + $0xe8] sm:$0xff] (!%p4757_p2), %v7841_v42 }
 0x313 PF: > { %v2637_v56 = vld [vmem:[#allocation8 + $0x80] sm:$0xff]  ;;  %v2638_v1 = vld [vmem:[#allocation8 + $0x88] sm:$0xff]  ;;  %v2639_v29 = vld [vmem:[#allocation8 + $0x90] sm:$0xff]  ;;  %s9250_s29 = sld [smem:[#allocation31_spill]]  ;;  %s9251_s25 = sld [smem:[#allocation33_spill]] }
 0x314   : > { %v6820_v43 = vpack.c.bf16 %v2638_v1, %v2637_v56  ;;  %v2640_v36 = vld [vmem:[#allocation8 + $0x98] sm:$0xff]  ;;  %v2641_v14 = vld [vmem:[#allocation8 + $0xa0] sm:$0xff]  ;;  %v2642_v16 = vld [vmem:[#allocation8 + $0xa8] sm:$0xff]  ;;  %s9252_s11 = sld [smem:[#allocation32_spill]]  ;;  %s9253_s5 = sld [smem:[#allocation34_spill]] }
 0x315   : > { %v6824_v34 = vpack.c.bf16 %v2640_v36, %v2639_v29  ;;  %v6828_v30 = vpack.c.bf16 %v2642_v16, %v2641_v14  ;;  %v2620_v24 = vld [vmem:[#allocation2 + $0x1] sm:$0xff]  ;;  %v2645_v53 = vld [vmem:[#allocation8 + $0xc0] sm:$0xff]  ;;  %v2646_v54 = vld [vmem:[#allocation8 + $0xc8] sm:$0xff]  ;;  %s9254_s8 = sld [smem:[#allocation17_spill]]  ;;  %s4769_s30 = sshll.u32 %s7815_s19, 4 }
 0x316   : > { %6821 = vmatprep.subr.bf16.mxu1 %v6820_v43  ;;  %v2643_v61 = vld [vmem:[#allocation8 + $0xb0] sm:$0xff]  ;;  %v2644_v45 = vld [vmem:[#allocation8 + $0xb8] sm:$0xff]  ;;  %6004 = vmatprep.mubr.f32.mxu1 %v2620_v24  ;;  %v6836_v8 = vpack.c.bf16 %v2646_v54, %v2645_v53  ;;  %v2649_v39 = vld [vmem:[#allocation8 + $0xe0] sm:$0xff]  ;;  %s9255_s10 = sld [smem:[#allocation18_spill]]  ;;  %s9108_s28 = scalar_lea.sflag [#allocation5], %s433_s4 }
 0x317   : > { %6823 = vmatpush3.bf16.msra.mxu1 %v6820_v43  ;;  %v6832_v46 = vpack.c.bf16 %v2644_v45, %v2643_v61  ;;  %v2647_v17 = vld [vmem:[#allocation8 + $0xd0] sm:$0xff]  ;;  %v2648_v38 = vld [vmem:[#allocation8 + $0xd8] sm:$0xff]  ;;  %v2650_v60 = vld [vmem:[#allocation8 + $0xe8] sm:$0xff]  ;;  %s7842_s20 = smov [#allocation11]  }
 0x318   : > { %6825 = vmatprep.subr.bf16.mxu1 %v6824_v34  ;;  %v6840_v2 = vpack.c.bf16 %v2648_v38, %v2647_v17  ;;  %v6844_v57 = vpack.c.bf16 %v2650_v60, %v2649_v39  ;;  %v2651_v28 = vld [vmem:[#allocation8 + $0xf0] sm:$0xff]  ;;  %v2652_v27 = vld [vmem:[#allocation8 + $0xf8] sm:$0xff]  ;;  %v2604_v47 = vld [vmem:[#allocation8] sm:$0xff]  ;;  %s7705_s3 = sshll.u32 %s7842_s20, 4  ;;  %s7706_s3 = int_to_ptr.vmem [resolvable:$false] %s7705_s3 }
 0x319   : > { %v6848_v41 = vpack.c.bf16 %v2652_v27, %v2651_v28  ;;  %v2605_v15 = vld [vmem:[#allocation8 + $0x8] sm:$0xff]  ;;  %v2606_v58 = vld [vmem:[#allocation8 + $0x10] sm:$0xff]  ;;  %v2607_v40 = vld [vmem:[#allocation8 + $0x18] sm:$0xff] }
 0x31a   : > { %v6852_v48 = vpack.c.bf16 %v2605_v15, %v2604_v47  ;;  %v2621_v59 = vld [vmem:[#allocation2 + $0x9] sm:$0xff]  ;;  %v8728_v5 = vld [vmem:[#allocation2 + $0x19] sm:$0xff]  ;;  %v6856_v4 = vpack.c.bf16 %v2607_v40, %v2606_v58  ;;  %v8731_v51 = vld [vmem:[#allocation2 + $0x21] sm:$0xff] }
 0x31b   : > { %6827 = vmatpush3.bf16.msra.mxu1 %v6824_v34  ;;  %v2608_v6 = vld [vmem:[#allocation8 + $0x20] sm:$0xff]  ;;  %v2609_v18 = vld [vmem:[#allocation8 + $0x28] sm:$0xff]  ;;  %v2610_v31 = vld [vmem:[#allocation8 + $0x30] sm:$0xff]  ;;  %s4765_s16 = sshll.u32 %s9254_s8, 5 }
 0x31c   : > { %6829 = vmatprep.subr.bf16.mxu1 %v6828_v30  ;;  %v8733_v19 = vld [vmem:[#allocation2 + $0x31] sm:$0xff]  ;;  %v6860_v50 = vpack.c.bf16 %v2609_v18, %v2608_v6  ;;  %v2611_v26 = vld [vmem:[#allocation8 + $0x38] sm:$0xff]  ;;  %v8737_v63 = vld [vmem:[#allocation2 + $0x39] sm:$0xff]  ;;  %s4618_s19 = sadd.s32 %s4769_s30, %s4765_s16  ;;  %p9257_p5 = scmp.ne.s32.totalorder %s9255_s10, 0 }
 0x31d   : > { %v8739_v32 = vld [vmem:[#allocation2 + $0x49] sm:$0xff]  ;;  %v6864_v44 = vpack.c.bf16 %v2611_v26, %v2610_v31  ;;  %v2613_v37 = vld [vmem:[#allocation8 + $0x48] sm:$0xff]  ;;  %v8745_v55 = vld [vmem:[#allocation2 + $0x61] sm:$0xff]  ;;  %s4766_s1 = sshll.u32 %s4618_s19, 7 }
 0x31e   : > { %v2612_v25 = vld [vmem:[#allocation8 + $0x40] sm:$0xff]  ;;  %v2614_v56 = vld [vmem:[#allocation8 + $0x50] sm:$0xff]  ;;  %v2615_v1 = vld [vmem:[#allocation8 + $0x58] sm:$0xff] }
 0x31f   : > { %6831 = vmatpush3.bf16.msra.mxu1 %v6828_v30  ;;  %v8743_v22 = vld [vmem:[#allocation2 + $0x51] sm:$0xff]  ;;  %v6868_v42 = vpack.c.bf16 %v2613_v37, %v2612_v25  ;;  %v8749_v29 = vld [vmem:[#allocation2 + $0x69] sm:$0xff]  ;;  %v8751_v43 = vld [vmem:[#allocation2 + $0x79] sm:$0xff]  ;;  %v6872_v36 = vpack.c.bf16 %v2615_v1, %v2614_v56 }
 0x320   : > { %6833 = vmatprep.subr.bf16.mxu1 %v6832_v46  ;;  %v2616_v34 = vld [vmem:[#allocation8 + $0x60] sm:$0xff]  ;;  %v2617_v14 = vld [vmem:[#allocation8 + $0x68] sm:$0xff]  ;;  %v8755_v16 = vld [vmem:[#allocation2 + $0x81] sm:$0xff] }
 0x321   : > { %v8757_v30 = vld [vmem:[#allocation2 + $0x91] sm:$0xff]  ;;  %v6876_v24 = vpack.c.bf16 %v2617_v14, %v2616_v34  ;;  %v2618_v61 = vld [vmem:[#allocation8 + $0x70] sm:$0xff]  ;;  %v2619_v45 = vld [vmem:[#allocation8 + $0x78] sm:$0xff] }
 0x322   : > { %v8763_v53 = vld [vmem:[#allocation2 + $0xa9] sm:$0xff]  ;;  %v6880_v54 = vpack.c.bf16 %v2619_v45, %v2618_v61  ;;  %v2961_v17 = vld [vmem:[#allocation8 + $0x108] sm:$0xff]  ;;  %v2962_v60 = vld [vmem:[#allocation8 + $0x110] sm:$0xff] }
 0x323   : > { %6835 = vmatpush3.bf16.msra.mxu1 %v6832_v46  ;;  %v8761_v46 = vld [vmem:[#allocation2 + $0x99] sm:$0xff]  ;;  %v8767_v38 = vld [vmem:[#allocation2 + $0xb1] sm:$0xff]  ;;  %v2589_v28 = vld [vmem:[#allocation2 + $0x8] sm:$0xff] }
 0x324   : > { %6837 = vmatprep.subr.bf16.mxu1 %v6836_v8  ;;  %v8770_v27 = vld [vmem:[#allocation2 + $0x18] sm:$0xff]  ;;  %v2964_v47 = vld [vmem:[#allocation8 + $0x120] sm:$0xff]  ;;  %v8781_v18 = vld [vmem:[#allocation2 + $0x48] sm:$0xff] }
 0x325   : > { %v2965_v15 = vld [vmem:[#allocation8 + $0x128] sm:$0xff]  ;;  %v8775_v58 = vld [vmem:[#allocation2 + $0x30] sm:$0xff]  ;;  %v8787_v25 = vld [vmem:[#allocation2 + $0x60] sm:$0xff] }
 0x326   : > { %v6892_v40 = vpack.c.bf16 %v2965_v15, %v2964_v47  ;;  %v8779_v6 = vld [vmem:[#allocation2 + $0x38] sm:$0xff]  ;;  %v2968_v31 = vld [vmem:[#allocation8 + $0x140] sm:$0xff]  ;;  %v2971_v56 = vld [vmem:[#allocation8 + $0x158] sm:$0xff] }
 0x327   : > { %6839 = vmatpush3.bf16.msra.mxu1 %v6836_v8  ;;  %v2960_v8 = vld [vmem:[#allocation8 + $0x100] sm:$0xff]  ;;  %v2969_v26 = vld [vmem:[#allocation8 + $0x148] sm:$0xff]  ;;  %v8791_v1 = vld [vmem:[#allocation2 + $0x68] sm:$0xff] }
 0x328   : > { %6841 = vmatprep.subr.bf16.mxu1 %v6840_v2  ;;  %v6884_v39 = vpack.c.bf16 %v2961_v17, %v2960_v8  ;;  %v6900_v37 = vpack.c.bf16 %v2969_v26, %v2968_v31  ;;  %v2972_v14 = vld [vmem:[#allocation8 + $0x160] sm:$0xff]  ;;  %v8797_v61 = vld [vmem:[#allocation2 + $0x80] sm:$0xff]  ;;  %v2975_v17 = vld [vmem:[#allocation8 + $0x178] sm:$0xff] }
 0x329   : > { %v8799_v45 = vld [vmem:[#allocation2 + $0x90] sm:$0xff]  ;;  %v2974_v8 = vld [vmem:[#allocation8 + $0x170] sm:$0xff]  ;;  %v3350_v10 = vld [vmem:[#allocation8 + $0x208] sm:$0xff] }
 0x32a   : > { %v2943_v47 = vld [vmem:[#allocation2 + $0x2] sm:$0xff]  ;;  %v3159_v26 = vld [vmem:[#allocation8 + $0x1a0] sm:$0xff]  ;;  %v3354_v12 = vld [vmem:[#allocation8 + $0x228] sm:$0xff] }
 0x32b   : > { %6843 = vmatpush3.bf16.msra.mxu1 %v6840_v2  ;;  %v2588_v2 = vld [vmem:[#allocation2] sm:$0xff]  ;;  %v3349_v11 = vld [vmem:[#allocation8 + $0x200] sm:$0xff]  ;;  %v3352_v21 = vld [vmem:[#allocation8 + $0x218] sm:$0xff] }
 0x32c   : > { %6845 = vmatprep.subr.bf16.mxu1 %v6844_v57  ;;  %v3355_v13 = vld [vmem:[#allocation8 + $0x230] sm:$0xff] }
 0x32f   : > { %6847 = vmatpush3.bf16.msra.mxu1 %v6844_v57  ;;  %v2963_v57 = vld [vmem:[#allocation8 + $0x118] sm:$0xff] }
 0x330   : > { %6849 = vmatprep.subr.bf16.mxu1 %v6848_v41 }
 0x333   : > { %6851 = vmatpush3.bf16.msra.mxu1 %v6848_v41  ;;  %v6888_v41 = vpack.c.bf16 %v2963_v57, %v2962_v60  ;;  %v6912_v60 = vpack.c.bf16 %v2975_v17, %v2974_v8  ;;  %v3155_v57 = vld [vmem:[#allocation8 + $0x180] sm:$0xff] }
 0x334   : > { %6853 = vmatprep.subr.bf16.mxu1 %v6852_v48  ;;  %v8823_v8 = vld [vmem:[#allocation2 + $0x4a] sm:$0xff] }
 0x336   : > { %6005 = vmatmul.mubr.f32.vlgmr.msra.gmra.mrb[4].mxu1 %v2621_v59  ;;  %v2966_v59 = vld [vmem:[#allocation8 + $0x130] sm:$0xff] }
 0x337   : > { %6855 = vmatpush3.bf16.msra.mxu1 %v6852_v48  ;;  %6007 = vmatprep.mubr.f32.mxu1 %v8728_v5  ;;  %v8773_v48 = vld [vmem:[#allocation2 + $0x20] sm:$0xff] }
 0x338   : > { %6857 = vmatprep.subr.bf16.mxu1 %v6856_v4 }
 0x33a   : > { %6008 = vmatmul.mubr.f32.gmra.mrb[6].mxu1 %v8731_v51 }
 0x33b   : > { %6859 = vmatpush3.bf16.msra.mxu1 %v6856_v4  ;;  %6010 = vmatprep.mubr.f32.mxu1 %v8733_v19  ;;  %v2967_v4 = vld [vmem:[#allocation8 + $0x138] sm:$0xff] }
 0x33c   : > { %6861 = vmatprep.subr.bf16.mxu1 %v6860_v50 }
 0x33e   : > { %6011 = vmatmul.mubr.f32.gmra.mrb[8].mxu1 %v8737_v63 }
 0x33f   : > { %6863 = vmatpush3.bf16.msra.mxu1 %v6860_v50  ;;  %6013 = vmatprep.mubr.f32.mxu1 %v8739_v32  ;;  %v6896_v50 = vpack.c.bf16 %v2967_v4, %v2966_v59  ;;  %v3158_v59 = vld [vmem:[#allocation8 + $0x198] sm:$0xff] }
 0x340   : > { %6865 = vmatprep.subr.bf16.mxu1 %v6864_v44  ;;  %v2944_v4 = vld [vmem:[#allocation2 + $0xa] sm:$0xff] }
 0x342   : > { %6014 = vmatmul.mubr.f32.gmra.mrb[10].mxu1 %v8743_v22 }
 0x343   : > { %6867 = vmatpush3.bf16.msra.mxu1 %v6864_v44  ;;  %6016 = vmatprep.mubr.f32.mxu1 %v8745_v55  ;;  %v8785_v44 = vld [vmem:[#allocation2 + $0x50] sm:$0xff] }
 0x344   : > { %6869 = vmatprep.subr.bf16.mxu1 %v6868_v42 }
 0x346   : > { %6017 = vmatmul.mubr.f32.gmra.mrb[12].mxu1 %v8749_v29 }
 0x347   : > { %6871 = vmatpush3.bf16.msra.mxu1 %v6868_v42  ;;  %6019 = vmatprep.mubr.f32.mxu1 %v8751_v43  ;;  %v2970_v42 = vld [vmem:[#allocation8 + $0x150] sm:$0xff] }
 0x348   : > { %6873 = vmatprep.subr.bf16.mxu1 %v6872_v36  ;;  %v6904_v34 = vpack.c.bf16 %v2971_v56, %v2970_v42  ;;  %v8815_v42 = vld [vmem:[#allocation2 + $0x22] sm:$0xff]  ;;  %v8817_v56 = vld [vmem:[#allocation2 + $0x32] sm:$0xff] }
 0x34a   : > { %6020 = vmatmul.mubr.f32.gmra.mrb[14].mxu1 %v8755_v16 }
 0x34b   : > { %6875 = vmatpush3.bf16.msra.mxu1 %v6872_v36  ;;  %6022 = vmatprep.mubr.f32.mxu1 %v8757_v30  ;;  %v8793_v36 = vld [vmem:[#allocation2 + $0x78] sm:$0xff] }
 0x34c   : > { %6877 = vmatprep.subr.bf16.mxu1 %v6876_v24 }
 0x34e   : > { %6023 = vmatmul.mubr.f32.gmra.mrb[16].mxu1 %v8761_v46 }
 0x34f   : > { %6879 = vmatpush3.bf16.msra.mxu1 %v6876_v24  ;;  %6025 = vmatprep.mubr.f32.mxu1 %v8763_v53  ;;  %v2973_v24 = vld [vmem:[#allocation8 + $0x168] sm:$0xff] }
 0x350   : > { %6881 = vmatprep.subr.bf16.mxu1 %v6880_v54 }
 0x352   : > { %6026 = vmatmul.mubr.f32.gmra.mrb[18].mxu1 %v8767_v38 }
 0x353   : > { %6883 = vmatpush3.bf16.msra.mxu1 %v6880_v54  ;;  %6060 = vmatprep.mubr.f32.mxu1 %v2588_v2  ;;  %v6908_v54 = vpack.c.bf16 %v2973_v24, %v2972_v14  ;;  %v8803_v2 = vld [vmem:[#allocation2 + $0x98] sm:$0xff]  ;;  %v3161_v14 = vld [vmem:[#allocation8 + $0x1b0] sm:$0xff]  ;;  %v3162_v24 = vld [vmem:[#allocation8 + $0x1b8] sm:$0xff] }
 0x354   : > { %6885 = vmatprep.subr.bf16.mxu1 %v6884_v39  ;;  %v6928_v17 = vpack.c.bf16 %v3162_v24, %v3161_v14  ;;  %v8839_v14 = vld [vmem:[#allocation2 + $0x82] sm:$0xff]  ;;  %v8841_v24 = vld [vmem:[#allocation2 + $0x92] sm:$0xff] }
 0x356   : > { %6061 = vmatmul.mubr.f32.vlgmr.msra.gmra.mrb[4].mxu1 %v2589_v28  ;;  %v3156_v28 = vld [vmem:[#allocation8 + $0x188] sm:$0xff] }
 0x357   : > { %6887 = vmatpush3.bf16.msra.mxu1 %v6884_v39  ;;  %6063 = vmatprep.mubr.f32.mxu1 %v8770_v27  ;;  %v8805_v39 = vld [vmem:[#allocation2 + $0xa8] sm:$0xff]  ;;  %v6916_v15 = vpack.c.bf16 %v3156_v28, %v3155_v57  ;;  %v3164_v57 = vld [vmem:[#allocation8 + $0x1c8] sm:$0xff] }
 0x358   : > { %6889 = vmatprep.subr.bf16.mxu1 %v6888_v41  ;;  %v8827_v28 = vld [vmem:[#allocation2 + $0x52] sm:$0xff] }
 0x35a   : > { %6064 = vmatmul.mubr.f32.gmra.mrb[6].mxu1 %v8773_v48 }
 0x35b   : > { %6891 = vmatpush3.bf16.msra.mxu1 %v6888_v41  ;;  %6066 = vmatprep.mubr.f32.mxu1 %v8775_v58  ;;  %v8809_v41 = vld [vmem:[#allocation2 + $0xb0] sm:$0xff] }
 0x35c   : > { %6893 = vmatprep.subr.bf16.mxu1 %v6892_v40 }
 0x35e   : > { %6067 = vmatmul.mubr.f32.gmra.mrb[8].mxu1 %v8779_v6 }
 0x35f   : > { %6895 = vmatpush3.bf16.msra.mxu1 %v6892_v40  ;;  %6069 = vmatprep.mubr.f32.mxu1 %v8781_v18  ;;  %v3157_v40 = vld [vmem:[#allocation8 + $0x190] sm:$0xff] }
 0x360   : > { %6897 = vmatprep.subr.bf16.mxu1 %v6896_v50  ;;  %v6920_v31 = vpack.c.bf16 %v3158_v59, %v3157_v40  ;;  %v3165_v40 = vld [vmem:[#allocation8 + $0x1d0] sm:$0xff]  ;;  %v3166_v59 = vld [vmem:[#allocation8 + $0x1d8] sm:$0xff] }
 0x362   : > { %6070 = vmatmul.mubr.f32.gmra.mrb[10].mxu1 %v8785_v44 }
 0x363   : > { %6899 = vmatpush3.bf16.msra.mxu1 %v6896_v50  ;;  %6072 = vmatprep.mubr.f32.mxu1 %v8787_v25  ;;  %v8812_v50 = vld [vmem:[#allocation2 + $0x1a] sm:$0xff] }
 0x364   : > { %6901 = vmatprep.subr.bf16.mxu1 %v6900_v37 }
 0x366   : > { %6073 = vmatmul.mubr.f32.gmra.mrb[12].mxu1 %v8791_v1 }
 0x367   : > { %6903 = vmatpush3.bf16.msra.mxu1 %v6900_v37  ;;  %6075 = vmatprep.mubr.f32.mxu1 %v8793_v36  ;;  %v3160_v37 = vld [vmem:[#allocation8 + $0x1a8] sm:$0xff] }
 0x368   : > { %6905 = vmatprep.subr.bf16.mxu1 %v6904_v34 }
 0x36a   : > { %6076 = vmatmul.mubr.f32.gmra.mrb[14].mxu1 %v8797_v61 }
 0x36b   : > { %6907 = vmatpush3.bf16.msra.mxu1 %v6904_v34  ;;  %6078 = vmatprep.mubr.f32.mxu1 %v8799_v45  ;;  %v6924_v34 = vpack.c.bf16 %v3160_v37, %v3159_v26  ;;  %v6936_v26 = vpack.c.bf16 %v3166_v59, %v3165_v40  ;;  %v3167_v37 = vld [vmem:[#allocation8 + $0x1e0] sm:$0xff]  ;;  %v8845_v40 = vld [vmem:[#allocation2 + $0x9a] sm:$0xff] }
 0x36c   : > { %6909 = vmatprep.subr.bf16.mxu1 %v6908_v54  ;;  %v8847_v59 = vld [vmem:[#allocation2 + $0xaa] sm:$0xff] }
 0x36e   : > { %6079 = vmatmul.mubr.f32.gmra.mrb[16].mxu1 %v8803_v2 }
 0x36f   : > { %6911 = vmatpush3.bf16.msra.mxu1 %v6908_v54  ;;  %6081 = vmatprep.mubr.f32.mxu1 %v8805_v39  ;;  %v8821_v54 = vld [vmem:[#allocation2 + $0x3a] sm:$0xff] }
 0x370   : > { %6913 = vmatprep.subr.bf16.mxu1 %v6912_v60 }
 0x372   : > { %6082 = vmatmul.mubr.f32.gmra.mrb[18].mxu1 %v8809_v41 }
 0x373   : > { %6915 = vmatpush3.bf16.msra.mxu1 %v6912_v60  ;;  %6116 = vmatprep.mubr.f32.mxu1 %v2943_v47  ;;  %v3163_v60 = vld [vmem:[#allocation8 + $0x1c0] sm:$0xff]  ;;  %v8829_v47 = vld [vmem:[#allocation2 + $0x62] sm:$0xff] }
 0x374   : > { %6917 = vmatprep.subr.bf16.mxu1 %v6916_v15 }
 0x376   : > { %6117 = vmatmul.mubr.f32.vlgmr.msra.gmra.mrb[4].mxu1 %v2944_v4  ;;  %v8833_v4 = vld [vmem:[#allocation2 + $0x6a] sm:$0xff] }
 0x377   : > { %6919 = vmatpush3.bf16.msra.mxu1 %v6916_v15  ;;  %6119 = vmatprep.mubr.f32.mxu1 %v8812_v50  ;;  %v6932_v15 = vpack.c.bf16 %v3164_v57, %v3163_v60  ;;  %v3169_v60 = vld [vmem:[#allocation8 + $0x1f0] sm:$0xff]  ;;  %v3170_v57 = vld [vmem:[#allocation8 + $0x1f8] sm:$0xff] }
 0x378   : > { %6921 = vmatprep.subr.bf16.mxu1 %v6920_v31 }
 0x37a   : > { %6120 = vmatmul.mubr.f32.gmra.mrb[6].mxu1 %v8815_v42 }
 0x37b   : > { %6923 = vmatpush3.bf16.msra.mxu1 %v6920_v31  ;;  %6122 = vmatprep.mubr.f32.mxu1 %v8817_v56  ;;  %v8835_v31 = vld [vmem:[#allocation2 + $0x7a] sm:$0xff] }
 0x37c   : > { %6925 = vmatprep.subr.bf16.mxu1 %v6924_v34 }
 0x37e   : > { %6123 = vmatmul.mubr.f32.gmra.mrb[8].mxu1 %v8821_v54 }
 0x37f   : > { %6927 = vmatpush3.bf16.msra.mxu1 %v6924_v34  ;;  %6125 = vmatprep.mubr.f32.mxu1 %v8823_v8  ;;  %v3168_v34 = vld [vmem:[#allocation8 + $0x1e8] sm:$0xff] }
 0x380   : > { %6929 = vmatprep.subr.bf16.mxu1 %v6928_v17 }
 0x382   : > { %6126 = vmatmul.mubr.f32.gmra.mrb[10].mxu1 %v8827_v28 }
 0x383   : > { %6931 = vmatpush3.bf16.msra.mxu1 %v6928_v17  ;;  %6128 = vmatprep.mubr.f32.mxu1 %v8829_v47  ;;  %v6940_v17 = vpack.c.bf16 %v3168_v34, %v3167_v37  ;;  %v8851_v37 = vld [vmem:[#allocation2 + $0xb2] sm:$0xff]  ;;  %v6948_v34 = vpack.c.bf16 %v3350_v10, %v3349_v11  ;;  %v3356_v10 = vld [vmem:[#allocation8 + $0x238] sm:$0xff] }
 0x384   : > { %6933 = vmatprep.subr.bf16.mxu1 %v6932_v15  ;;  %v6960_v11 = vpack.c.bf16 %v3356_v10, %v3355_v13  ;;  %v3362_v13 = vld [vmem:[#allocation8 + $0x268] sm:$0xff]  ;;  %v8867_v10 = vld [vmem:[#allocation2 + $0xc0] sm:$0xff] }
 0x386   : > { %6129 = vmatmul.mubr.f32.gmra.mrb[12].mxu1 %v8833_v4 }
 0x387   : > { %6935 = vmatpush3.bf16.msra.mxu1 %v6932_v15  ;;  %6131 = vmatprep.mubr.f32.mxu1 %v8835_v31  ;;  %v6944_v15 = vpack.c.bf16 %v3170_v57, %v3169_v60  ;;  %v3353_v57 = vld [vmem:[#allocation8 + $0x220] sm:$0xff] }
 0x388   : > { %6937 = vmatprep.subr.bf16.mxu1 %v6936_v26 }
 0x38a   : > { %6132 = vmatmul.mubr.f32.gmra.mrb[14].mxu1 %v8839_v14 }
 0x38b   : > { %6939 = vmatpush3.bf16.msra.mxu1 %v6936_v26  ;;  %6134 = vmatprep.mubr.f32.mxu1 %v8841_v24  ;;  %v3351_v26 = vld [vmem:[#allocation8 + $0x210] sm:$0xff] }
 0x38c   : > { %6941 = vmatprep.subr.bf16.mxu1 %v6940_v17  ;;  %v6952_v60 = vpack.c.bf16 %v3352_v21, %v3351_v26  ;;  %v3358_v21 = vld [vmem:[#allocation8 + $0x248] sm:$0xff]  ;;  %v3361_v26 = vld [vmem:[#allocation8 + $0x260] sm:$0xff] }
 0x38e   : > { %6135 = vmatmul.mubr.f32.gmra.mrb[16].mxu1 %v8845_v40 }
 0x38f   : > { %6943 = vmatpush3.bf16.msra.mxu1 %v6940_v17  ;;  %6137 = vmatprep.mubr.f32.mxu1 %v8847_v59  ;;  %v6956_v17 = vpack.c.bf16 %v3354_v12, %v3353_v57  ;;  %v3360_v12 = vld [vmem:[#allocation8 + $0x258] sm:$0xff]  ;;  %v3363_v57 = vld [vmem:[#allocation8 + $0x270] sm:$0xff] }
 0x390   : > { %6945 = vmatprep.subr.bf16.mxu1 %v6944_v15 }
 0x392   : > { %6138 = vmatmul.mubr.f32.gmra.mrb[18].mxu1 %v8851_v37 }
 0x393   : > { %6947 = vmatpush3.bf16.msra.mxu1 %v6944_v15  ;;  %6172 = vmatprep.mubr.f32.mxu1 %v8770_v27  ;;  %v3357_v27 = vld [vmem:[#allocation8 + $0x240] sm:$0xff]  ;;  %v3359_v15 = vld [vmem:[#allocation8 + $0x250] sm:$0xff] }
 0x394   : > { %6949 = vmatprep.subr.bf16.mxu1 %v6948_v34 }
 0x396   : > { %6173 = vmatmul.mubr.f32.vlgmr.msra.gmra.mrb[4].mxu1 %v8773_v48  ;;  %v6964_v48 = vpack.c.bf16 %v3358_v21, %v3357_v27  ;;  %v3543_v27 = vld [vmem:[#allocation8 + $0x280] sm:$0xff]  ;;  %v3544_v21 = vld [vmem:[#allocation8 + $0x288] sm:$0xff] }
 0x397   : > { %6951 = vmatpush3.bf16.msra.mxu1 %v6948_v34  ;;  %6175 = vmatprep.mubr.f32.mxu1 %v8775_v58  ;;  %v6968_v34 = vpack.c.bf16 %v3360_v12, %v3359_v15  ;;  %v6980_v15 = vpack.c.bf16 %v3544_v21, %v3543_v27  ;;  %v3545_v12 = vld [vmem:[#allocation8 + $0x290] sm:$0xff]  ;;  %v3550_v27 = vld [vmem:[#allocation8 + $0x2b8] sm:$0xff]  ;;  %v3552_v21 = vld [vmem:[#allocation8 + $0x2c8] sm:$0xff] }
 0x398   : > { %6953 = vmatprep.subr.bf16.mxu1 %v6952_v60 }
 0x39a   : > { %6176 = vmatmul.mubr.f32.gmra.mrb[6].mxu1 %v8779_v6 }
 0x39b   : > { %6955 = vmatpush3.bf16.msra.mxu1 %v6952_v60  ;;  %6178 = vmatprep.mubr.f32.mxu1 %v8781_v18  ;;  %v6972_v60 = vpack.c.bf16 %v3362_v13, %v3361_v26  ;;  %v3546_v26 = vld [vmem:[#allocation8 + $0x298] sm:$0xff]  ;;  %v3547_v13 = vld [vmem:[#allocation8 + $0x2a0] sm:$0xff] }
 0x39c   : > { %6957 = vmatprep.subr.bf16.mxu1 %v6956_v17 }
 0x39e   : > { %6179 = vmatmul.mubr.f32.gmra.mrb[8].mxu1 %v8785_v44 }
 0x39f   : > { %6959 = vmatpush3.bf16.msra.mxu1 %v6956_v17  ;;  %6181 = vmatprep.mubr.f32.mxu1 %v8787_v25  ;;  %v3364_v17 = vld [vmem:[#allocation8 + $0x278] sm:$0xff] }
 0x3a0   : > { %6961 = vmatprep.subr.bf16.mxu1 %v6960_v11 }
 0x3a2   : > { %6182 = vmatmul.mubr.f32.gmra.mrb[10].mxu1 %v8791_v1 }
 0x3a3   : > { %6963 = vmatpush3.bf16.msra.mxu1 %v6960_v11  ;;  %6184 = vmatprep.mubr.f32.mxu1 %v8793_v36  ;;  %v6976_v11 = vpack.c.bf16 %v3364_v17, %v3363_v57  ;;  %v3548_v57 = vld [vmem:[#allocation8 + $0x2a8] sm:$0xff]  ;;  %v3549_v17 = vld [vmem:[#allocation8 + $0x2b0] sm:$0xff] }
 0x3a4   : > { %6965 = vmatprep.subr.bf16.mxu1 %v6964_v48 }
 0x3a6   : > { %6185 = vmatmul.mubr.f32.gmra.mrb[12].mxu1 %v8797_v61 }
 0x3a7   : > { %6967 = vmatpush3.bf16.msra.mxu1 %v6964_v48  ;;  %6187 = vmatprep.mubr.f32.mxu1 %v8799_v45  ;;  %v8871_v48 = vld [vmem:[#allocation2 + $0xc8] sm:$0xff] }
 0x3a8   : > { %6969 = vmatprep.subr.bf16.mxu1 %v6968_v34 }
 0x3aa   : > { %6188 = vmatmul.mubr.f32.gmra.mrb[14].mxu1 %v8803_v2 }
 0x3ab   : > { %6971 = vmatpush3.bf16.msra.mxu1 %v6968_v34  ;;  %6190 = vmatprep.mubr.f32.mxu1 %v8805_v39  ;;  %v6984_v34 = vpack.c.bf16 %v3546_v26, %v3545_v12  ;;  %v3554_v12 = vld [vmem:[#allocation8 + $0x2d8] sm:$0xff] }
 0x3ac   : > { %6973 = vmatprep.subr.bf16.mxu1 %v6972_v60 }
 0x3ae   : > { %6191 = vmatmul.mubr.f32.gmra.mrb[16].mxu1 %v8809_v41 }
 0x3af   : > { %6975 = vmatpush3.bf16.msra.mxu1 %v6972_v60  ;;  %6193 = vmatprep.mubr.f32.mxu1 %v8867_v10  ;;  %v6988_v60 = vpack.c.bf16 %v3548_v57, %v3547_v13  ;;  %v3556_v13 = vld [vmem:[#allocation8 + $0x2e8] sm:$0xff] }
 0x3b0   : > { %6977 = vmatprep.subr.bf16.mxu1 %v6976_v11 }
 0x3b2   : > { %6194 = vmatmul.mubr.f32.gmra.mrb[18].mxu1 %v8871_v48 }
 0x3b3   : > { %6979 = vmatpush3.bf16.msra.mxu1 %v6976_v11  ;;  %6228 = vmatprep.mubr.f32.mxu1 %v8728_v5  ;;  %v6992_v5 = vpack.c.bf16 %v3550_v27, %v3549_v17  ;;  %v3551_v11 = vld [vmem:[#allocation8 + $0x2c0] sm:$0xff]  ;;  %v3558_v17 = vld [vmem:[#allocation8 + $0x2f8] sm:$0xff] }
 0x3b4   : > { %6981 = vmatprep.subr.bf16.mxu1 %v6980_v15  ;;  %v8887_v27 = vld [vmem:[#allocation2 + $0xc1] sm:$0xff] }
 0x3b6   : > { %6229 = vmatmul.mubr.f32.vlgmr.msra.gmra.mrb[4].mxu1 %v8731_v51  ;;  %v6996_v51 = vpack.c.bf16 %v3552_v21, %v3551_v11  ;;  %v3738_v11 = vld [vmem:[#allocation8 + $0x300] sm:$0xff]  ;;  %v3739_v21 = vld [vmem:[#allocation8 + $0x308] sm:$0xff] }
 0x3b7   : > { %6983 = vmatpush3.bf16.msra.mxu1 %v6980_v15  ;;  %6231 = vmatprep.mubr.f32.mxu1 %v8733_v19  ;;  %v3553_v15 = vld [vmem:[#allocation8 + $0x2d0] sm:$0xff] }
 0x3b8   : > { %6985 = vmatprep.subr.bf16.mxu1 %v6984_v34  ;;  %v7000_v26 = vpack.c.bf16 %v3554_v12, %v3553_v15  ;;  %v7012_v15 = vpack.c.bf16 %v3739_v21, %v3738_v11  ;;  %v3740_v12 = vld [vmem:[#allocation8 + $0x310] sm:$0xff]  ;;  %v3745_v11 = vld [vmem:[#allocation8 + $0x338] sm:$0xff]  ;;  %v3747_v21 = vld [vmem:[#allocation8 + $0x348] sm:$0xff] }
 0x3ba   : > { %6232 = vmatmul.mubr.f32.gmra.mrb[6].mxu1 %v8737_v63 }
 0x3bb   : > { %6987 = vmatpush3.bf16.msra.mxu1 %v6984_v34  ;;  %6234 = vmatprep.mubr.f32.mxu1 %v8739_v32  ;;  %v3555_v34 = vld [vmem:[#allocation8 + $0x2e0] sm:$0xff] }
 0x3bc   : > { %6989 = vmatprep.subr.bf16.mxu1 %v6988_v60  ;;  %v7004_v57 = vpack.c.bf16 %v3556_v13, %v3555_v34  ;;  %v3741_v34 = vld [vmem:[#allocation8 + $0x318] sm:$0xff]  ;;  %v3742_v13 = vld [vmem:[#allocation8 + $0x320] sm:$0xff] }
 0x3be   : > { %6235 = vmatmul.mubr.f32.gmra.mrb[8].mxu1 %v8743_v22 }
 0x3bf   : > { %6991 = vmatpush3.bf16.msra.mxu1 %v6988_v60  ;;  %6237 = vmatprep.mubr.f32.mxu1 %v8745_v55  ;;  %v3557_v60 = vld [vmem:[#allocation8 + $0x2f0] sm:$0xff] }
 0x3c0   : > { %6993 = vmatprep.subr.bf16.mxu1 %v6992_v5 }
 0x3c2   : > { %6238 = vmatmul.mubr.f32.gmra.mrb[10].mxu1 %v8749_v29 }
 0x3c3   : > { %6995 = vmatpush3.bf16.msra.mxu1 %v6992_v5  ;;  %6240 = vmatprep.mubr.f32.mxu1 %v8751_v43  ;;  %v7008_v5 = vpack.c.bf16 %v3558_v17, %v3557_v60  ;;  %v3743_v60 = vld [vmem:[#allocation8 + $0x328] sm:$0xff]  ;;  %v3744_v17 = vld [vmem:[#allocation8 + $0x330] sm:$0xff] }
 0x3c4   : > { %6997 = vmatprep.subr.bf16.mxu1 %v6996_v51 }
 0x3c6   : > { %6241 = vmatmul.mubr.f32.gmra.mrb[12].mxu1 %v8755_v16 }
 0x3c7   : > { %6999 = vmatpush3.bf16.msra.mxu1 %v6996_v51  ;;  %6243 = vmatprep.mubr.f32.mxu1 %v8757_v30  ;;  %v8891_v51 = vld [vmem:[#allocation2 + $0xc9] sm:$0xff] }
 0x3c8   : > { %7001 = vmatprep.subr.bf16.mxu1 %v7000_v26 }
 0x3ca   : > { %6244 = vmatmul.mubr.f32.gmra.mrb[14].mxu1 %v8761_v46 }
 0x3cb   : > { %7003 = vmatpush3.bf16.msra.mxu1 %v7000_v26  ;;  %6246 = vmatprep.mubr.f32.mxu1 %v8763_v53  ;;  %v7016_v26 = vpack.c.bf16 %v3741_v34, %v3740_v12  ;;  %v3749_v12 = vld [vmem:[#allocation8 + $0x358] sm:$0xff] }
 0x3cc   : > { %7005 = vmatprep.subr.bf16.mxu1 %v7004_v57 }
 0x3ce   : > { %6247 = vmatmul.mubr.f32.gmra.mrb[16].mxu1 %v8767_v38 }
 0x3cf   : > { %7007 = vmatpush3.bf16.msra.mxu1 %v7004_v57  ;;  %6249 = vmatprep.mubr.f32.mxu1 %v8887_v27  ;;  %v7020_v57 = vpack.c.bf16 %v3743_v60, %v3742_v13  ;;  %v3751_v13 = vld [vmem:[#allocation8 + $0x368] sm:$0xff] }
 0x3d0   : > { %7009 = vmatprep.subr.bf16.mxu1 %v7008_v5 }
 0x3d2   : > { %6250 = vmatmul.mubr.f32.gmra.mrb[18].mxu1 %v8891_v51 }
 0x3d3   : > { %7011 = vmatpush3.bf16.msra.mxu1 %v7008_v5  ;;  %6284 = vmatprep.mubr.f32.mxu1 %v8812_v50  ;;  %v7024_v50 = vpack.c.bf16 %v3745_v11, %v3744_v17  ;;  %v3746_v5 = vld [vmem:[#allocation8 + $0x340] sm:$0xff]  ;;  %v3753_v17 = vld [vmem:[#allocation8 + $0x378] sm:$0xff] }
 0x3d4   : > { %7013 = vmatprep.subr.bf16.mxu1 %v7012_v15  ;;  %v8907_v11 = vld [vmem:[#allocation2 + $0xc2] sm:$0xff] }
 0x3d6   : > { %6285 = vmatmul.mubr.f32.vlgmr.msra.gmra.mrb[4].mxu1 %v8815_v42  ;;  %v7028_v42 = vpack.c.bf16 %v3747_v21, %v3746_v5  ;;  %v3932_v5 = vld [vmem:[#allocation8 + $0x380] sm:$0xff]  ;;  %v3933_v21 = vld [vmem:[#allocation8 + $0x388] sm:$0xff] }
 0x3d7   : > { %7015 = vmatpush3.bf16.msra.mxu1 %v7012_v15  ;;  %6287 = vmatprep.mubr.f32.mxu1 %v8817_v56  ;;  %v3748_v15 = vld [vmem:[#allocation8 + $0x350] sm:$0xff] }
 0x3d8   : > { %7017 = vmatprep.subr.bf16.mxu1 %v7016_v26  ;;  %v7032_v34 = vpack.c.bf16 %v3749_v12, %v3748_v15  ;;  %v7044_v15 = vpack.c.bf16 %v3933_v21, %v3932_v5  ;;  %v3934_v12 = vld [vmem:[#allocation8 + $0x390] sm:$0xff]  ;;  %v3939_v5 = vld [vmem:[#allocation8 + $0x3b8] sm:$0xff]  ;;  %v3941_v21 = vld [vmem:[#allocation8 + $0x3c8] sm:$0xff] }
 0x3da   : > { %6288 = vmatmul.mubr.f32.gmra.mrb[6].mxu1 %v8821_v54 }
 0x3db   : > { %7019 = vmatpush3.bf16.msra.mxu1 %v7016_v26  ;;  %6290 = vmatprep.mubr.f32.mxu1 %v8823_v8  ;;  %v3750_v26 = vld [vmem:[#allocation8 + $0x360] sm:$0xff] }
 0x3dc   : > { %7021 = vmatprep.subr.bf16.mxu1 %v7020_v57  ;;  %v7036_v60 = vpack.c.bf16 %v3751_v13, %v3750_v26  ;;  %v3935_v26 = vld [vmem:[#allocation8 + $0x398] sm:$0xff]  ;;  %v3936_v13 = vld [vmem:[#allocation8 + $0x3a0] sm:$0xff] }
 0x3de   : > { %6291 = vmatmul.mubr.f32.gmra.mrb[8].mxu1 %v8827_v28 }
 0x3df   : > { %7023 = vmatpush3.bf16.msra.mxu1 %v7020_v57  ;;  %6293 = vmatprep.mubr.f32.mxu1 %v8829_v47  ;;  %v3752_v57 = vld [vmem:[#allocation8 + $0x370] sm:$0xff] }
 0x3e0   : > { %7025 = vmatprep.subr.bf16.mxu1 %v7024_v50 }
 0x3e2   : > { %6294 = vmatmul.mubr.f32.gmra.mrb[10].mxu1 %v8833_v4 }
 0x3e3   : > { %7027 = vmatpush3.bf16.msra.mxu1 %v7024_v50  ;;  %6296 = vmatprep.mubr.f32.mxu1 %v8835_v31  ;;  %v7040_v50 = vpack.c.bf16 %v3753_v17, %v3752_v57  ;;  %v3937_v57 = vld [vmem:[#allocation8 + $0x3a8] sm:$0xff]  ;;  %v3938_v17 = vld [vmem:[#allocation8 + $0x3b0] sm:$0xff] }
 0x3e4   : > { %7029 = vmatprep.subr.bf16.mxu1 %v7028_v42 }
 0x3e6   : > { %6297 = vmatmul.mubr.f32.gmra.mrb[12].mxu1 %v8839_v14 }
 0x3e7   : > { %7031 = vmatpush3.bf16.msra.mxu1 %v7028_v42  ;;  %6299 = vmatprep.mubr.f32.mxu1 %v8841_v24  ;;  %v8911_v42 = vld [vmem:[#allocation2 + $0xca] sm:$0xff] }
 0x3e8   : > { %7033 = vmatprep.subr.bf16.mxu1 %v7032_v34 }
 0x3ea   : > { %6300 = vmatmul.mubr.f32.gmra.mrb[14].mxu1 %v8845_v40 }
 0x3eb   : > { %7035 = vmatpush3.bf16.msra.mxu1 %v7032_v34  ;;  %6302 = vmatprep.mubr.f32.mxu1 %v8847_v59  ;;  %v7048_v34 = vpack.c.bf16 %v3935_v26, %v3934_v12  ;;  %v3945_v12 = vld [vmem:[#allocation8 + $0x3e8] sm:$0xff]  ;;  %v3947_v26 = vld [vmem:[#allocation8 + $0x3f8] sm:$0xff] }
 0x3ec   : > { %7037 = vmatprep.subr.bf16.mxu1 %v7036_v60 }
 0x3ee   : > { %6303 = vmatmul.mubr.f32.gmra.mrb[16].mxu1 %v8851_v37 }
 0x3ef   : > { %7039 = vmatpush3.bf16.msra.mxu1 %v7036_v60  ;;  %6305 = vmatprep.mubr.f32.mxu1 %v8907_v11  ;;  %v7052_v60 = vpack.c.bf16 %v3937_v57, %v3936_v13  ;;  %v4127_v13 = vld [vmem:[#allocation8 + $0x408] sm:$0xff]  ;;  %v4128_v57 = vld [vmem:[#allocation8 + $0x410] sm:$0xff] }
 0x3f0   : > { %7041 = vmatprep.subr.bf16.mxu1 %v7040_v50 }
 0x3f2   : > { %6306 = vmatmul.mubr.f32.gmra.mrb[18].mxu1 %v8911_v42 }
 0x3f3   : > { %7043 = vmatpush3.bf16.msra.mxu1 %v7040_v50  ;;  %6340 = vmatprep.mubr.f32.mxu1 %v8775_v58  ;;  %v7056_v58 = vpack.c.bf16 %v3939_v5, %v3938_v17  ;;  %v3940_v50 = vld [vmem:[#allocation8 + $0x3c0] sm:$0xff]  ;;  %v4131_v17 = vld [vmem:[#allocation8 + $0x428] sm:$0xff]  ;;  %v4132_v5 = vld [vmem:[#allocation8 + $0x430] sm:$0xff] }
 0x3f4   : > { %7045 = vmatprep.subr.bf16.mxu1 %v7044_v15 }
 0x3f6   : > { %6341 = vmatmul.mubr.f32.vlgmr.msra.gmra.mrb[4].mxu1 %v8779_v6  ;;  %v7060_v6 = vpack.c.bf16 %v3941_v21, %v3940_v50  ;;  %v4134_v50 = vld [vmem:[#allocation8 + $0x440] sm:$0xff]  ;;  %v4135_v21 = vld [vmem:[#allocation8 + $0x448] sm:$0xff] }
 0x3f7   : > { %7047 = vmatpush3.bf16.msra.mxu1 %v7044_v15  ;;  %6343 = vmatprep.mubr.f32.mxu1 %v8781_v18  ;;  %v3942_v18 = vld [vmem:[#allocation8 + $0x3d0] sm:$0xff]  ;;  %v3943_v15 = vld [vmem:[#allocation8 + $0x3d8] sm:$0xff] }
 0x3f8   : > { %7049 = vmatprep.subr.bf16.mxu1 %v7048_v34 }
 0x3fa   : > { %6344 = vmatmul.mubr.f32.gmra.mrb[6].mxu1 %v8785_v44  ;;  %v7064_v44 = vpack.c.bf16 %v3943_v15, %v3942_v18  ;;  %v4139_v18 = vld [vmem:[#allocation8 + $0x468] sm:$0xff]  ;;  %v4141_v15 = vld [vmem:[#allocation8 + $0x478] sm:$0xff] }
 0x3fb   : > { %7051 = vmatpush3.bf16.msra.mxu1 %v7048_v34  ;;  %6346 = vmatprep.mubr.f32.mxu1 %v8787_v25  ;;  %v3944_v25 = vld [vmem:[#allocation8 + $0x3e0] sm:$0xff] }
 0x3fc   : > { %7053 = vmatprep.subr.bf16.mxu1 %v7052_v60  ;;  %v4126_v34 = vld [vmem:[#allocation8 + $0x400] sm:$0xff] }
 0x3fe   : > { %6347 = vmatmul.mubr.f32.gmra.mrb[8].mxu1 %v8791_v1  ;;  %v7068_v1 = vpack.c.bf16 %v3945_v12, %v3944_v25  ;;  %v4350_v25 = vld [vmem:[#allocation9 + $0x8] sm:$0xff]  ;;  %v4351_v12 = vld [vmem:[#allocation9 + $0x10] sm:$0xff] }
 0x3ff   : > { %7055 = vmatpush3.bf16.msra.mxu1 %v7052_v60  ;;  %6349 = vmatprep.mubr.f32.mxu1 %v8793_v36  ;;  %v3946_v36 = vld [vmem:[#allocation8 + $0x3f0] sm:$0xff]  ;;  %v4129_v60 = vld [vmem:[#allocation8 + $0x418] sm:$0xff] }
 0x400   : > { %7057 = vmatprep.subr.bf16.mxu1 %v7056_v58 }
 0x402   : > { %6350 = vmatmul.mubr.f32.gmra.mrb[10].mxu1 %v8797_v61  ;;  %v3735_v61 = vld [vmem:[#allocation2 + $0xd8] sm:$0xff] }
 0x403   : > { %7059 = vmatpush3.bf16.msra.mxu1 %v7056_v58  ;;  %6352 = vmatprep.mubr.f32.mxu1 %v8799_v45  ;;  %v7072_v45 = vpack.c.bf16 %v3947_v26, %v3946_v36  ;;  %v4133_v58 = vld [vmem:[#allocation8 + $0x438] sm:$0xff]  ;;  %v4354_v36 = vld [vmem:[#allocation9 + $0x28] sm:$0xff]  ;;  %v4355_v26 = vld [vmem:[#allocation9 + $0x30] sm:$0xff] }
 0x404   : > { %7061 = vmatprep.subr.bf16.mxu1 %v7060_v6 }
 0x406   : > { %6353 = vmatmul.mubr.f32.gmra.mrb[12].mxu1 %v8803_v2  ;;  %v3736_v2 = vld [vmem:[#allocation2 + $0xe0] sm:$0xff] }
 0x407   : > { %7063 = vmatpush3.bf16.msra.mxu1 %v7060_v6  ;;  %6355 = vmatprep.mubr.f32.mxu1 %v8805_v39  ;;  %v7076_v39 = vpack.c.bf16 %v4127_v13, %v4126_v34  ;;  %v4137_v6 = vld [vmem:[#allocation8 + $0x458] sm:$0xff]  ;;  %v4358_v34 = vld [vmem:[#allocation9 + $0x48] sm:$0xff] }
 0x408   : > { %7065 = vmatprep.subr.bf16.mxu1 %v7064_v44  ;;  %v4360_v13 = vld [vmem:[#allocation9 + $0x58] sm:$0xff] }
 0x40a   : > { %6356 = vmatmul.mubr.f32.gmra.mrb[14].mxu1 %v8809_v41  ;;  %v7080_v41 = vpack.c.bf16 %v4129_v60, %v4128_v57 }
 0x40b   : > { %7067 = vmatpush3.bf16.msra.mxu1 %v7064_v44  ;;  %6358 = vmatprep.mubr.f32.mxu1 %v8867_v10  ;;  %v4130_v10 = vld [vmem:[#allocation8 + $0x420] sm:$0xff] }
 0x40c   : > { %7069 = vmatprep.subr.bf16.mxu1 %v7068_v1  ;;  %v4349_v44 = vld [vmem:[#allocation9] sm:$0xff] }
 0x40e   : > { %6359 = vmatmul.mubr.f32.gmra.mrb[16].mxu1 %v8871_v48  ;;  %v7084_v48 = vpack.c.bf16 %v4131_v17, %v4130_v10  ;;  %v8987_v17 = vld [vmem:[%s9250_s29] ss:$0 sm:$0xff]  ;;  %s4621_s29 = sshll.u32 %s8724_s2, 4  ;;  %s9102_s29 = int_to_ptr.vmem [resolvable:$true] %s4621_s29 }
 0x40f   : > { %7071 = vmatpush3.bf16.msra.mxu1 %v7068_v1  ;;  %6361 = vmatprep.mubr.f32.mxu1 %v3735_v61  ;;  %v4352_v1 = vld [vmem:[#allocation9 + $0x18] sm:$0xff]  ;;  %p7708_p8 = scmp.lt.s32.totalorder %s9102_s29, %s7706_s3 }
 0x410   : > { %7073 = vmatprep.subr.bf16.mxu1 %v7072_v45  ;;  %v4356_v61 = vld [vmem:[#allocation9 + $0x38] sm:$0xff] }
 0x412   : > { %6362 = vmatmul.mubr.f32.gmra.mrb[18].mxu1 %v3736_v2  ;;  %v4362_v2 = vld [vmem:[#allocation9 + $0x68] sm:$0xff] }
 0x413   : > { %7075 = vmatpush3.bf16.msra.mxu1 %v7072_v45  ;;  %6396 = vmatprep.mubr.f32.mxu1 %v8733_v19  ;;  %v7088_v19 = vpack.c.bf16 %v4133_v58, %v4132_v5  ;;  %v4357_v45 = vld [vmem:[#allocation9 + $0x40] sm:$0xff]  ;;  %v8996_v58 = vld [vmem:[%s9251_s25] ss:$0 sm:$0xff]  ;;  %s9256_s25 = sld [smem:[#allocation35_spill]] }
 0x414   : > { %7077 = vmatprep.subr.bf16.mxu1 %v7076_v39 }
 0x416   : > { %6397 = vmatmul.mubr.f32.vlgmr.msra.gmra.mrb[4].mxu1 %v8737_v63  ;;  %v7092_v63 = vpack.c.bf16 %v4135_v21, %v4134_v50  ;;  %v9002_v50 = vld [vmem:[%s9252_s11] ss:$0 sm:$0xff]  ;;  %s7701_s11 = scalar_lea.vmem %s9102_s29, 2048 }
 0x417   : > { %7079 = vmatpush3.bf16.msra.mxu1 %v7076_v39  ;;  %6399 = vmatprep.mubr.f32.mxu1 %v8739_v32  ;;  %v4136_v32 = vld [vmem:[#allocation8 + $0x450] sm:$0xff]  ;;  %v4364_v39 = vld [vmem:[#allocation9 + $0x78] sm:$0xff]  ;;  %p7702_p9 = scmp.ne.s32.totalorder %s9102_s29, %s7701_s11 }
 0x418   : > { %7081 = vmatprep.subr.bf16.mxu1 %v7080_v41 }
 0x419   : > { %s9100_s26 = scalar_lea.hbm %s9256_s25, %s4766_s1  ;;  %p7703_p13 = pnand %p7702_p9, %p9257_p5 }
 0x41a   : > { %6400 = vmatmul.mubr.f32.gmra.mrb[6].mxu1 %v8743_v22  ;;  %v7096_v22 = vpack.c.bf16 %v4137_v6, %v4136_v32  ;;  %v9008_v32 = vld [vmem:[%s9253_s5] ss:$0 sm:$0xff]  ;;  %s7707_s5 = scalar_lea.vmem %s7706_s3, 4096 }
 0x41b   : > { %7083 = vmatpush3.bf16.msra.mxu1 %v7080_v41  ;;  %6402 = vmatprep.mubr.f32.mxu1 %v8745_v55  ;;  %v4138_v55 = vld [vmem:[#allocation8 + $0x460] sm:$0xff]  ;;  %p7704_p6 = pneg %p7703_p13  ;;  %p7709_p12 = scmp.lt.s32.totalorder %s7707_s5, %s7701_s11 }
 0x41c   : > { %7085 = vmatprep.subr.bf16.mxu1 %v7084_v48 }
 0x41d   : > { %p7710_p4 = por %p7709_p12, %p7708_p8 }
 0x41e   : > { %6403 = vmatmul.mubr.f32.gmra.mrb[8].mxu1 %v8749_v29  ;;  %v7100_v29 = vpack.c.bf16 %v4139_v18, %v4138_v55 }
 0x41f   : > { %7087 = vmatpush3.bf16.msra.mxu1 %v7084_v48  ;;  %6405 = vmatprep.mubr.f32.mxu1 %v8751_v43  ;;  %v4140_v43 = vld [vmem:[#allocation8 + $0x470] sm:$0xff]  ;;  %p7711_p7 = pnand %p7710_p4, %p7704_p6 }
 0x420   : > { %7089 = vmatprep.subr.bf16.mxu1 %v7088_v19 }
 0x422   : > { %6406 = vmatmul.mubr.f32.gmra.mrb[10].mxu1 %v8755_v16  ;;  %v3929_v16 = vld [vmem:[#allocation2 + $0xd9] sm:$0xff] }
 0x423   : > { %7091 = vmatpush3.bf16.msra.mxu1 %v7088_v19  ;;  %6408 = vmatprep.mubr.f32.mxu1 %v8757_v30  ;;  %v7104_v30 = vpack.c.bf16 %v4141_v15, %v4140_v43 }
 0x424   : > { %7093 = vmatprep.subr.bf16.mxu1 %v7092_v63 }
 0x426   : > { %6409 = vmatmul.mubr.f32.gmra.mrb[12].mxu1 %v8761_v46  ;;  %v3930_v46 = vld [vmem:[#allocation2 + $0xe1] sm:$0xff] }
 0x427   : > { %7095 = vmatpush3.bf16.msra.mxu1 %v7092_v63  ;;  %6411 = vmatprep.mubr.f32.mxu1 %v8763_v53  ;;  %v7108_v53 = vpack.c.bf16 %v4350_v25, %v4349_v44 }
 0x428   : > { %7097 = vmatprep.subr.bf16.mxu1 %v7096_v22 }
 0x42a   : > { %6412 = vmatmul.mubr.f32.gmra.mrb[14].mxu1 %v8767_v38  ;;  %v7112_v38 = vpack.c.bf16 %v4352_v1, %v4351_v12 }
 0x42b   : > { %7099 = vmatpush3.bf16.msra.mxu1 %v7096_v22  ;;  %6414 = vmatprep.mubr.f32.mxu1 %v8887_v27  ;;  %v4353_v27 = vld [vmem:[#allocation9 + $0x20] sm:$0xff] }
 0x42c   : > { %7101 = vmatprep.subr.bf16.mxu1 %v7100_v29 }
 0x42e   : > { %6415 = vmatmul.mubr.f32.gmra.mrb[16].mxu1 %v8891_v51  ;;  %v7116_v51 = vpack.c.bf16 %v4354_v36, %v4353_v27 }
 0x42f   : > { %7103 = vmatpush3.bf16.msra.mxu1 %v7100_v29  ;;  %6417 = vmatprep.mubr.f32.mxu1 %v3929_v16 }
 0x430   : > { %7105 = vmatprep.subr.bf16.mxu1 %v7104_v30 }
 0x432   : > { %6418 = vmatmul.mubr.f32.gmra.mrb[18].mxu1 %v3930_v46 }
 0x433   : > { %7107 = vmatpush3.bf16.msra.mxu1 %v7104_v30  ;;  %6452 = vmatprep.mubr.f32.mxu1 %v8817_v56  ;;  %v7120_v56 = vpack.c.bf16 %v4356_v61, %v4355_v26 }
 0x434   : > { %7109 = vmatprep.subr.bf16.mxu1 %v7108_v53 }
 0x436   : > { %6453 = vmatmul.mubr.f32.vlgmr.msra.gmra.mrb[4].mxu1 %v8821_v54  ;;  %v7124_v54 = vpack.c.bf16 %v4358_v34, %v4357_v45 }
 0x437   : > { %7111 = vmatpush3.bf16.msra.mxu1 %v7108_v53  ;;  %6455 = vmatprep.mubr.f32.mxu1 %v8823_v8  ;;  %v4359_v8 = vld [vmem:[#allocation9 + $0x50] sm:$0xff] }
 0x438   : > { %7113 = vmatprep.subr.bf16.mxu1 %v7112_v38 }
 0x43a   : > { %6456 = vmatmul.mubr.f32.gmra.mrb[6].mxu1 %v8827_v28  ;;  %v7128_v28 = vpack.c.bf16 %v4360_v13, %v4359_v8 }
 0x43b   : > { %7115 = vmatpush3.bf16.msra.mxu1 %v7112_v38  ;;  %6458 = vmatprep.mubr.f32.mxu1 %v8829_v47  ;;  %v4361_v47 = vld [vmem:[#allocation9 + $0x60] sm:$0xff] }
 0x43c   : > { %7117 = vmatprep.subr.bf16.mxu1 %v7116_v51 }
 0x43e   : > { %6459 = vmatmul.mubr.f32.gmra.mrb[8].mxu1 %v8833_v4  ;;  %v7132_v4 = vpack.c.bf16 %v4362_v2, %v4361_v47 }
 0x43f   : > { %7119 = vmatpush3.bf16.msra.mxu1 %v7116_v51  ;;  %6461 = vmatprep.mubr.f32.mxu1 %v8835_v31  ;;  %v4363_v31 = vld [vmem:[#allocation9 + $0x70] sm:$0xff] }
 0x440   : > { %7121 = vmatprep.subr.bf16.mxu1 %v7120_v56 }
 0x442   : > { %6462 = vmatmul.mubr.f32.gmra.mrb[10].mxu1 %v8839_v14  ;;  %v4123_v14 = vld [vmem:[#allocation2 + $0xda] sm:$0xff] }
 0x443   : > { %7123 = vmatpush3.bf16.msra.mxu1 %v7120_v56  ;;  %6464 = vmatprep.mubr.f32.mxu1 %v8841_v24  ;;  %v7136_v24 = vpack.c.bf16 %v4364_v39, %v4363_v31 }
 0x444   : > { %7125 = vmatprep.subr.bf16.mxu1 %v7124_v54 }
 0x446   : > { %6465 = vmatmul.mubr.f32.gmra.mrb[12].mxu1 %v8845_v40  ;;  %v4124_v40 = vld [vmem:[#allocation2 + $0xe2] sm:$0xff] }
 0x447   : > { %7127 = vmatpush3.bf16.msra.mxu1 %v7124_v54  ;;  %6467 = vmatprep.mubr.f32.mxu1 %v8847_v59 }
 0x448   : > { %7129 = vmatprep.subr.bf16.mxu1 %v7128_v28 }
 0x44a   : > { %6468 = vmatmul.mubr.f32.gmra.mrb[14].mxu1 %v8851_v37 }
 0x44b   : > { %7131 = vmatpush3.bf16.msra.mxu1 %v7128_v28  ;;  %6470 = vmatprep.mubr.f32.mxu1 %v8907_v11 }
 0x44c   : > { %7133 = vmatprep.subr.bf16.mxu1 %v7132_v4 }
 0x44e   : > { %6471 = vmatmul.mubr.f32.gmra.mrb[16].mxu1 %v8911_v42 }
 0x44f   : > { %7135 = vmatpush3.bf16.msra.mxu1 %v7132_v4  ;;  %6473 = vmatprep.mubr.f32.mxu1 %v4123_v14 }
 0x450   : > { %7137 = vmatprep.subr.bf16.mxu1 %v7136_v24 }
 0x452   : > { %6474 = vmatmul.mubr.f32.gmra.mrb[18].mxu1 %v4124_v40 }
 0x453   : > { %7139 = vmatpush3.bf16.msra.mxu1 %v7136_v24  ;;  %6508 = vmatprep.mubr.f32.mxu1 %v8240_v62  ;;  %v9245_v62 = vld [vmem:[#allocation20_spill] sm:$0xff] }
 0x456   : > { %6509 = vmatmul.mubr.f32.vlgmr.msra.gmra.mrb[20].mxu1 %v8256_v7  ;;  %v9246_v7 = vld [vmem:[#allocation21_spill] sm:$0xff] }
 0x457   : > { %6511 = vmatprep.mubr.f32.mxu1 %v8260_v9  ;;  %v9247_v9 = vld [vmem:[#allocation22_spill] sm:$0xff] }
 0x45a   : > { %6512 = vmatmul.mubr.f32.gmra.mrb[22].mxu1 %v8276_v20  ;;  %v9248_v20 = vld [vmem:[#allocation23_spill] sm:$0xff] }
 0x45b   : > { %6514 = vmatprep.mubr.f32.mxu1 %v8280_v23  ;;  %v9249_v23 = vld [vmem:[#allocation24_spill] sm:$0xff] }
 0x45e   : > { %6515 = vmatmul.mubr.f32.gmra.mrb[24].mxu1 %v8296_v33 }
 0x45f   : > { %6517 = vmatprep.mubr.f32.mxu1 %v8300_v35 }
 0x462   : > { %6518 = vmatmul.mubr.f32.gmra.mrb[26].mxu1 %v8316_v49 }
 0x463   : > { %6520 = vmatprep.mubr.f32.mxu1 %v8320_v52 }
 0x466   : > { %6521 = vmatmul.mubr.f32.gmra.mrb[28].mxu1 %v8330_v0 }
 0x467   : > { %6523 = vmatprep.mubr.f32.mxu1 %v8334_v3 }
 0x46a   : > { %6524 = vmatmul.mubr.f32.gmra.mrb[30].mxu1 %v9245_v62 }
 0x46b   : > { %6526 = vmatprep.mubr.f32.mxu1 %v9246_v7 }
 0x46e   : > { %6527 = vmatmul.mubr.f32.gmra.mrb[32].mxu1 %v9247_v9 }
 0x46f   : > { %6529 = vmatprep.mubr.f32.mxu1 %v9248_v20 }
 0x472   : > { %6530 = vmatmul.mubr.f32.gmra.mrb[34].mxu1 %v9249_v23 }
 0x509   : > { %v6454_v33 = vpop.f32.mrb[4].mxu1 }
 0x50a   : > { %v4208_v35 = vpop.f32.mrb[5].mxu1  ;;  %v4311_v19 = vmul.f32 %v6454_v33, %v8987_v17 }
 0x50b   : > { %v4310_v21 = vmul.f32 %v8987_v17, %v4208_v35 }
 0x50c   : > { %v4334_v18 = vadd.f32 %v9002_v50, %v4311_v19 }
 0x50d   : > { %v6457_v59 = vpop.f32.mrb[6].mxu1  ;;  %v4333_v15 = vadd.f32 %v9002_v50, %v4310_v21 }
 0x50e   : > { %v4218_v49 = vpop.f32.mrb[7].mxu1  ;;  %v4313_v29 = vmul.f32 %v6457_v59, %v8987_v17 }
 0x50f   : > { %v4312_v16 = vmul.f32 %v8987_v17, %v4218_v49 }
 0x510   : > { %v4336_v38 = vadd.f32 %v9002_v50, %v4313_v29 }
 0x511   : > { %v6460_v37 = vpop.f32.mrb[8].mxu1  ;;  %v4335_v26 = vadd.f32 %v9002_v50, %v4312_v16 }
 0x512   : > { %v4228_v52 = vpop.f32.mrb[9].mxu1  ;;  %v4315_v27 = vmul.f32 %v6460_v37, %v8987_v17 }
 0x513   : > { %v4314_v61 = vmul.f32 %v8987_v17, %v4228_v52 }
 0x514   : > { %v4338_v2 = vadd.f32 %v9002_v50, %v4315_v27 }
 0x515   : > { %v6463_v11 = vpop.f32.mrb[10].mxu1  ;;  %v4337_v14 = vadd.f32 %v9002_v50, %v4314_v61 }
 0x516   : > { %v4238_v0 = vpop.f32.mrb[11].mxu1  ;;  %v4317_v4 = vmul.f32 %v6463_v11, %v8987_v17 }
 0x517   : > { %v4316_v24 = vmul.f32 %v8987_v17, %v4238_v0 }
 0x518   : > { %v4340_v59 = vadd.f32 %v9002_v50, %v4317_v4 }
 0x519   : > { %v8972_v42 = vpop.f32.mrb[12].mxu1  ;;  %v4339_v11 = vadd.f32 %v9002_v50, %v4316_v24 }
 0x51a   : > { %v8974_v3 = vpop.f32.mrb[13].mxu1  ;;  %v4319_v49 = vmul.f32 %v8972_v42, %v8987_v17 }
 0x51b   : > { %v4318_v0 = vmul.f32 %v8987_v17, %v8974_v3 }
 0x51c   : > { %v4342_v29 = vadd.f32 %v9002_v50, %v4319_v49 }
 0x51d   : > { %v8976_v57 = vpop.f32.mrb[14].mxu1  ;;  %v4341_v16 = vadd.f32 %v9002_v50, %v4318_v0 }
 0x51e   : > { %v8978_v60 = vpop.f32.mrb[15].mxu1  ;;  %v4321_v3 = vmul.f32 %v8976_v57, %v8987_v17 }
 0x520   : > { %v4344_v27 = vadd.f32 %v9002_v50, %v4321_v3 }
 0x521   : > { %v8980_v41 = vpop.f32.mrb[16].mxu1 }
 0x522   : > { %v8982_v10 = vpop.f32.mrb[17].mxu1 }
 0x523   : > { %v4322_v61 = vmul.f32 %v8987_v17, %v8982_v10 }
 0x525   : > { %v8989_v48 = vpop.f32.mrb[18].mxu1 }
 0x526   : > { %v8991_v5 = vpop.f32.mrb[19].mxu1  ;;  %v4325_v10 = vmul.f32 %v8989_v48, %v8987_v17 }
 0x529   : > { %v6510_v63 = vpop.f32.mrb[20].mxu1 }
 0x52a   : > { %v4518_v6 = vmul.f32 %v6510_v63, %v8996_v58  ;;  %v4431_v22 = vpop.f32.mrb[21].mxu1 }
 0x52b   : > { %v4517_v55 = vmul.f32 %v8996_v58, %v4431_v22 }
 0x52c   : > { %v4541_v43 = vadd.f32 %v9008_v32, %v4518_v6 }
 0x52d   : > { %v4540_v30 = vadd.f32 %v9008_v32, %v4517_v55  ;;  %v6513_v44 = vpop.f32.mrb[22].mxu1 }
 0x52e   : > { %v4557_v25 = vadd.f32 %v4541_v43, %v4334_v18  ;;  %v4520_v46 = vmul.f32 %v6513_v44, %v8996_v58  ;;  %v4441_v53 = vpop.f32.mrb[23].mxu1 }
 0x52f   : > { %v4556_v12 = vadd.f32 %v4540_v30, %v4333_v15  ;;  %v4519_v1 = vmul.f32 %v8996_v58, %v4441_v53  ;;  %v4320_v30 = vmul.f32 %v8987_v17, %v8978_v60  ;;  %v4323_v60 = vmul.f32 %v8980_v41, %v8987_v17 }
 0x530   : > { %v4573_v36 = vmax.f32 %v4557_v25, 0.0  ;;  %v4543_v51 = vadd.f32 %v9008_v32, %v4520_v46 }
 0x531   : > { %v4572_v56 = vmax.f32 %v4556_v12, 0.0  ;;  %v4542_v45 = vadd.f32 %v9008_v32, %v4519_v1  ;;  %v6516_v34 = vpop.f32.mrb[24].mxu1 }
 0x532   : > { %4589 = vst [vmem:[%s8724_s2 + $0x8] sm:$0xff] %v4573_v36  ;;  %v4559_v54 = vadd.f32 %v4543_v51, %v4336_v38  ;;  %v4522_v8 = vmul.f32 %v6516_v34, %v8996_v58  ;;  %v4451_v13 = vpop.f32.mrb[25].mxu1 }
 0x533   : > { %4588 = vst [vmem:[%s8724_s2] sm:$0xff] %v4572_v56  ;;  %v4558_v28 = vadd.f32 %v4542_v45, %v4335_v26  ;;  %v4521_v47 = vmul.f32 %v8996_v58, %v4451_v13  ;;  %v4343_v26 = vadd.f32 %v9002_v50, %v4320_v30 }
 0x534   : > { %v4575_v31 = vmax.f32 %v4559_v54, 0.0  ;;  %v4545_v39 = vadd.f32 %v9008_v32, %v4522_v8 }
 0x535   : > { %v4574_v40 = vmax.f32 %v4558_v28, 0.0  ;;  %v4544_v62 = vadd.f32 %v9008_v32, %v4521_v47  ;;  %v6519_v7 = vpop.f32.mrb[26].mxu1  ;;  %v4346_v47 = vadd.f32 %v9002_v50, %v4323_v60 }
 0x536   : > { %4591 = vst [vmem:[%s8724_s2 + $0x18] sm:$0xff] %v4575_v31  ;;  %v4561_v9 = vadd.f32 %v4545_v39, %v4338_v2  ;;  %v4524_v20 = vmul.f32 %v6519_v7, %v8996_v58  ;;  %v4461_v23 = vpop.f32.mrb[27].mxu1  ;;  %v4345_v31 = vadd.f32 %v9002_v50, %v4322_v61  ;;  %v4324_v39 = vmul.f32 %v8987_v17, %v8991_v5 }
 0x537   : > { %4590 = vst [vmem:[%s8724_s2 + $0x10] sm:$0xff] %v4574_v40  ;;  %v4560_v33 = vadd.f32 %v4544_v62, %v4337_v14  ;;  %v4523_v35 = vmul.f32 %v8996_v58, %v4461_v23  ;;  %v4348_v23 = vadd.f32 %v9002_v50, %v4325_v10 }
 0x538   : > { %v4577_v37 = vmax.f32 %v4561_v9, 0.0  ;;  %v4547_v52 = vadd.f32 %v9008_v32, %v4524_v20 }
 0x539   : > { %v4576_v19 = vmax.f32 %v4560_v33, 0.0  ;;  %v4546_v21 = vadd.f32 %v9008_v32, %v4523_v35  ;;  %v6522_v63 = vpop.f32.mrb[28].mxu1  ;;  %v4347_v33 = vadd.f32 %v9002_v50, %v4324_v39 }
 0x53a   : > { %4593 = vst [vmem:[%s8724_s2 + $0x28] sm:$0xff] %v4577_v37  ;;  %v4563_v6 = vadd.f32 %v4547_v52, %v4340_v59  ;;  %v4526_v22 = vmul.f32 %v6522_v63, %v8996_v58  ;;  %v4471_v55 = vpop.f32.mrb[29].mxu1 }
 0x53b   : > { %4592 = vst [vmem:[%s8724_s2 + $0x20] sm:$0xff] %v4576_v19  ;;  %v4562_v42 = vadd.f32 %v4546_v21, %v4339_v11  ;;  %v4525_v18 = vmul.f32 %v8996_v58, %v4471_v55 }
 0x53c   : > { %v4579_v43 = vmax.f32 %v4563_v6, 0.0  ;;  %v4549_v15 = vadd.f32 %v9008_v32, %v4526_v22 }
 0x53d   : > { %v4578_v44 = vmax.f32 %v4562_v42, 0.0  ;;  %v4548_v25 = vadd.f32 %v9008_v32, %v4525_v18  ;;  %v6525_v46 = vpop.f32.mrb[30].mxu1 }
 0x53e   : > { %4595 = vst [vmem:[%s8724_s2 + $0x38] sm:$0xff] %v4579_v43  ;;  %v4565_v53 = vadd.f32 %v4549_v15, %v4342_v29  ;;  %v4528_v12 = vmul.f32 %v6525_v46, %v8996_v58  ;;  %v4481_v1 = vpop.f32.mrb[31].mxu1 }
 0x53f   : > { %4594 = vst [vmem:[%s8724_s2 + $0x30] sm:$0xff] %v4578_v44  ;;  %v4564_v57 = vadd.f32 %v4548_v25, %v4341_v16  ;;  %v4527_v38 = vmul.f32 %v8996_v58, %v4481_v1 }
 0x540   : > { %v4581_v36 = vmax.f32 %v4565_v53, 0.0  ;;  %v4551_v51 = vadd.f32 %v9008_v32, %v4528_v12 }
 0x541   : > { %v4580_v56 = vmax.f32 %v4564_v57, 0.0  ;;  %v4550_v45 = vadd.f32 %v9008_v32, %v4527_v38  ;;  %v6528_v34 = vpop.f32.mrb[32].mxu1 }
 0x542   : > { %4597 = vst [vmem:[%s8724_s2 + $0x48] sm:$0xff] %v4581_v36  ;;  %v4567_v54 = vadd.f32 %v4551_v51, %v4344_v27  ;;  %v4530_v8 = vmul.f32 %v6528_v34, %v8996_v58  ;;  %v4491_v13 = vpop.f32.mrb[33].mxu1 }
 0x543   : > { %4596 = vst [vmem:[%s8724_s2 + $0x40] sm:$0xff] %v4580_v56  ;;  %v4566_v41 = vadd.f32 %v4550_v45, %v4343_v26  ;;  %v4529_v28 = vmul.f32 %v8996_v58, %v4491_v13 }
 0x544   : > { %v4583_v2 = vmax.f32 %v4567_v54, 0.0  ;;  %v4553_v4 = vadd.f32 %v9008_v32, %v4530_v8 }
 0x545   : > { %v4582_v14 = vmax.f32 %v4566_v41, 0.0  ;;  %v4552_v24 = vadd.f32 %v9008_v32, %v4529_v28  ;;  %v6531_v40 = vpop.f32.mrb[34].mxu1 }
 0x546   : > { %4599 = vst [vmem:[%s8724_s2 + $0x58] sm:$0xff] %v4583_v2  ;;  %v4569_v62 = vadd.f32 %v4553_v4, %v4346_v47  ;;  %v4532_v7 = vmul.f32 %v6531_v40, %v8996_v58  ;;  %v4501_v48 = vpop.f32.mrb[35].mxu1 }
 0x547   : > { %4598 = vst [vmem:[%s8724_s2 + $0x50] sm:$0xff] %v4582_v14  ;;  %v4568_v9 = vadd.f32 %v4552_v24, %v4345_v31  ;;  %v4531_v20 = vmul.f32 %v8996_v58, %v4501_v48 }
 0x548   : > { %v4585_v17 = vmax.f32 %v4569_v62, 0.0  ;;  %v4555_v5 = vadd.f32 %v9008_v32, %v4532_v7 }
 0x549   : > { %v4584_v35 = vmax.f32 %v4568_v9, 0.0  ;;  %v4554_v59 = vadd.f32 %v9008_v32, %v4531_v20 }
 0x54a   : > { %4601 = vst [vmem:[%s8724_s2 + $0x68] sm:$0xff] %v4585_v17  ;;  %v4571_v49 = vadd.f32 %v4555_v5, %v4348_v23 }
 0x54b   : > { %4600 = vst [vmem:[%s8724_s2 + $0x60] sm:$0xff] %v4584_v35  ;;  %v4570_v58 = vadd.f32 %v4554_v59, %v4347_v33 }
 0x54c   : > { %v4587_v37 = vmax.f32 %v4571_v49, 0.0 }
 0x54d   : > { %v4586_v50 = vmax.f32 %v4570_v58, 0.0 }
 0x54e   : > { %4603 = vst [vmem:[%s8724_s2 + $0x78] sm:$0xff] %v4587_v37 }
 0x54f   : > { %4602 = vst [vmem:[%s8724_s2 + $0x70] sm:$0xff] %v4586_v50 }
 0x550   : > { %7714 = shalt.err (!%p7711_p7)
}
 0x551   : > { %s7715_s4 = scalar_lea.hbm %s9100_s26, 2048  ;;  %s7719_s30 = scalar_lea.hbm %s9256_s25, 8192 }
 0x552   : > { %p7716_p3 = scmp.ne.s32.totalorder %s9100_s26, %s7715_s4  ;;  %p7720_p11 = scmp.lt.u32.totalorder %s9100_s26, %s9256_s25 }
 0x553   : > { %p7721_p10 = scmp.lt.u32.totalorder %s7719_s30, %s7715_s4  ;;  %p7723_p9 = scmp.lt.u32.totalorder %s7715_s4, %s9100_s26 }
 0x554   : > { %p7717_p0 = pnand %p7716_p3, %p9257_p5 }
 0x555   : > { %p7722_p2 = por %p7721_p10, %p7720_p11 }
 0x556   : > { %p7718_p1 = pneg %p7717_p0 }
 0x557   : > { %p7724_p13 = por %p7723_p9, %p7722_p2 }
 0x559   : > { %p7725_p6 = pnand %p7724_p13, %p7718_p1 }
 0x55b   : > { %7728 = shalt.err (!%p7725_p6)
}
 0x55c   : > { %s7843_s1 = smov 128   ;;  %s7844_s13 = smov 8  }
 0x55d   : > { %7461 = dma.vmem_to_hbm [thread:$0]  (%p9257_p5), %s9102_s29, 2048, %s9100_s26, %s9108_s28, %s7843_s1, %s7843_s1, %s7844_s13  }
 0x55e PF: > { %s9258_s12 = sld [smem:[#allocation16_spill]]  ;;  %s9259_s11 = sld [smem:[#allocation19_spill]] }
 0x55f   : > { %p7488_p8 = scmp.ge.s32.totalorder %s7831_s23, 2 }
 0x564   : > { %s4636_s20 = sand.u32 1, %s9258_s12   ;;  %p9260_p12 = scmp.ne.s32.totalorder %s9259_s11, 0 }
 0x565   : > { %s4637_s3 = scalar_lea.sflag [#allocation5], %s4636_s20 }
 0x566   : > { %p7478_p4 = pnand %p7488_p8, %p9260_p12 }
 0x568   : > { %7786 = dma.done.wait (!%p7478_p4), %s4637_s3, 2048  }
 0x569   : > { %7788 = vsyncadd (!%p7478_p4), %s4637_s3, 4294965248  ;;  %s28_s23 = sadd.s32 1, %s7831_s23   ;;  %s9261_s13 = smov %s7795_s14 }
 0x56a   : > { %p25_p7 = scmp.ge.s32.totalorder %s28_s23, 6   ;;  %s9262_s14 = smov %s7799_s15 }
 0x56b   : > { %s9263_s15 = smov %s8107_s27  ;;  %s9264_s16 = smov %s7807_s17 }
 0x56c   : > { %s9265_s17 = smov %s7811_s18  ;;  %s9266_s18 = smov %s8102_s9 }
 0x56d   : > { %s9267_s19 = smov %s7823_s21  ;;  %s9268_s20 = smov %s7827_s22 }
 0x56e   : > { %s9269_s21 = smov %s9272_s6  ;;  %s9270_s22 = smov %s9276_s24 }
 0x56f   :  { %27 = sbr.rel (!%p25_p7) target bundleno = 21 (0x15), region = 145 }
 0x576   :  { %4642 = vsyncpa [#allocation4], 1 }
 0x577   :  { %4644 = vsyncpa [#allocation4 + $0x1], 1 }
 0x578   :  { %4645 = vsyncpa [#allocation7], 1 }
 0x579   :  { %4646 = vsyncpa [#allocation10], 1 }
 0x57a   :  { %4647 = vsyncpa [#allocation5], 1 }
 0x57b   :  { %4649 = vsyncpa [#allocation5 + $0x1], 1 }

</bundles_post_ra>
